<compile_context>
chip_gen: v7x
topology: tpu7x:2x2x1
jax: 0.10.0
libtpu: 0.0.40
codegen_flags: <defaults>
</compile_context>

<pallas_src>
import jax
import jax.numpy as jnp
from jax.experimental import pallas as pl
from jax.experimental.pallas import tpu as pltpu

NEG_SLOPE = 0.01   # nn.LeakyReLU default
FEAT = 1024        # hard-coded in the batch_norm=False branch of the module


def _leaky_relu(x):
    return jnp.where(x > 0, x, NEG_SLOPE * x)


def _make_kernel(n_points, tn):
    rem = n_points % tn

    def kernel(x_ref, w1_ref, b1_ref, w2_ref, b2_ref, w3_ref, b3_ref, o_ref):
        nt = pl.program_id(1)

        @pl.when(nt == 0)
        def _():
            o_ref[...] = jnp.full(o_ref.shape, -jnp.inf, o_ref.dtype)

        x = x_ref[0].astype(jnp.bfloat16)            # (6, TN), channel-major

        # Conv1d(6 -> 64, k=1) + LeakyReLU:   (64, 6) @ (6, TN)
        h1 = jnp.dot(w1_ref[...], x, preferred_element_type=jnp.float32) + b1_ref[...]
        h1 = _leaky_relu(h1).astype(jnp.bfloat16)    # (64, TN)

        # Conv1d(64 -> 128, k=1) + LeakyReLU: (128, 64) @ (64, TN)
        h2 = jnp.dot(w2_ref[...], h1, preferred_element_type=jnp.float32) + b2_ref[...]
        h2 = _leaky_relu(h2).astype(jnp.bfloat16)    # (128, TN)

        # Conv1d(128 -> 1024, k=1): dominant matmul, bf16 on MXU, f32 accum.
        h3 = jnp.dot(w3_ref[...], h2, preferred_element_type=jnp.float32) + b3_ref[...]

        if rem != 0:
            # Tail tile: points past N are padding; exclude them from the max.
            col = jax.lax.broadcasted_iota(jnp.int32, h3.shape, 1)
            h3 = jnp.where(nt * tn + col < n_points, h3, -jnp.inf)

        # AdaptiveMaxPool1d(1): running max over the point (lane) axis.
        blk_max = jnp.max(h3, axis=1, keepdims=True)            # (1024, 1)
        o_ref[0] = jnp.maximum(o_ref[0], blk_max)

    return kernel


def pointfeat_cnn(x_ncw, params, *, tn=512):
    """x_ncw: (B, 6, N) float32 NCW input (PyTorch layout). Returns .squeeze()'d output."""
    w1, b1, w2, b2, w3, b3 = params      # w: (out, in) f32, b: (out, 1) f32
    B, c_in, N = x_ncw.shape
    assert c_in == 6

    if N <= tn:
        TN = N                            # single tile; last block dim == full dim
    else:
        assert tn % 128 == 0, "point tile must be a multiple of 128 lanes"
        TN = tn
    n_tiles = pl.cdiv(N, TN)

    # One-time host-side bf16 cast of the weights (native MXU rate in-kernel).
    w1b, w2b, w3b = (w.astype(jnp.bfloat16) for w in (w1, w2, w3))

    # Constant index maps -> weights/biases DMA'd once, resident in VMEM.
    resident = lambda shape: pl.BlockSpec(shape, lambda b, t: (0, 0))

    out = pl.pallas_call(
        _make_kernel(N, TN),
        out_shape=jax.ShapeDtypeStruct((B, FEAT, 1), jnp.float32),
        grid_spec=pltpu.PrefetchScalarGridSpec(
            num_scalar_prefetch=0,
            grid=(B, n_tiles),                         # reduction (N tiles) axis last
            in_specs=[
                pl.BlockSpec((1, 6, TN), lambda b, t: (b, 0, t)),   # x tile (NCW)
                resident((64, 6)),    resident((64, 1)),
                resident((128, 64)),  resident((128, 1)),
                resident((FEAT, 128)), resident((FEAT, 1)),
            ],
            out_specs=pl.BlockSpec((1, FEAT, 1), lambda b, t: (b, 0, 0)),
        ),
        compiler_params=pltpu.CompilerParams(
            dimension_semantics=("parallel", "arbitrary")),
    )(x_ncw, w1b, b1, w2b, b2, w3b, b3)

    # PyTorch: (B, 1024, 1).squeeze() -> (B, 1024) for B > 1, (1024,) for B == 1.
    return jnp.squeeze(out)


def init_params(key):
    """Deterministic synthetic params. Conv1d weight (out,in,1) stored as (out,in), bias as (out,1)."""
    ks = jax.random.split(key, 6)

    def w(k, cin, cout):
        bound = 1.0 / jnp.sqrt(cin)
        return jax.random.uniform(k, (cout, cin), jnp.float32, -bound, bound)

    def b(k, cin, cout):
        bound = 1.0 / jnp.sqrt(cin)
        return jax.random.uniform(k, (cout, 1), jnp.float32, -bound, bound)

    return (w(ks[0], 6, 64),     b(ks[1], 6, 64),
            w(ks[2], 64, 128),   b(ks[3], 64, 128),
            w(ks[4], 128, FEAT), b(ks[5], 128, FEAT))


def pointfeat_cnn_ref(x_ncw, params):
    """Pure-JAX f32 reference of the PyTorch forward."""
    w1, b1, w2, b2, w3, b3 = params
    h = _leaky_relu(jnp.einsum("oc,bcn->bon", w1, x_ncw) + b1[None])   # (B, 64, N)
    h = _leaky_relu(jnp.einsum("oc,bcn->bon", w2, h) + b2[None])       # (B, 128, N)
    h = jnp.einsum("oc,bcn->bon", w3, h) + b3[None]                    # (B, 1024, N)
    return jnp.squeeze(jnp.max(h, axis=-1))                            # (B, 1024)


if __name__ == "__main__":
    key = jax.random.PRNGKey(0)
    k_x, k_x2, k_p = jax.random.split(key, 3)
    params = init_params(k_p)

    # Small shape consistent with the module: B=2, C=6, N=16 points.
    B, C, N = 2, 6, 16
    x = jax.random.normal(k_x, (B, C, N), jnp.float32)
    out = jax.block_until_ready(pointfeat_cnn(x, params))
    ref = pointfeat_cnn_ref(x, params)
    assert out.shape == (B, FEAT), out.shape
    # bf16 matmuls (f32 accumulation) vs f32 reference -> loosened tolerance.
    assert jnp.allclose(out, ref, atol=3e-2, rtol=3e-2), float(jnp.max(jnp.abs(out - ref)))

    # Exercise the tiled + tail-masked accumulator path (N not a multiple of TN).
    B2, N2 = 2, 200
    x2 = jax.random.normal(k_x2, (B2, C, N2), jnp.float32)
    out2 = jax.block_until_ready(pointfeat_cnn(x2, params, tn=128))
    ref2 = pointfeat_cnn_ref(x2, params)
    assert out2.shape == (B2, FEAT), out2.shape
    assert jnp.allclose(out2, ref2, atol=3e-2, rtol=3e-2), float(jnp.max(jnp.abs(out2 - ref2)))

    print("KERNEL_OK")
</pallas_src>

<mosaic_0001>
module attributes {stable_mosaic.version = 11 : i64} {
  func.func @kernel(%arg0: i32, %arg1: i32, %arg2: memref<1x6x16xf32, #tpu.memory_space<vmem>>, %arg3: memref<64x6xbf16, #tpu.memory_space<vmem>>, %arg4: memref<64x1xf32, #tpu.memory_space<vmem>>, %arg5: memref<128x64xbf16, #tpu.memory_space<vmem>>, %arg6: memref<128x1xf32, #tpu.memory_space<vmem>>, %arg7: memref<1024x128xbf16, #tpu.memory_space<vmem>>, %arg8: memref<1024x1xf32, #tpu.memory_space<vmem>>, %arg9: memref<1x1024x1xf32, #tpu.memory_space<vmem>>) attributes {dimension_semantics = [#tpu.dimension_semantics<parallel>, #tpu.dimension_semantics<arbitrary>], iteration_bounds = array<i64: 2, 1>, scalar_prefetch = 0 : i64, scratch_operands = 0 : i64, tpu.core_type = #tpu.core_type<tc>, window_params = [{transform_indices = @transform_0, window_bounds = array<i64: 1, 6, 16>}, {pipeline_mode = #tpu.pipeline_mode<synchronous>, transform_indices = @transform_1, window_bounds = array<i64: 64, 6>}, {pipeline_mode = #tpu.pipeline_mode<synchronous>, transform_indices = @transform_2, window_bounds = array<i64: 64, 1>}, {pipeline_mode = #tpu.pipeline_mode<synchronous>, transform_indices = @transform_3, window_bounds = array<i64: 128, 64>}, {pipeline_mode = #tpu.pipeline_mode<synchronous>, transform_indices = @transform_4, window_bounds = array<i64: 128, 1>}, {pipeline_mode = #tpu.pipeline_mode<synchronous>, transform_indices = @transform_5, window_bounds = array<i64: 1024, 128>}, {pipeline_mode = #tpu.pipeline_mode<synchronous>, transform_indices = @transform_6, window_bounds = array<i64: 1024, 1>}, {transform_indices = @transform_7, window_bounds = array<i64: 1, 1024, 1>}]} {
    %c0_i32 = arith.constant 0 : i32
    %0 = arith.cmpi eq, %arg1, %c0_i32 : i32
    %1 = arith.extui %0 : i1 to i32
    %c0_i32_0 = arith.constant 0 : i32
    %2 = arith.cmpi ne, %1, %c0_i32_0 : i32
    scf.if %2 {
      %cst_28 = arith.constant 0xFF800000 : f32
      %41 = vector.broadcast %cst_28 : f32 to vector<1x1024x1xf32>
      %c0_29 = arith.constant 0 : index
      %c0_30 = arith.constant 0 : index
      %c0_31 = arith.constant 0 : index
      %42 = vector.load %arg9[%c0_29, %c0_30, %c0_31] : memref<1x1024x1xf32, #tpu.memory_space<vmem>>, vector<1x1024x1xf32>
      tpu.vector_store %arg9[%c0_29, %c0_30, %c0_31], %41 {strides = array<i32>} : memref<1x1024x1xf32, #tpu.memory_space<vmem>>, vector<1x1024x1xf32>,
    } else {
    }
    %c0 = arith.constant 0 : index
    %c0_1 = arith.constant 0 : index
    %c0_2 = arith.constant 0 : index
    %3 = vector.load %arg2[%c0, %c0_1, %c0_2] : memref<1x6x16xf32, #tpu.memory_space<vmem>>, vector<1x6x16xf32>
    %4 = vector.shape_cast %3 : vector<1x6x16xf32> to vector<6x16xf32>
    %5 = arith.truncf %4 : vector<6x16xf32> to vector<6x16xbf16>
    %c0_3 = arith.constant 0 : index
    %c0_4 = arith.constant 0 : index
    %6 = vector.load %arg3[%c0_3, %c0_4] : memref<64x6xbf16, #tpu.memory_space<vmem>>, vector<64x6xbf16>
    %cst = arith.constant dense<0.000000e+00> : vector<64x16xf32>
    %7 = tpu.matmul %6, %5, %cst {dimension_numbers = #tpu.dot_dimension_numbers<[1], [0], [0], [1], [0, 0, 1, 1], [], []>} : vector<64x6xbf16>, vector<6x16xbf16>, vector<64x16xf32> -> vector<64x16xf32>
    %c0_5 = arith.constant 0 : index
    %c0_6 = arith.constant 0 : index
    %8 = vector.load %arg4[%c0_5, %c0_6] : memref<64x1xf32, #tpu.memory_space<vmem>>, vector<64x1xf32>
    %9 = vector.broadcast %8 : vector<64x1xf32> to vector<64x16xf32>
    %10 = arith.addf %7, %9 : vector<64x16xf32>
    %cst_7 = arith.constant 0.000000e+00 : f32
    %11 = vector.broadcast %cst_7 : f32 to vector<64x16xf32>
    %12 = arith.cmpf ogt, %10, %11 : vector<64x16xf32>
    %cst_8 = arith.constant 0.00999999977 : f32
    %13 = vector.broadcast %cst_8 : f32 to vector<64x16xf32>
    %14 = arith.mulf %13, %10 : vector<64x16xf32>
    %15 = arith.select %12, %10, %14 : vector<64x16xi1>, vector<64x16xf32>
    %16 = arith.truncf %15 : vector<64x16xf32> to vector<64x16xbf16>
    %c0_9 = arith.constant 0 : index
    %c0_10 = arith.constant 0 : index
    %17 = vector.load %arg5[%c0_9, %c0_10] : memref<128x64xbf16, #tpu.memory_space<vmem>>, vector<128x64xbf16>
    %cst_11 = arith.constant dense<0.000000e+00> : vector<128x16xf32>
    %18 = tpu.matmul %17, %16, %cst_11 {dimension_numbers = #tpu.dot_dimension_numbers<[1], [0], [0], [1], [0, 0, 1, 1], [], []>} : vector<128x64xbf16>, vector<64x16xbf16>, vector<128x16xf32> -> vector<128x16xf32>
    %c0_12 = arith.constant 0 : index
    %c0_13 = arith.constant 0 : index
    %19 = vector.load %arg6[%c0_12, %c0_13] : memref<128x1xf32, #tpu.memory_space<vmem>>, vector<128x1xf32>
    %20 = vector.broadcast %19 : vector<128x1xf32> to vector<128x16xf32>
    %21 = arith.addf %18, %20 : vector<128x16xf32>
    %cst_14 = arith.constant 0.000000e+00 : f32
    %22 = vector.broadcast %cst_14 : f32 to vector<128x16xf32>
    %23 = arith.cmpf ogt, %21, %22 : vector<128x16xf32>
    %cst_15 = arith.constant 0.00999999977 : f32
    %24 = vector.broadcast %cst_15 : f32 to vector<128x16xf32>
    %25 = arith.mulf %24, %21 : vector<128x16xf32>
    %26 = arith.select %23, %21, %25 : vector<128x16xi1>, vector<128x16xf32>
    %27 = arith.truncf %26 : vector<128x16xf32> to vector<128x16xbf16>
    %c0_16 = arith.constant 0 : index
    %c0_17 = arith.constant 0 : index
    %28 = vector.load %arg7[%c0_16, %c0_17] : memref<1024x128xbf16, #tpu.memory_space<vmem>>, vector<1024x128xbf16>
    %cst_18 = arith.constant dense<0.000000e+00> : vector<1024x16xf32>
    %29 = tpu.matmul %28, %27, %cst_18 {dimension_numbers = #tpu.dot_dimension_numbers<[1], [0], [0], [1], [0, 0, 1, 1], [], []>} : vector<1024x128xbf16>, vector<128x16xbf16>, vector<1024x16xf32> -> vector<1024x16xf32>
    %c0_19 = arith.constant 0 : index
    %c0_20 = arith.constant 0 : index
    %30 = vector.load %arg8[%c0_19, %c0_20] : memref<1024x1xf32, #tpu.memory_space<vmem>>, vector<1024x1xf32>
    %31 = vector.broadcast %30 : vector<1024x1xf32> to vector<1024x16xf32>
    %32 = arith.addf %29, %31 : vector<1024x16xf32>
    %cst_21 = arith.constant dense<0xFF800000> : vector<1024xf32>
    %33 = vector.multi_reduction <maximumf>, %32, %cst_21 [1] : vector<1024x16xf32> to vector<1024xf32>
    %34 = vector.shape_cast %33 : vector<1024xf32> to vector<1024x1xf32>
    %c0_22 = arith.constant 0 : index
    %c0_23 = arith.constant 0 : index
    %c0_24 = arith.constant 0 : index
    %35 = vector.load %arg9[%c0_22, %c0_23, %c0_24] : memref<1x1024x1xf32, #tpu.memory_space<vmem>>, vector<1x1024x1xf32>
    %36 = vector.shape_cast %35 : vector<1x1024x1xf32> to vector<1024x1xf32>
    %37 = arith.maximumf %36, %34 : vector<1024x1xf32>
    %c0_25 = arith.constant 0 : index
    %c0_26 = arith.constant 0 : index
    %c0_27 = arith.constant 0 : index
    %38 = vector.load %arg9[%c0_25, %c0_26, %c0_27] : memref<1x1024x1xf32, #tpu.memory_space<vmem>>, vector<1x1024x1xf32>
    %39 = vector.shape_cast %38 : vector<1x1024x1xf32> to vector<1024x1xf32>
    %40 = vector.shape_cast %37 : vector<1024x1xf32> to vector<1x1024x1xf32>
    tpu.vector_store %arg9[%c0_25, %c0_26, %c0_27], %40 {strides = array<i32>} : memref<1x1024x1xf32, #tpu.memory_space<vmem>>, vector<1x1024x1xf32>,
    return
  }
  func.func @transform_0(%arg0: i32, %arg1: i32) -> (i32, i32, i32) {
    %c0_i32 = arith.constant 0 : i32
    %c0_i32_0 = arith.constant 0 : i32
    return %arg0, %c0_i32, %arg1 : i32, i32, i32
  }
  func.func @transform_1(%arg0: i32, %arg1: i32) -> (i32, i32) {
    %c0_i32 = arith.constant 0 : i32
    %c0_i32_0 = arith.constant 0 : i32
    %c0_i32_1 = arith.constant 0 : i32
    return %c0_i32, %c0_i32_0 : i32, i32
  }
  func.func @transform_2(%arg0: i32, %arg1: i32) -> (i32, i32) {
    %c0_i32 = arith.constant 0 : i32
    %c0_i32_0 = arith.constant 0 : i32
    %c0_i32_1 = arith.constant 0 : i32
    return %c0_i32, %c0_i32_0 : i32, i32
  }
  func.func @transform_3(%arg0: i32, %arg1: i32) -> (i32, i32) {
    %c0_i32 = arith.constant 0 : i32
    %c0_i32_0 = arith.constant 0 : i32
    %c0_i32_1 = arith.constant 0 : i32
    return %c0_i32, %c0_i32_0 : i32, i32
  }
  func.func @transform_4(%arg0: i32, %arg1: i32) -> (i32, i32) {
    %c0_i32 = arith.constant 0 : i32
    %c0_i32_0 = arith.constant 0 : i32
    %c0_i32_1 = arith.constant 0 : i32
    return %c0_i32, %c0_i32_0 : i32, i32
  }
  func.func @transform_5(%arg0: i32, %arg1: i32) -> (i32, i32) {
    %c0_i32 = arith.constant 0 : i32
    %c0_i32_0 = arith.constant 0 : i32
    %c0_i32_1 = arith.constant 0 : i32
    return %c0_i32, %c0_i32_0 : i32, i32
  }
  func.func @transform_6(%arg0: i32, %arg1: i32) -> (i32, i32) {
    %c0_i32 = arith.constant 0 : i32
    %c0_i32_0 = arith.constant 0 : i32
    %c0_i32_1 = arith.constant 0 : i32
    return %c0_i32, %c0_i32_0 : i32, i32
  }
  func.func @transform_7(%arg0: i32, %arg1: i32) -> (i32, i32, i32) {
    %c0_i32 = arith.constant 0 : i32
    %c0_i32_0 = arith.constant 0 : i32
    %c0_i32_1 = arith.constant 0 : i32
    return %arg0, %c0_i32, %c0_i32_0 : i32, i32, i32
  }
}

</mosaic_0001>

<bundles_post_ra>
// kernel: tpu_custom_call.1
= control target key start
LH: loop header
LB: loop body
LE: loop exit
PB: predicated region body
PF: predicated region fallthrough
CT: control target
= control target key end

     0   :  { %s4165_s24 = smov 0   ;;  %s4167_s25 = smov 0   ;;  %s6582_s0 = inlined_call_operand.vmem [shape: f32[2,6,16], index: 0, kind: input, shape index: {}]   ;;  %s6583_s1 = inlined_call_operand.vmem [shape: bf16[64,6], index: 1, kind: input, shape index: {}]   ;;  %s6584_s2 = inlined_call_operand.vmem [shape: f32[64,1], index: 2, kind: input, shape index: {}]   ;;  %s6585_s3 = inlined_call_operand.vmem [shape: bf16[128,64], index: 3, kind: input, shape index: {}]   ;;  %s6586_s4 = inlined_call_operand.vmem [shape: f32[128,1], index: 4, kind: input, shape index: {}]   ;;  %s6587_s5 = inlined_call_operand.vmem [shape: bf16[1024,128], index: 5, kind: input, shape index: {}]   ;;  %s6588_s6 = inlined_call_operand.vmem [shape: f32[1024,1], index: 6, kind: input, shape index: {}]   ;;  %s6589_s7 = inlined_call_operand.vmem [shape: f32[2,1024,1], index: 7, kind: output, shape index: {}]  }
   0x1   :  { %s4169_s26 = smov 0  }
   0x2 LB: > { %s29_s27 = sadd.s32 1, %s4117_s25  ;;  %p3616_p0 = scmp.ge.s32.totalorder %s4121_s26, 1  ;;  %s4121_s26 = sphi %s4169_s26, %s17_s26   ;;  %s4117_s25 = sphi %s4167_s25, %s6755_s25   ;;  %s4113_s24 = sphi %s4165_s24, %s6754_s24  }
   0x3   : > { %p31_p1 = scmp.ge.s32.totalorder %s29_s27, 2  ;;  %p253_p2 = scmp.lt.s32.totalorder %s4121_s26, 3 }
   0x5   : > { %s6757_s27 = smov (%p31_p1, %s29_s27), 0  ;;  %p254_p3 = pnand %p3616_p0, %p253_p2 }
   0x7   : > { %257 = sbr.rel (%p254_p3) target bundleno = 1180 (0x49c), region = 48 }
   0xe   : > { %v445_v0 = vld [vmem:[%s6584_s2 + $0x10] sm:$0xff]  ;;  %v443_v1 = vld [vmem:[%s6584_s2] sm:$0xff]  ;;  %p287_p4 = scmp.lt.s32.totalorder %s4113_s24, 1  ;;  %v4123_v2 = vmov 0   ;;  %v446_v3 = vld [vmem:[%s6584_s2 + $0x18] sm:$0xff]  ;;  %vm511_vm0 = vcmask 48128  }
   0xf   : > { %4022 = vset.pattern.permute.xlu1 %v4123_v2  ;;  %4021 = vset.pattern.permute.xlu0 %v4123_v2  ;;  %v4023_v4 = vld [vmem:[%s6583_s1] sm:$0xff]   ;;  %v444_v5 = vld [vmem:[%s6584_s2 + $0x8] sm:$0xff]  ;;  %vm524_vm1 = vcmask 1042432   ;;  %v450_v12 = vld [vmem:[%s6584_s2 + $0x38] sm:$0xff]  ;;  %vm773_vm2 = vcmask 523264  }
  0x10   : > { %463 = vperm.xlu1 %4022, %v445_v0   ;;  %453 = vperm.xlu0 %4021, %v443_v1   ;;  %s6759_s24 = smov (!%p287_p4, %s4113_s24), 1  ;;  %v448_v8 = vld [vmem:[%s6584_s2 + $0x28] sm:$0xff]  ;;  %v447_v9 = vld [vmem:[%s6584_s2 + $0x20] sm:$0xff]  ;;  %v4025_v13 = vld [vmem:[%s6583_s1 + $0x10] sm:$0xff]  }
  0x11   : > { %s3617_s15 = sshll.u32 %s6759_s24, 3  ;;  %3802 = vmatprep.mubr.msk.bf16.mxu0 %vm511_vm0, %v4023_v4  ;;  %v4024_v11 = vld [vmem:[%s6583_s1 + $0x8] sm:$0xff]   ;;  %v449_v14 = vld [vmem:[%s6584_s2 + $0x30] sm:$0xff]  ;;  %v637_v16 = vld [vmem:[%s6586_s4] sm:$0xff]  ;;  %s3710_s9 = sshll.u32 %s6759_s24, 10 }
  0x12   : > { %s293_s18 = scalar_lea.vmem %s6582_s0, %s3617_s15  ;;  %v638_v15 = vld [vmem:[%s6586_s4 + $0x8] sm:$0xff]  ;;  %v4026_v17 = vld [vmem:[%s6583_s1 + $0x18] sm:$0xff]   ;;  %v639_v19 = vld [vmem:[%s6586_s4 + $0x10] sm:$0xff]  ;;  %s5155_s12 = scalar_lea.vmem %s6589_s7, %s3710_s9 }
  0x13   : > { %v433_v6 = vld [vmem:[%s293_s18] sm:$0x3f]  ;;  %v640_v18 = vld [vmem:[%s6586_s4 + $0x18] sm:$0xff]  ;;  %v642_v20 = vld [vmem:[%s6586_s4 + $0x28] sm:$0xff] }
  0x14   : > { %468 = vperm.xlu1 %4022, %v446_v3   ;;  %458 = vperm.xlu0 %4021, %v444_v5   ;;  %v434_v7 = vpack.c.bf16 %v433_v6, %v433_v6  ;;  %v641_v21 = vld [vmem:[%s6586_s4 + $0x20] sm:$0xff]  ;;  %v644_v22 = vld [vmem:[%s6586_s4 + $0x38] sm:$0xff]  ;;  %v643_v23 = vld [vmem:[%s6586_s4 + $0x30] sm:$0xff] }
  0x15   : > { %v646_v24 = vld [vmem:[%s6586_s4 + $0x48] sm:$0xff]  ;;  %v645_v25 = vld [vmem:[%s6586_s4 + $0x40] sm:$0xff]  ;;  %v648_v26 = vld [vmem:[%s6586_s4 + $0x58] sm:$0xff] }
  0x16   : > { %3994 = vmatprep.subr.msk.bf16.mxu0 %vm524_vm1, %v434_v7  ;;  %v526_v10 = vsel %vm524_vm1, %v434_v7, 0  ;;  %v647_v27 = vld [vmem:[%s6586_s4 + $0x50] sm:$0xff]  ;;  %v650_v28 = vld [vmem:[%s6586_s4 + $0x68] sm:$0xff]  ;;  %v649_v29 = vld [vmem:[%s6586_s4 + $0x60] sm:$0xff] }
  0x17   : > { %3801 = vmatpush3.bf16.msra.mxu0 %v526_v10  ;;  %v652_v30 = vld [vmem:[%s6586_s4 + $0x78] sm:$0xff]  ;;  %v651_v31 = vld [vmem:[%s6586_s4 + $0x70] sm:$0xff]  ;;  %v1080_v32 = vld [vmem:[%s6588_s6 + $0x8] sm:$0xff] }
  0x18   : > { %478 = vperm.xlu1 %4022, %v448_v8   ;;  %473 = vperm.xlu0 %4021, %v447_v9   ;;  %v1079_v33 = vld [vmem:[%s6588_s6] sm:$0xff]  ;;  %v1082_v34 = vld [vmem:[%s6588_s6 + $0x18] sm:$0xff]  ;;  %v1081_v35 = vld [vmem:[%s6588_s6 + $0x10] sm:$0xff] }
  0x19   : > { %v1084_v36 = vld [vmem:[%s6588_s6 + $0x28] sm:$0xff]  ;;  %v1083_v37 = vld [vmem:[%s6588_s6 + $0x20] sm:$0xff]  ;;  %v1086_v38 = vld [vmem:[%s6588_s6 + $0x38] sm:$0xff] }
  0x1a   : > { %3803 = vmatmul.mubr.msk.bf16.vlgmr.msra.gmra.mrb[0].mxu0 %vm511_vm0, %v4024_v11  ;;  %v1085_v39 = vld [vmem:[%s6588_s6 + $0x30] sm:$0xff]  ;;  %v1088_v40 = vld [vmem:[%s6588_s6 + $0x48] sm:$0xff]  ;;  %v1087_v41 = vld [vmem:[%s6588_s6 + $0x40] sm:$0xff] }
  0x1b   : > { %3806 = vmatprep.mubr.msk.bf16.mxu0 %vm511_vm0, %v4025_v13  ;;  %v1090_v42 = vld [vmem:[%s6588_s6 + $0x58] sm:$0xff]  ;;  %v1089_v43 = vld [vmem:[%s6588_s6 + $0x50] sm:$0xff]  ;;  %v1092_v44 = vld [vmem:[%s6588_s6 + $0x68] sm:$0xff] }
  0x1c   : > { %488 = vperm.xlu1 %4022, %v450_v12   ;;  %483 = vperm.xlu0 %4021, %v449_v14   ;;  %v1091_v45 = vld [vmem:[%s6588_s6 + $0x60] sm:$0xff]  ;;  %v1094_v46 = vld [vmem:[%s6588_s6 + $0x78] sm:$0xff]  ;;  %v1093_v47 = vld [vmem:[%s6588_s6 + $0x70] sm:$0xff] }
  0x1d   : > { %v1096_v48 = vld [vmem:[%s6588_s6 + $0x88] sm:$0xff]  ;;  %v1095_v49 = vld [vmem:[%s6588_s6 + $0x80] sm:$0xff]  ;;  %v1098_v50 = vld [vmem:[%s6588_s6 + $0x98] sm:$0xff] }
  0x1e   : > { %v1097_v51 = vld [vmem:[%s6588_s6 + $0x90] sm:$0xff]  ;;  %v1100_v52 = vld [vmem:[%s6588_s6 + $0xa8] sm:$0xff]  ;;  %v1099_v53 = vld [vmem:[%s6588_s6 + $0xa0] sm:$0xff] }
  0x1f   : > { %v1102_v54 = vld [vmem:[%s6588_s6 + $0xb8] sm:$0xff]  ;;  %v1101_v55 = vld [vmem:[%s6588_s6 + $0xb0] sm:$0xff]  ;;  %v1104_v56 = vld [vmem:[%s6588_s6 + $0xc8] sm:$0xff] }
  0x20   : > { %660 = vperm.xlu1 %4022, %v638_v15   ;;  %655 = vperm.xlu0 %4021, %v637_v16   ;;  %v1103_v57 = vld [vmem:[%s6588_s6 + $0xc0] sm:$0xff]  ;;  %v1106_v58 = vld [vmem:[%s6588_s6 + $0xd8] sm:$0xff]  ;;  %v1105_v59 = vld [vmem:[%s6588_s6 + $0xd0] sm:$0xff] }
  0x21   : > { %v1108_v60 = vld [vmem:[%s6588_s6 + $0xe8] sm:$0xff]  ;;  %v1107_v61 = vld [vmem:[%s6588_s6 + $0xe0] sm:$0xff]  ;;  %v1110_v62 = vld [vmem:[%s6588_s6 + $0xf8] sm:$0xff] }
  0x22   : > { %3807 = vmatmul.mubr.msk.bf16.gmra.mrb[4].mxu0 %vm511_vm0, %v4026_v17  ;;  %v1109_v63 = vld [vmem:[%s6588_s6 + $0xf0] sm:$0xff]  ;;  %v1112_v0 = vld [vmem:[%s6588_s6 + $0x108] sm:$0xff]  ;;  %v1111_v1 = vld [vmem:[%s6588_s6 + $0x100] sm:$0xff] }
  0x23   : > { %v1114_v2 = vld [vmem:[%s6588_s6 + $0x118] sm:$0xff]  ;;  %v1113_v3 = vld [vmem:[%s6588_s6 + $0x110] sm:$0xff]  ;;  %v1116_v4 = vld [vmem:[%s6588_s6 + $0x128] sm:$0xff] }
  0x24   : > { %670 = vperm.xlu1 %4022, %v640_v18   ;;  %665 = vperm.xlu0 %4021, %v639_v19   ;;  %v1115_v5 = vld [vmem:[%s6588_s6 + $0x120] sm:$0xff]  ;;  %v1118_v7 = vld [vmem:[%s6588_s6 + $0x138] sm:$0xff]  ;;  %v1117_v8 = vld [vmem:[%s6588_s6 + $0x130] sm:$0xff] }
  0x25   : > { %v4027_v6 = vld [vmem:[%s6585_s3] sm:$0xff]   ;;  %v1120_v9 = vld [vmem:[%s6588_s6 + $0x148] sm:$0xff]  ;;  %v1122_v11 = vld [vmem:[%s6588_s6 + $0x158] sm:$0xff] }
  0x26   : > { %3818 = vmatprep.mubr.msk.bf16.mxu1 %vm773_vm2, %v4027_v6  ;;  %v1119_v10 = vld [vmem:[%s6588_s6 + $0x140] sm:$0xff]  ;;  %v1121_v12 = vld [vmem:[%s6588_s6 + $0x150] sm:$0xff]  ;;  %v1124_v13 = vld [vmem:[%s6588_s6 + $0x168] sm:$0xff] }
  0x27   : > { %v1123_v14 = vld [vmem:[%s6588_s6 + $0x160] sm:$0xff]  ;;  %v1126_v15 = vld [vmem:[%s6588_s6 + $0x178] sm:$0xff]  ;;  %v1125_v16 = vld [vmem:[%s6588_s6 + $0x170] sm:$0xff] }
  0x28   : > { %680 = vperm.xlu1 %4022, %v642_v20   ;;  %675 = vperm.xlu0 %4021, %v641_v21   ;;  %v1128_v17 = vld [vmem:[%s6588_s6 + $0x188] sm:$0xff]  ;;  %v1127_v18 = vld [vmem:[%s6588_s6 + $0x180] sm:$0xff]  ;;  %v1130_v21 = vld [vmem:[%s6588_s6 + $0x198] sm:$0xff] }
  0x2c   : > { %690 = vperm.xlu1 %4022, %v644_v22   ;;  %685 = vperm.xlu0 %4021, %v643_v23   ;;  %v1129_v22 = vld [vmem:[%s6588_s6 + $0x190] sm:$0xff]  ;;  %v1132_v23 = vld [vmem:[%s6588_s6 + $0x1a8] sm:$0xff] }
  0x30   : > { %700 = vperm.xlu1 %4022, %v646_v24   ;;  %695 = vperm.xlu0 %4021, %v645_v25   ;;  %v1131_v25 = vld [vmem:[%s6588_s6 + $0x1a0] sm:$0xff] }
  0x34   : > { %710 = vperm.xlu1 %4022, %v648_v26   ;;  %705 = vperm.xlu0 %4021, %v647_v27   ;;  %v1134_v27 = vld [vmem:[%s6588_s6 + $0x1b8] sm:$0xff] }
  0x38   : > { %720 = vperm.xlu1 %4022, %v650_v28   ;;  %715 = vperm.xlu0 %4021, %v649_v29   ;;  %v1133_v28 = vld [vmem:[%s6588_s6 + $0x1b0] sm:$0xff] }
  0x3c   : > { %730 = vperm.xlu1 %4022, %v652_v30   ;;  %725 = vperm.xlu0 %4021, %v651_v31   ;;  %v1136_v31 = vld [vmem:[%s6588_s6 + $0x1c8] sm:$0xff] }
  0x40   : > { %1214 = vperm.xlu1 %4022, %v1080_v32   ;;  %1209 = vperm.xlu0 %4021, %v1079_v33   ;;  %v1135_v32 = vld [vmem:[%s6588_s6 + $0x1c0] sm:$0xff]  ;;  %v1138_v33 = vld [vmem:[%s6588_s6 + $0x1d8] sm:$0xff] }
  0x44   : > { %1224 = vperm.xlu1 %4022, %v1082_v34   ;;  %1219 = vperm.xlu0 %4021, %v1081_v35   ;;  %v1137_v35 = vld [vmem:[%s6588_s6 + $0x1d0] sm:$0xff] }
  0x48   : > { %1234 = vperm.xlu1 %4022, %v1084_v36   ;;  %1229 = vperm.xlu0 %4021, %v1083_v37   ;;  %v1140_v37 = vld [vmem:[%s6588_s6 + $0x1e8] sm:$0xff] }
  0x4c   : > { %1244 = vperm.xlu1 %4022, %v1086_v38   ;;  %1239 = vperm.xlu0 %4021, %v1085_v39   ;;  %v1139_v38 = vld [vmem:[%s6588_s6 + $0x1e0] sm:$0xff] }
  0x50   : > { %1254 = vperm.xlu1 %4022, %v1088_v40   ;;  %1249 = vperm.xlu0 %4021, %v1087_v41   ;;  %v1142_v41 = vld [vmem:[%s6588_s6 + $0x1f8] sm:$0xff] }
  0x54   : > { %1264 = vperm.xlu1 %4022, %v1090_v42   ;;  %1259 = vperm.xlu0 %4021, %v1089_v43   ;;  %v1141_v42 = vld [vmem:[%s6588_s6 + $0x1f0] sm:$0xff]  ;;  %v1144_v43 = vld [vmem:[%s6588_s6 + $0x208] sm:$0xff] }
  0x58   : > { %1274 = vperm.xlu1 %4022, %v1092_v44   ;;  %1269 = vperm.xlu0 %4021, %v1091_v45   ;;  %v1143_v45 = vld [vmem:[%s6588_s6 + $0x200] sm:$0xff] }
  0x5c   : > { %1284 = vperm.xlu1 %4022, %v1094_v46   ;;  %1279 = vperm.xlu0 %4021, %v1093_v47   ;;  %v1146_v47 = vld [vmem:[%s6588_s6 + $0x218] sm:$0xff] }
  0x60   : > { %1294 = vperm.xlu1 %4022, %v1096_v48   ;;  %1289 = vperm.xlu0 %4021, %v1095_v49   ;;  %v1145_v48 = vld [vmem:[%s6588_s6 + $0x210] sm:$0xff] }
  0x64   : > { %1304 = vperm.xlu1 %4022, %v1098_v50   ;;  %1299 = vperm.xlu0 %4021, %v1097_v51   ;;  %v1148_v51 = vld [vmem:[%s6588_s6 + $0x228] sm:$0xff] }
  0x68   : > { %1314 = vperm.xlu1 %4022, %v1100_v52   ;;  %1309 = vperm.xlu0 %4021, %v1099_v53   ;;  %v1147_v52 = vld [vmem:[%s6588_s6 + $0x220] sm:$0xff]  ;;  %v1150_v53 = vld [vmem:[%s6588_s6 + $0x238] sm:$0xff] }
  0x6c   : > { %1324 = vperm.xlu1 %4022, %v1102_v54   ;;  %1319 = vperm.xlu0 %4021, %v1101_v55   ;;  %v1149_v55 = vld [vmem:[%s6588_s6 + $0x230] sm:$0xff] }
  0x70   : > { %1334 = vperm.xlu1 %4022, %v1104_v56   ;;  %1329 = vperm.xlu0 %4021, %v1103_v57   ;;  %v1152_v57 = vld [vmem:[%s6588_s6 + $0x248] sm:$0xff] }
  0x74   : > { %1344 = vperm.xlu1 %4022, %v1106_v58   ;;  %1339 = vperm.xlu0 %4021, %v1105_v59   ;;  %v1151_v58 = vld [vmem:[%s6588_s6 + $0x240] sm:$0xff] }
  0x78   : > { %1354 = vperm.xlu1 %4022, %v1108_v60   ;;  %1349 = vperm.xlu0 %4021, %v1107_v61   ;;  %v1154_v61 = vld [vmem:[%s6588_s6 + $0x258] sm:$0xff] }
  0x7c   : > { %1364 = vperm.xlu1 %4022, %v1110_v62   ;;  %1359 = vperm.xlu0 %4021, %v1109_v63   ;;  %v1153_v62 = vld [vmem:[%s6588_s6 + $0x250] sm:$0xff]  ;;  %v1156_v63 = vld [vmem:[%s6588_s6 + $0x268] sm:$0xff] }
  0x80   : > { %1374 = vperm.xlu1 %4022, %v1112_v0   ;;  %1369 = vperm.xlu0 %4021, %v1111_v1   ;;  %v1155_v1 = vld [vmem:[%s6588_s6 + $0x260] sm:$0xff] }
  0x84   : > { %1384 = vperm.xlu1 %4022, %v1114_v2   ;;  %1379 = vperm.xlu0 %4021, %v1113_v3   ;;  %v1158_v3 = vld [vmem:[%s6588_s6 + $0x278] sm:$0xff] }
  0x88   : > { %1394 = vperm.xlu1 %4022, %v1116_v4   ;;  %1389 = vperm.xlu0 %4021, %v1115_v5   ;;  %v1157_v4 = vld [vmem:[%s6588_s6 + $0x270] sm:$0xff] }
  0x8c   : > { %1404 = vperm.xlu1 %4022, %v1118_v7   ;;  %1399 = vperm.xlu0 %4021, %v1117_v8   ;;  %v1160_v7 = vld [vmem:[%s6588_s6 + $0x288] sm:$0xff]  ;;  %v1159_v8 = vld [vmem:[%s6588_s6 + $0x280] sm:$0xff] }
  0x8f   : > { %v4431_v19 = vpop.permute.xlu1 %463  ;;  %v4433_v20 = vpop.permute.xlu0 %453 }
  0x90   : > { %1414 = vperm.xlu1 %4022, %v1120_v9   ;;  %1409 = vperm.xlu0 %4021, %v1119_v10   ;;  %v1162_v9 = vld [vmem:[%s6588_s6 + $0x298] sm:$0xff] }
  0x93   : > { %v4444_v24 = vpop.permute.xlu1 %468  ;;  %v4449_v26 = vpop.permute.xlu0 %458 }
  0x94   : > { %1424 = vperm.xlu1 %4022, %v1122_v11   ;;  %1419 = vperm.xlu0 %4021, %v1121_v12   ;;  %v1161_v11 = vld [vmem:[%s6588_s6 + $0x290] sm:$0xff] }
  0x97   : > { %v4457_v29 = vpop.permute.xlu1 %478  ;;  %v4459_v30 = vpop.permute.xlu0 %473 }
  0x98   : > { %1434 = vperm.xlu1 %4022, %v1124_v13   ;;  %1429 = vperm.xlu0 %4021, %v1123_v14   ;;  %v1164_v13 = vld [vmem:[%s6588_s6 + $0x2a8] sm:$0xff]  ;;  %v1163_v14 = vld [vmem:[%s6588_s6 + $0x2a0] sm:$0xff] }
  0x9b   : > { %v4470_v34 = vpop.permute.xlu1 %488  ;;  %v4475_v36 = vpop.permute.xlu0 %483 }
  0x9c   : > { %1444 = vperm.xlu1 %4022, %v1126_v15   ;;  %1439 = vperm.xlu0 %4021, %v1125_v16  }
  0x9f   : > { %v4483_v39 = vpop.permute.xlu1 %660  ;;  %v4485_v40 = vpop.permute.xlu0 %655 }
  0xa0   : > { %1454 = vperm.xlu1 %4022, %v1128_v17   ;;  %1449 = vperm.xlu0 %4021, %v1127_v18   ;;  %v1166_v17 = vld [vmem:[%s6588_s6 + $0x2b8] sm:$0xff]  ;;  %v1165_v18 = vld [vmem:[%s6588_s6 + $0x2b0] sm:$0xff] }
  0xa3   : > { %v4496_v44 = vpop.permute.xlu1 %670  ;;  %v4501_v46 = vpop.permute.xlu0 %665 }
  0xa4   : > { %1464 = vperm.xlu1 %4022, %v1130_v21   ;;  %1459 = vperm.xlu0 %4021, %v1129_v22   ;;  %v1168_v21 = vld [vmem:[%s6588_s6 + $0x2c8] sm:$0xff] }
  0xa7   : > { %v4509_v49 = vpop.permute.xlu1 %680  ;;  %v4511_v50 = vpop.permute.xlu0 %675 }
  0xa8   : > { %1474 = vperm.xlu1 %4022, %v1132_v23   ;;  %1469 = vperm.xlu0 %4021, %v1131_v25   ;;  %v1167_v23 = vld [vmem:[%s6588_s6 + $0x2c0] sm:$0xff] }
  0xab   : > { %v4522_v54 = vpop.permute.xlu1 %690  ;;  %v4527_v56 = vpop.permute.xlu0 %685 }
  0xac   : > { %1484 = vperm.xlu1 %4022, %v1134_v27   ;;  %1479 = vperm.xlu0 %4021, %v1133_v28  }
  0xaf   : > { %v4535_v59 = vpop.permute.xlu1 %700  ;;  %v4537_v60 = vpop.permute.xlu0 %695 }
  0xb0   : > { %1494 = vperm.xlu1 %4022, %v1136_v31   ;;  %1489 = vperm.xlu0 %4021, %v1135_v32  }
  0xb3   : > { %v4548_v0 = vpop.permute.xlu1 %710  ;;  %v4553_v2 = vpop.permute.xlu0 %705 }
  0xb4   : > { %1504 = vperm.xlu1 %4022, %v1138_v33   ;;  %1499 = vperm.xlu0 %4021, %v1137_v35   ;;  %v1170_v35 = vld [vmem:[%s6588_s6 + $0x2d8] sm:$0xff] }
  0xb7   : > { %v4561_v5 = vpop.permute.xlu1 %720  ;;  %v4563_v6 = vpop.permute.xlu0 %715 }
  0xb8   : > { %1514 = vperm.xlu1 %4022, %v1140_v37   ;;  %1509 = vperm.xlu0 %4021, %v1139_v38  }
  0xbb   : > { %v4574_v10 = vpop.permute.xlu1 %730  ;;  %v4579_v12 = vpop.permute.xlu0 %725 }
  0xbc   : > { %1524 = vperm.xlu1 %4022, %v1142_v41   ;;  %1519 = vperm.xlu0 %4021, %v1141_v42   ;;  %v1169_v42 = vld [vmem:[%s6588_s6 + $0x2d0] sm:$0xff] }
  0xbf   : > { %v4587_v15 = vpop.permute.xlu1 %1214  ;;  %v4589_v16 = vpop.permute.xlu0 %1209 }
  0xc0   : > { %1534 = vperm.xlu1 %4022, %v1144_v43   ;;  %1529 = vperm.xlu0 %4021, %v1143_v45  }
  0xc3   : > { %v4600_v22 = vpop.permute.xlu1 %1224  ;;  %v4605_v25 = vpop.permute.xlu0 %1219 }
  0xc4   : > { %1544 = vperm.xlu1 %4022, %v1146_v47   ;;  %1539 = vperm.xlu0 %4021, %v1145_v48  }
  0xc7   : > { %v4617_v45 = vpop.permute.xlu1 %1234  ;;  %v4619_v47 = vpop.permute.xlu0 %1229 }
  0xc8   : > { %1554 = vperm.xlu1 %4022, %v1148_v51   ;;  %1549 = vperm.xlu0 %4021, %v1147_v52   ;;  %v1171_v51 = vld [vmem:[%s6588_s6 + $0x2e0] sm:$0xff] }
  0xcc   : > { %1564 = vperm.xlu1 %4022, %v1150_v53   ;;  %1559 = vperm.xlu0 %4021, %v1149_v55  }
  0xd0   : > { %1574 = vperm.xlu1 %4022, %v1152_v57   ;;  %1569 = vperm.xlu0 %4021, %v1151_v58  }
  0xd4   : > { %1584 = vperm.xlu1 %4022, %v1154_v61   ;;  %1579 = vperm.xlu0 %4021, %v1153_v62  }
  0xd8   : > { %1594 = vperm.xlu1 %4022, %v1156_v63   ;;  %1589 = vperm.xlu0 %4021, %v1155_v1  }
  0xdc   : > { %1604 = vperm.xlu1 %4022, %v1158_v3   ;;  %1599 = vperm.xlu0 %4021, %v1157_v4   ;;  %v1174_v4 = vld [vmem:[%s6588_s6 + $0x2f8] sm:$0xff] }
  0xe0   : > { %1614 = vperm.xlu1 %4022, %v1160_v7   ;;  %1609 = vperm.xlu0 %4021, %v1159_v8   ;;  %v4632_v7 = vpop.permute.xlu1 %1244 }
  0xe4   : > { %1624 = vperm.xlu1 %4022, %v1162_v9   ;;  %1619 = vperm.xlu0 %4021, %v1161_v11  }
  0xe8   : > { %1634 = vperm.xlu1 %4022, %v1164_v13   ;;  %1629 = vperm.xlu0 %4021, %v1163_v14   ;;  %v4638_v13 = vpop.permute.xlu0 %1239 }
  0xec   : > { %1644 = vperm.xlu1 %4022, %v1166_v17   ;;  %1639 = vperm.xlu0 %4021, %v1165_v18   ;;  %v1176_v18 = vld [vmem:[%s6588_s6 + $0x308] sm:$0xff] }
  0xed   : > { %v3804_v27 = vpop.f32.mrb[0].mxu0 }
  0xee   : > { %v571_v28 = vadd.f32 %v3804_v27, %v4431_v19  ;;  %v562_v31 = vpop.f32.mrb[1].mxu0 }
  0xef   : > { %v563_v32 = vadd.f32 %v562_v31, %v4433_v20  ;;  %v3805_v33 = vpop.f32.mrb[2].mxu0 }
  0xf0   : > { %1654 = vperm.xlu1 %4022, %v1168_v21   ;;  %1649 = vperm.xlu0 %4021, %v1167_v23   ;;  %v603_v37 = vmul.f32 0.01, %v571_v28  ;;  %v574_v38 = vadd.f32 %v3805_v33, %v4444_v24  ;;  %v565_v41 = vpop.f32.mrb[3].mxu0  ;;  %vm595_vm3 = vcmp.gt.f32.partialorder %v571_v28, 0.0  ;;  %v1172_v24 = vld [vmem:[%s6588_s6 + $0x2e8] sm:$0xff]  ;;  %v1175_v21 = vld [vmem:[%s6588_s6 + $0x300] sm:$0xff] }
  0xf1   : > { %v601_v19 = vmul.f32 0.01, %v563_v32  ;;  %v566_v43 = vadd.f32 %v565_v41, %v4449_v26  ;;  %vm593_vm5 = vcmp.gt.f32.partialorder %v563_v32, 0.0  ;;  %v1180_v41 = vld [vmem:[%s6588_s6 + $0x328] sm:$0xff] }
  0xf2   : > { %vm596_vm4 = vcmp.gt.f32.partialorder %v574_v38, 0.0  ;;  %v604_v20 = vmul.f32 0.01, %v574_v38  ;;  %v611_v26 = vsel %vm595_vm3, %v571_v28, %v603_v37  ;;  %v1178_v37 = vld [vmem:[%s6588_s6 + $0x318] sm:$0xff] }
  0xf3   : > { %v602_v48 = vmul.f32 0.01, %v566_v43  ;;  %vm594_vm6 = vcmp.gt.f32.partialorder %v566_v43, 0.0  ;;  %v609_v55 = vsel %vm593_vm5, %v563_v32, %v601_v19  ;;  %v4647_v32 = vpop.permute.xlu1 %1254  ;;  %v1179_v19 = vld [vmem:[%s6588_s6 + $0x320] sm:$0xff] }
  0xf4   : > { %1664 = vperm.xlu1 %4022, %v1170_v35   ;;  %1659 = vperm.xlu0 %4021, %v1169_v42   ;;  %v612_v52 = vsel %vm596_vm4, %v574_v38, %v604_v20  ;;  %v4649_v35 = vpop.permute.xlu0 %1249  ;;  %v1177_v38 = vld [vmem:[%s6588_s6 + $0x310] sm:$0xff] }
  0xf5   : > { %v3808_v53 = vpop.f32.mrb[4].mxu0  ;;  %v610_v57 = vsel %vm594_vm6, %v566_v43, %v602_v48  ;;  %v618_v58 = vpack.c.bf16 %v612_v52, %v611_v26  ;;  %v4028_v43 = vld [vmem:[%s6585_s3 + $0x8] sm:$0xff]   ;;  %v4029_v48 = vld [vmem:[%s6585_s3 + $0x10] sm:$0xff]  }
  0xf6   : > { %v587_v61 = vadd.f32 %v3808_v53, %v4475_v36  ;;  %v578_v62 = vpop.f32.mrb[5].mxu0  ;;  %v617_v63 = vpack.c.bf16 %v610_v57, %v609_v55  ;;  %v1173_v36 = vld [vmem:[%s6588_s6 + $0x2f0] sm:$0xff]  ;;  %v1184_v53 = vld [vmem:[%s6588_s6 + $0x348] sm:$0xff]  ;;  %v1183_v55 = vld [vmem:[%s6588_s6 + $0x340] sm:$0xff] }
  0xf7   : > { %v579_v1 = vadd.f32 %v578_v62, %v4459_v30  ;;  %v3809_v3 = vpop.f32.mrb[6].mxu0  ;;  %v4660_v42 = vpop.permute.xlu1 %1264  ;;  %v4030_v57 = vld [vmem:[%s6585_s3 + $0x18] sm:$0xff]  }
  0xf8   : > { %1674 = vperm.xlu1 %4022, %v1172_v24   ;;  %1669 = vperm.xlu0 %4021, %v1171_v51   ;;  %v607_v8 = vmul.f32 0.01, %v587_v61  ;;  %v590_v9 = vadd.f32 %v3809_v3, %v4470_v34  ;;  %v581_v11 = vpop.f32.mrb[7].mxu0  ;;  %vm599_vm7 = vcmp.gt.f32.partialorder %v587_v61, 0.0  ;;  %v4668_v20 = vpop.permute.xlu0 %1259  ;;  %v1182_v24 = vld [vmem:[%s6588_s6 + $0x338] sm:$0xff]  ;;  %v1181_v51 = vld [vmem:[%s6588_s6 + $0x330] sm:$0xff] }
  0xf9   : > { %3810 = vmatprep.subr.bf16.mxu1 %v617_v63  ;;  %v605_v30 = vmul.f32 0.01, %v579_v1  ;;  %v582_v14 = vadd.f32 %v581_v11, %v4457_v29  ;;  %vm597_vm8 = vcmp.gt.f32.partialorder %v579_v1, 0.0  ;;  %v1188_v3 = vld [vmem:[%s6588_s6 + $0x368] sm:$0xff] }
  0xfa   : > { %3811 = vmatpush3.bf16.msra.mxu1 %v617_v63  ;;  %vm600_vm9 = vcmp.gt.f32.partialorder %v590_v9, 0.0  ;;  %v608_v17 = vmul.f32 0.01, %v590_v9  ;;  %v615_v23 = vsel %vm599_vm7, %v587_v61, %v607_v8  ;;  %v1186_v61 = vld [vmem:[%s6588_s6 + $0x358] sm:$0xff]  ;;  %v1185_v63 = vld [vmem:[%s6588_s6 + $0x350] sm:$0xff]  ;;  %v4032_v8 = vld [vmem:[%s6585_s3 + $0x28] sm:$0xff]  }
  0xfb   : > { %3812 = vmatprep.subr.bf16.mxu1 %v618_v58  ;;  %vm598_vm10 = vcmp.gt.f32.partialorder %v582_v14, 0.0  ;;  %v606_v34 = vmul.f32 0.01, %v582_v14  ;;  %v613_v29 = vsel %vm597_vm8, %v579_v1, %v605_v30  ;;  %v4681_v26 = vpop.permute.xlu1 %1274  ;;  %v1190_v30 = vld [vmem:[%s6588_s6 + $0x378] sm:$0xff] }
  0xfc   : > { %1684 = vperm.xlu1 %4022, %v1174_v4   ;;  %1679 = vperm.xlu0 %4021, %v1173_v36   ;;  %v616_v27 = vsel %vm600_vm9, %v590_v9, %v608_v17  ;;  %v4683_v52 = vpop.permute.xlu0 %1269  ;;  %v1187_v4 = vld [vmem:[%s6588_s6 + $0x360] sm:$0xff]  ;;  %v4033_v9 = vld [vmem:[%s6585_s3 + $0x30] sm:$0xff]   ;;  %v1192_v17 = vld [vmem:[%s6588_s6 + $0x388] sm:$0xff] }
  0xfd   : > { %v614_v28 = vsel %vm598_vm10, %v582_v14, %v606_v34  ;;  %v620_v31 = vpack.c.bf16 %v616_v27, %v615_v23  ;;  %v1189_v14 = vld [vmem:[%s6588_s6 + $0x370] sm:$0xff]  ;;  %v1194_v27 = vld [vmem:[%s6588_s6 + $0x398] sm:$0xff] }
  0xfe   : > { %3813 = vmatpush3.bf16.msra.mxu1 %v618_v58  ;;  %v619_v33 = vpack.c.bf16 %v614_v28, %v613_v29  ;;  %v4031_v58 = vld [vmem:[%s6585_s3 + $0x20] sm:$0xff]   ;;  %v1193_v29 = vld [vmem:[%s6588_s6 + $0x390] sm:$0xff] }
  0xff   : > { %v4700_v62 = vpop.permute.xlu1 %1284 }
 0x100   : > { %1694 = vperm.xlu1 %4022, %v1176_v18   ;;  %1689 = vperm.xlu0 %4021, %v1175_v21   ;;  %v4706_v1 = vpop.permute.xlu0 %1279  ;;  %v1191_v18 = vld [vmem:[%s6588_s6 + $0x380] sm:$0xff]  ;;  %v4034_v21 = vld [vmem:[%s6585_s3 + $0x38] sm:$0xff]  }
 0x101   : > { %3814 = vmatprep.subr.bf16.mxu1 %v619_v33 }
 0x102   : > { %3815 = vmatpush3.bf16.msra.mxu1 %v619_v33  ;;  %v1196_v33 = vld [vmem:[%s6588_s6 + $0x3a8] sm:$0xff] }
 0x103   : > { %3816 = vmatprep.subr.bf16.mxu1 %v620_v31  ;;  %v4721_v11 = vpop.permute.xlu1 %1294 }
 0x104   : > { %1704 = vperm.xlu1 %4022, %v1178_v37   ;;  %1699 = vperm.xlu0 %4021, %v1177_v38   ;;  %v4723_v36 = vpop.permute.xlu0 %1289  ;;  %v1195_v37 = vld [vmem:[%s6588_s6 + $0x3a0] sm:$0xff]  ;;  %v1198_v38 = vld [vmem:[%s6588_s6 + $0x3b8] sm:$0xff] }
 0x106   : > { %3817 = vmatpush3.bf16.msra.mxu1 %v620_v31 }
 0x107   : > { %v4736_v34 = vpop.permute.xlu1 %1304 }
 0x108   : > { %1714 = vperm.xlu1 %4022, %v1180_v41   ;;  %1709 = vperm.xlu0 %4021, %v1179_v19   ;;  %v4744_v23 = vpop.permute.xlu0 %1299  ;;  %v1197_v19 = vld [vmem:[%s6588_s6 + $0x3b0] sm:$0xff] }
 0x109   : > { %3819 = vmatmul.mubr.msk.bf16.vlgmr.msra.gmra.mrb[0].mxu1 %vm773_vm2, %v4028_v43 }
 0x10a   : > { %3822 = vmatprep.mubr.msk.bf16.mxu1 %vm773_vm2, %v4029_v48  ;;  %v1200_v48 = vld [vmem:[%s6588_s6 + $0x3c8] sm:$0xff] }
 0x10b   : > { %v4753_v28 = vpop.permute.xlu1 %1314 }
 0x10c   : > { %1724 = vperm.xlu1 %4022, %v1182_v24   ;;  %1719 = vperm.xlu0 %4021, %v1181_v51   ;;  %v4755_v31 = vpop.permute.xlu0 %1309  ;;  %v1199_v24 = vld [vmem:[%s6588_s6 + $0x3c0] sm:$0xff] }
 0x10f   : > { %v4766_v41 = vpop.permute.xlu1 %1324 }
 0x110   : > { %1734 = vperm.xlu1 %4022, %v1184_v53   ;;  %1729 = vperm.xlu0 %4021, %v1183_v55   ;;  %v4771_v43 = vpop.permute.xlu0 %1319  ;;  %v1202_v55 = vld [vmem:[%s6588_s6 + $0x3d8] sm:$0xff] }
 0x111   : > { %3823 = vmatmul.mubr.msk.bf16.gmra.mrb[4].mxu1 %vm773_vm2, %v4030_v57  ;;  %v1201_v57 = vld [vmem:[%s6588_s6 + $0x3d0] sm:$0xff] }
 0x112   : > { %3826 = vmatprep.mubr.msk.bf16.mxu1 %vm773_vm2, %v4031_v58  ;;  %v1204_v58 = vld [vmem:[%s6588_s6 + $0x3e8] sm:$0xff] }
 0x113   : > { %v4779_v51 = vpop.permute.xlu1 %1334 }
 0x114   : > { %1744 = vperm.xlu1 %4022, %v1186_v61   ;;  %1739 = vperm.xlu0 %4021, %v1185_v63   ;;  %6590 = vst [vmem:[#allocation2_spill] sm:$0xff] %v4779_v51  ;;  %v4781_v53 = vpop.permute.xlu0 %1329  ;;  %v1203_v63 = vld [vmem:[%s6588_s6 + $0x3e0] sm:$0xff] }
 0x115   : > { %6591 = vst [vmem:[#allocation3_spill] sm:$0xff] %v4781_v53 }
 0x117   : > { %v4792_v61 = vpop.permute.xlu1 %1344 }
 0x118   : > { %1754 = vperm.xlu1 %4022, %v1188_v3   ;;  %1749 = vperm.xlu0 %4021, %v1187_v4   ;;  %6592 = vst [vmem:[#allocation4_spill] sm:$0xff] %v4792_v61  ;;  %v4797_v3 = vpop.permute.xlu0 %1339  ;;  %v1206_v4 = vld [vmem:[%s6588_s6 + $0x3f8] sm:$0xff] }
 0x119   : > { %3827 = vmatmul.mubr.msk.bf16.gmra.mrb[8].mxu1 %vm773_vm2, %v4032_v8  ;;  %v1205_v8 = vld [vmem:[%s6588_s6 + $0x3f0] sm:$0xff] }
 0x11a   : > { %3830 = vmatprep.mubr.msk.bf16.mxu1 %vm773_vm2, %v4033_v9 }
 0x11b   : > { %v4805_v9 = vpop.permute.xlu1 %1354 }
 0x11c   : > { %1764 = vperm.xlu1 %4022, %v1190_v30   ;;  %1759 = vperm.xlu0 %4021, %v1189_v14   ;;  %6593 = vst [vmem:[#allocation5_spill] sm:$0xff] %v4805_v9  ;;  %v4807_v30 = vpop.permute.xlu0 %1349  ;;  %v4035_v14 = vld [vmem:[%s6587_s5] sm:$0xff]  }
 0x11d   : > { %6594 = vst [vmem:[#allocation6_spill] sm:$0xff] %v4807_v30  ;;  %3850 = vmatprep.mubr.bf16.mxu0 %v4035_v14 }
 0x120   : > { %1774 = vperm.xlu1 %4022, %v1192_v17   ;;  %1769 = vperm.xlu0 %4021, %v1191_v18   ;;  %v4036_v17 = vld [vmem:[%s6587_s5 + $0x110] sm:$0xff]  }
 0x121   : > { %3831 = vmatmul.mubr.msk.bf16.gmra.mrb[12].mxu1 %vm773_vm2, %v4034_v21 }
 0x122   : > { %3918 = vmatprep.mubr.bf16.mxu1 %v4036_v17 }
 0x124   : > { %1784 = vperm.xlu1 %4022, %v1194_v27   ;;  %1779 = vperm.xlu0 %4021, %v1193_v29  }
 0x128   : > { %1794 = vperm.xlu1 %4022, %v1196_v33   ;;  %1789 = vperm.xlu0 %4021, %v1195_v37  }
 0x12c   : > { %1804 = vperm.xlu1 %4022, %v1198_v38   ;;  %1799 = vperm.xlu0 %4021, %v1197_v19  }
 0x130   : > { %1814 = vperm.xlu1 %4022, %v1200_v48   ;;  %1809 = vperm.xlu0 %4021, %v1199_v24  }
 0x134   : > { %1824 = vperm.xlu1 %4022, %v1202_v55   ;;  %1819 = vperm.xlu0 %4021, %v1201_v57  }
 0x138   : > { %1834 = vperm.xlu1 %4022, %v1204_v58   ;;  %1829 = vperm.xlu0 %4021, %v1203_v63  }
 0x13c   : > { %1844 = vperm.xlu1 %4022, %v1206_v4   ;;  %1839 = vperm.xlu0 %4021, %v1205_v8  }
 0x1dc   : > { %v3820_v18 = vpop.f32.mrb[0].mxu1 }
 0x1dd   : > { %v841_v21 = vadd.f32 %v3820_v18, %v4501_v46  ;;  %v832_v27 = vpop.f32.mrb[1].mxu1 }
 0x1de   : > { %v833_v29 = vadd.f32 %v832_v27, %v4485_v40  ;;  %v3821_v33 = vpop.f32.mrb[2].mxu1 }
 0x1df   : > { %v913_v37 = vmul.f32 0.01, %v841_v21  ;;  %v844_v38 = vadd.f32 %v3821_v33, %v4496_v44  ;;  %v835_v19 = vpop.f32.mrb[3].mxu1  ;;  %vm897_vm11 = vcmp.gt.f32.partialorder %v841_v21, 0.0 }
 0x1e0   : > { %v911_v48 = vmul.f32 0.01, %v833_v29  ;;  %v836_v24 = vadd.f32 %v835_v19, %v4483_v39  ;;  %vm895_vm12 = vcmp.gt.f32.partialorder %v833_v29, 0.0 }
 0x1e1   : > { %vm898_vm13 = vcmp.gt.f32.partialorder %v844_v38, 0.0  ;;  %v914_v55 = vmul.f32 0.01, %v844_v38  ;;  %v929_v58 = vsel %vm897_vm11, %v841_v21, %v913_v37  ;;  %vm2776_vm11 = vcmask 130048  }
 0x1e2   : > { %vm896_vm14 = vcmp.gt.f32.partialorder %v836_v24, 0.0  ;;  %v912_v57 = vmul.f32 0.01, %v836_v24  ;;  %v927_v46 = vsel %vm895_vm12, %v833_v29, %v911_v48  ;;  %vm304_vm12 = vcmask 7168  }
 0x1e3   : > { %v930_v63 = vsel %vm898_vm13, %v844_v38, %v914_v55 }
 0x1e4   : > { %v944_v4 = vpack.c.bf16 %v930_v63, %v929_v58  ;;  %v928_v8 = vsel %vm896_vm14, %v836_v24, %v912_v57  ;;  %v3824_v40 = vpop.f32.mrb[4].mxu1 }
 0x1e5   : > { %v943_v14 = vpack.c.bf16 %v928_v8, %v927_v46  ;;  %v857_v17 = vadd.f32 %v3824_v40, %v4527_v56  ;;  %v848_v44 = vpop.f32.mrb[5].mxu1 }
 0x1e6   : > { %v849_v18 = vadd.f32 %v848_v44, %v4511_v50  ;;  %v3825_v27 = vpop.f32.mrb[6].mxu1 }
 0x1e7   : > { %v917_v33 = vmul.f32 0.01, %v857_v17  ;;  %v860_v39 = vadd.f32 %v3825_v27, %v4522_v54  ;;  %v851_v19 = vpop.f32.mrb[7].mxu1  ;;  %3834 = vmatprep.subr.bf16.mxu0 %v943_v14  ;;  %3978 = vmatprep.subr.bf16.mxu1 %v943_v14  ;;  %vm901_vm15 = vcmp.gt.f32.partialorder %v857_v17, 0.0 }
 0x1e8   : > { %v915_v21 = vmul.f32 0.01, %v849_v18  ;;  %v852_v29 = vadd.f32 %v851_v19, %v4509_v49  ;;  %3835 = vmatpush3.bf16.msra.mxu0 %v943_v14  ;;  %3986 = vmatpush3.bf16.msra.mxu1 %v943_v14  ;;  %vm899_vm0 = vcmp.gt.f32.partialorder %v849_v18, 0.0 }
 0x1e9   : > { %vm902_vm1 = vcmp.gt.f32.partialorder %v860_v39, 0.0  ;;  %v918_v37 = vmul.f32 0.01, %v860_v39  ;;  %3836 = vmatprep.subr.bf16.mxu0 %v944_v4  ;;  %3979 = vmatprep.subr.bf16.mxu1 %v944_v4  ;;  %v933_v56 = vsel %vm901_vm15, %v857_v17, %v917_v33 }
 0x1ea   : > { %vm900_vm2 = vcmp.gt.f32.partialorder %v852_v29, 0.0  ;;  %v916_v50 = vmul.f32 0.01, %v852_v29  ;;  %v931_v48 = vsel %vm899_vm0, %v849_v18, %v915_v21 }
 0x1eb   : > { %v934_v38 = vsel %vm902_vm1, %v860_v39, %v918_v37 }
 0x1ec   : > { %v946_v54 = vpack.c.bf16 %v934_v38, %v933_v56  ;;  %v932_v24 = vsel %vm900_vm2, %v852_v29, %v916_v50  ;;  %v3828_v55 = vpop.f32.mrb[8].mxu1  ;;  %3837 = vmatpush3.bf16.msra.mxu0 %v944_v4  ;;  %3987 = vmatpush3.bf16.msra.mxu1 %v944_v4 }
 0x1ed   : > { %v945_v57 = vpack.c.bf16 %v932_v24, %v931_v48  ;;  %v873_v49 = vadd.f32 %v3828_v55, %v4553_v2  ;;  %v864_v58 = vpop.f32.mrb[9].mxu1 }
 0x1ee   : > { %v865_v63 = vadd.f32 %v864_v58, %v4537_v60  ;;  %v3829_v46 = vpop.f32.mrb[10].mxu1 }
 0x1ef   : > { %v921_v8 = vmul.f32 0.01, %v873_v49  ;;  %v876_v40 = vadd.f32 %v3829_v46, %v4548_v0  ;;  %v867_v14 = vpop.f32.mrb[11].mxu1  ;;  %3838 = vmatprep.subr.bf16.mxu0 %v945_v57  ;;  %3980 = vmatprep.subr.bf16.mxu1 %v945_v57  ;;  %vm905_vm3 = vcmp.gt.f32.partialorder %v873_v49, 0.0  ;;  %v4039_v46 = vld [vmem:[%s6587_s5 + $0x10] sm:$0xff]  }
 0x1f0   : > { %v919_v17 = vmul.f32 0.01, %v865_v63  ;;  %v868_v44 = vadd.f32 %v867_v14, %v4535_v59  ;;  %3839 = vmatpush3.bf16.msra.mxu0 %v945_v57  ;;  %3988 = vmatpush3.bf16.msra.mxu1 %v945_v57  ;;  %vm903_vm4 = vcmp.gt.f32.partialorder %v865_v63, 0.0  ;;  %v4042_v14 = vld [vmem:[%s6587_s5 + $0x128] sm:$0xff]  }
 0x1f1   : > { %vm906_vm5 = vcmp.gt.f32.partialorder %v876_v40, 0.0  ;;  %v922_v4 = vmul.f32 0.01, %v876_v40  ;;  %3840 = vmatprep.subr.bf16.mxu0 %v946_v54  ;;  %3981 = vmatprep.subr.bf16.mxu1 %v946_v54  ;;  %v937_v2 = vsel %vm905_vm3, %v873_v49, %v921_v8  ;;  %v4040_v8 = vld [vmem:[%s6587_s5 + $0x120] sm:$0xff]  }
 0x1f2   : > { %vm904_vm6 = vcmp.gt.f32.partialorder %v868_v44, 0.0  ;;  %v920_v60 = vmul.f32 0.01, %v868_v44  ;;  %v935_v27 = vsel %vm903_vm4, %v865_v63, %v919_v17  ;;  %v4038_v63 = vld [vmem:[%s6587_s5 + $0x118] sm:$0xff]   ;;  %v4043_v17 = vld [vmem:[%s6587_s5 + $0x20] sm:$0xff]  }
 0x1f3   : > { %v938_v18 = vsel %vm906_vm5, %v876_v40, %v922_v4  ;;  %v4041_v40 = vld [vmem:[%s6587_s5 + $0x18] sm:$0xff]   ;;  %v4045_v4 = vld [vmem:[%s6587_s5 + $0x28] sm:$0xff]  }
 0x1f4   : > { %v948_v0 = vpack.c.bf16 %v938_v18, %v937_v2  ;;  %v936_v33 = vsel %vm904_vm6, %v868_v44, %v920_v60  ;;  %v3832_v39 = vpop.f32.mrb[12].mxu1  ;;  %3841 = vmatpush3.bf16.msra.mxu0 %v946_v54  ;;  %3989 = vmatpush3.bf16.msra.mxu1 %v946_v54  ;;  %v4044_v44 = vld [vmem:[%s6587_s5 + $0x130] sm:$0xff]   ;;  %v4046_v60 = vld [vmem:[%s6587_s5 + $0x138] sm:$0xff]   ;;  %v4048_v18 = vld [vmem:[%s6587_s5 + $0x140] sm:$0xff]  }
 0x1f5   : > { %v947_v19 = vpack.c.bf16 %v936_v33, %v935_v27  ;;  %v889_v59 = vadd.f32 %v3832_v39, %v4579_v12  ;;  %v880_v21 = vpop.f32.mrb[13].mxu1  ;;  %v4047_v2 = vld [vmem:[%s6587_s5 + $0x30] sm:$0xff]   ;;  %v4867_v27 = vpop.permute.xlu0 %1359  ;;  %v4050_v33 = vld [vmem:[%s6587_s5 + $0x148] sm:$0xff]   ;;  %v4051_v39 = vld [vmem:[%s6587_s5 + $0x40] sm:$0xff]  }
 0x1f6   : > { %v881_v29 = vadd.f32 %v880_v21, %v4563_v6  ;;  %v3833_v37 = vpop.f32.mrb[14].mxu1  ;;  %6595 = vst [vmem:[#allocation7_spill] sm:$0xff] %v4867_v27 }
 0x1f7   : > { %v925_v50 = vmul.f32 0.01, %v889_v59  ;;  %v892_v56 = vadd.f32 %v3833_v37, %v4574_v10  ;;  %v883_v38 = vpop.f32.mrb[15].mxu1  ;;  %3842 = vmatprep.subr.bf16.mxu0 %v947_v19  ;;  %3982 = vmatprep.subr.bf16.mxu1 %v947_v19  ;;  %vm909_vm7 = vcmp.gt.f32.partialorder %v889_v59, 0.0  ;;  %v4054_v37 = vld [vmem:[%s6587_s5 + $0x158] sm:$0xff]  }
 0x1f8   : > { %v923_v48 = vmul.f32 0.01, %v881_v29  ;;  %v884_v24 = vadd.f32 %v883_v38, %v4561_v5  ;;  %3843 = vmatpush3.bf16.msra.mxu0 %v947_v19  ;;  %3990 = vmatpush3.bf16.msra.mxu1 %v947_v19  ;;  %vm907_vm8 = vcmp.gt.f32.partialorder %v881_v29, 0.0  ;;  %v4037_v5 = vld [vmem:[%s6587_s5 + $0x8] sm:$0xff]   ;;  %v4052_v19 = vld [vmem:[%s6587_s5 + $0x150] sm:$0xff]  }
 0x1f9   : > { %vm910_vm9 = vcmp.gt.f32.partialorder %v892_v56, 0.0  ;;  %v926_v54 = vmul.f32 0.01, %v892_v56  ;;  %3844 = vmatprep.subr.bf16.mxu0 %v948_v0  ;;  %3983 = vmatprep.subr.bf16.mxu1 %v948_v0  ;;  %v941_v12 = vsel %vm909_vm7, %v889_v59, %v925_v50  ;;  %v4881_v59 = vpop.permute.xlu1 %1364  ;;  %v4883_v21 = vpop.permute.xlu0 %1369  ;;  %v4055_v50 = vld [vmem:[%s6587_s5 + $0x50] sm:$0xff]  }
 0x1fa   : > { %vm908_vm10 = vcmp.gt.f32.partialorder %v884_v24, 0.0  ;;  %v924_v6 = vmul.f32 0.01, %v884_v24  ;;  %v939_v57 = vsel %vm907_vm8, %v881_v29, %v923_v48  ;;  %6596 = vst [vmem:[#allocation8_spill] sm:$0xff] %v4881_v59  ;;  %6597 = vst [vmem:[#allocation9_spill] sm:$0xff] %v4883_v21  ;;  %v4053_v29 = vld [vmem:[%s6587_s5 + $0x48] sm:$0xff]  }
 0x1fb   : > { %v942_v55 = vsel %vm910_vm9, %v892_v56, %v926_v54  ;;  %v4056_v56 = vld [vmem:[%s6587_s5 + $0x160] sm:$0xff]  }
 0x1fc   : > { %v950_v10 = vpack.c.bf16 %v942_v55, %v941_v12  ;;  %v940_v49 = vsel %vm908_vm10, %v884_v24, %v924_v6  ;;  %3845 = vmatpush3.bf16.msra.mxu0 %v948_v0  ;;  %3991 = vmatpush3.bf16.msra.mxu1 %v948_v0  ;;  %v4049_v0 = vld [vmem:[%s6587_s5 + $0x38] sm:$0xff]   ;;  %v4058_v12 = vld [vmem:[%s6587_s5 + $0x168] sm:$0xff]   ;;  %v4059_v55 = vld [vmem:[%s6587_s5 + $0x60] sm:$0xff]  }
 0x1fd   : > { %v949_v58 = vpack.c.bf16 %v940_v49, %v939_v57  ;;  %v4897_v38 = vpop.permute.xlu1 %1374  ;;  %v4899_v48 = vpop.permute.xlu0 %1379  ;;  %v4057_v6 = vld [vmem:[%s6587_s5 + $0x58] sm:$0xff]   ;;  %v4060_v57 = vld [vmem:[%s6587_s5 + $0x170] sm:$0xff]  }
 0x1fe   : > { %6598 = vst [vmem:[#allocation10_spill] sm:$0xff] %v4897_v38  ;;  %6599 = vst [vmem:[#allocation11_spill] sm:$0xff] %v4899_v48 }
 0x1ff   : > { %3846 = vmatprep.subr.bf16.mxu0 %v949_v58  ;;  %3984 = vmatprep.subr.bf16.mxu1 %v949_v58 }
 0x200   : > { %3847 = vmatpush3.bf16.msra.mxu0 %v949_v58  ;;  %3992 = vmatpush3.bf16.msra.mxu1 %v949_v58  ;;  %v4061_v58 = vld [vmem:[%s6587_s5 + $0x68] sm:$0xff]  }
 0x201   : > { %3848 = vmatprep.subr.bf16.mxu0 %v950_v10  ;;  %3985 = vmatprep.subr.bf16.mxu1 %v950_v10  ;;  %v4901_v24 = vpop.permute.xlu1 %1384  ;;  %v4903_v54 = vpop.permute.xlu0 %1389 }
 0x202   : > { %6600 = vst [vmem:[#allocation12_spill] sm:$0xff] %v4901_v24  ;;  %6601 = vst [vmem:[#allocation13_spill] sm:$0xff] %v4903_v54 }
 0x204   : > { %3849 = vmatpush3.bf16.msra.mxu0 %v950_v10  ;;  %3993 = vmatpush3.bf16.msra.mxu1 %v950_v10 }
 0x205   : > { %v4917_v10 = vpop.permute.xlu1 %1394  ;;  %v4919_v49 = vpop.permute.xlu0 %1399 }
 0x206   : > { %6602 = vst [vmem:[#allocation14_spill] sm:$0xff] %v4917_v10  ;;  %6603 = vst [vmem:[#allocation15_spill] sm:$0xff] %v4919_v49 }
 0x207   : > { %3851 = vmatmul.mubr.bf16.vlgmr.msra.gmra.mrb[8].mxu0 %v4037_v5  ;;  %3919 = vmatmul.mubr.bf16.vlgmr.msra.gmra.mrb[16].mxu1 %v4038_v63  ;;  %v4062_v5 = vld [vmem:[%s6587_s5 + $0x178] sm:$0xff]   ;;  %v4063_v63 = vld [vmem:[%s6587_s5 + $0x70] sm:$0xff]  }
 0x208   : > { %3854 = vmatprep.mubr.bf16.mxu0 %v4039_v46  ;;  %3922 = vmatprep.mubr.bf16.mxu1 %v4040_v8  ;;  %v4064_v46 = vld [vmem:[%s6587_s5 + $0x180] sm:$0xff]  }
 0x209   : > { %v4933_v8 = vpop.permute.xlu1 %1404 }
 0x20a   : > { %6604 = vst [vmem:[#allocation16_spill] sm:$0xff] %v4933_v8 }
 0x20f   : > { %3855 = vmatmul.mubr.bf16.gmra.mrb[12].mxu0 %v4041_v40  ;;  %3923 = vmatmul.mubr.bf16.gmra.mrb[20].mxu1 %v4042_v14  ;;  %v4935_v40 = vpop.permute.xlu0 %1409  ;;  %v4065_v14 = vld [vmem:[%s6587_s5 + $0x78] sm:$0xff]  }
 0x210   : > { %3858 = vmatprep.mubr.bf16.mxu0 %v4043_v17  ;;  %3926 = vmatprep.mubr.bf16.mxu1 %v4044_v44  ;;  %6605 = vst [vmem:[#allocation17_spill] sm:$0xff] %v4935_v40  ;;  %v4066_v17 = vld [vmem:[%s6587_s5 + $0x188] sm:$0xff]   ;;  %v4067_v44 = vld [vmem:[%s6587_s5 + $0x80] sm:$0xff]  }
 0x217   : > { %3859 = vmatmul.mubr.bf16.gmra.mrb[16].mxu0 %v4045_v4  ;;  %3927 = vmatmul.mubr.bf16.gmra.mrb[24].mxu1 %v4046_v60  ;;  %v4068_v4 = vld [vmem:[%s6587_s5 + $0x190] sm:$0xff]   ;;  %v4949_v60 = vpop.permute.xlu1 %1414 }
 0x218   : > { %3862 = vmatprep.mubr.bf16.mxu0 %v4047_v2  ;;  %3930 = vmatprep.mubr.bf16.mxu1 %v4048_v18  ;;  %6606 = vst [vmem:[#allocation18_spill] sm:$0xff] %v4949_v60  ;;  %v4951_v2 = vpop.permute.xlu0 %1419 }
 0x219   : > { %6607 = vst [vmem:[#allocation19_spill] sm:$0xff] %v4951_v2 }
 0x21b   : > { %v4953_v18 = vpop.permute.xlu1 %1424 }
 0x21c   : > { %6608 = vst [vmem:[#allocation20_spill] sm:$0xff] %v4953_v18 }
 0x21f   : > { %3863 = vmatmul.mubr.bf16.gmra.mrb[20].mxu0 %v4049_v0  ;;  %3931 = vmatmul.mubr.bf16.gmra.mrb[28].mxu1 %v4050_v33  ;;  %v4955_v0 = vpop.permute.xlu0 %1429  ;;  %v4069_v33 = vld [vmem:[%s6587_s5 + $0x88] sm:$0xff]  }
 0x220   : > { %3866 = vmatprep.mubr.bf16.mxu0 %v4051_v39  ;;  %3934 = vmatprep.mubr.bf16.mxu1 %v4052_v19  ;;  %6609 = vst [vmem:[#allocation21_spill] sm:$0xff] %v4955_v0  ;;  %v4070_v39 = vld [vmem:[%s6587_s5 + $0x198] sm:$0xff]   ;;  %v4071_v19 = vld [vmem:[%s6587_s5 + $0x90] sm:$0xff]  }
 0x227   : > { %3867 = vmatmul.mubr.bf16.gmra.mrb[24].mxu0 %v4053_v29  ;;  %3935 = vmatmul.mubr.bf16.gmra.mrb[32].mxu1 %v4054_v37  ;;  %v4072_v29 = vld [vmem:[%s6587_s5 + $0x1a0] sm:$0xff]   ;;  %v4969_v37 = vpop.permute.xlu1 %1434 }
 0x228   : > { %3870 = vmatprep.mubr.bf16.mxu0 %v4055_v50  ;;  %3938 = vmatprep.mubr.bf16.mxu1 %v4056_v56  ;;  %6610 = vst [vmem:[#allocation22_spill] sm:$0xff] %v4969_v37  ;;  %v4971_v50 = vpop.permute.xlu0 %1439  ;;  %v4073_v56 = vld [vmem:[%s6587_s5 + $0x98] sm:$0xff]  }
 0x229   : > { %6611 = vst [vmem:[#allocation23_spill] sm:$0xff] %v4971_v50 }
 0x22f   : > { %3871 = vmatmul.mubr.bf16.gmra.mrb[28].mxu0 %v4057_v6  ;;  %3939 = vmatmul.mubr.bf16.gmra.mrb[36].mxu1 %v4058_v12  ;;  %v4074_v6 = vld [vmem:[%s6587_s5 + $0x1a8] sm:$0xff]   ;;  %v4075_v12 = vld [vmem:[%s6587_s5 + $0xa0] sm:$0xff]  }
 0x230   : > { %3874 = vmatprep.mubr.bf16.mxu0 %v4059_v55  ;;  %3942 = vmatprep.mubr.bf16.mxu1 %v4060_v57  ;;  %v4076_v55 = vld [vmem:[%s6587_s5 + $0x1b0] sm:$0xff]   ;;  %v4985_v57 = vpop.permute.xlu1 %1444 }
 0x231   : > { %6612 = vst [vmem:[#allocation24_spill] sm:$0xff] %v4985_v57 }
 0x237   : > { %3875 = vmatmul.mubr.bf16.gmra.mrb[32].mxu0 %v4061_v58  ;;  %3943 = vmatmul.mubr.bf16.gmra.mrb[40].mxu1 %v4062_v5  ;;  %v4987_v58 = vpop.permute.xlu0 %1449  ;;  %v4077_v5 = vld [vmem:[%s6587_s5 + $0xa8] sm:$0xff]  }
 0x238   : > { %3878 = vmatprep.mubr.bf16.mxu0 %v4063_v63  ;;  %3946 = vmatprep.mubr.bf16.mxu1 %v4064_v46  ;;  %6613 = vst [vmem:[#allocation25_spill] sm:$0xff] %v4987_v58  ;;  %v4078_v63 = vld [vmem:[%s6587_s5 + $0x1b8] sm:$0xff]   ;;  %v4079_v46 = vld [vmem:[%s6587_s5 + $0xb0] sm:$0xff]  }
 0x23f   : > { %3879 = vmatmul.mubr.bf16.gmra.mrb[36].mxu0 %v4065_v14  ;;  %3947 = vmatmul.mubr.bf16.gmra.mrb[44].mxu1 %v4066_v17  ;;  %v4080_v14 = vld [vmem:[%s6587_s5 + $0x1c0] sm:$0xff]   ;;  %v5001_v17 = vpop.permute.xlu1 %1454 }
 0x240   : > { %3882 = vmatprep.mubr.bf16.mxu0 %v4067_v44  ;;  %3950 = vmatprep.mubr.bf16.mxu1 %v4068_v4  ;;  %6614 = vst [vmem:[#allocation26_spill] sm:$0xff] %v5001_v17  ;;  %v5003_v44 = vpop.permute.xlu0 %1459 }
 0x241   : > { %6615 = vst [vmem:[#allocation27_spill] sm:$0xff] %v5003_v44 }
 0x243   : > { %v5005_v4 = vpop.permute.xlu1 %1464 }
 0x244   : > { %6616 = vst [vmem:[#allocation28_spill] sm:$0xff] %v5005_v4 }
 0x247   : > { %3883 = vmatmul.mubr.bf16.gmra.mrb[40].mxu0 %v4069_v33  ;;  %3951 = vmatmul.mubr.bf16.gmra.mrb[48].mxu1 %v4070_v39  ;;  %v5007_v33 = vpop.permute.xlu0 %1469  ;;  %v4081_v39 = vld [vmem:[%s6587_s5 + $0xb8] sm:$0xff]  }
 0x248   : > { %3886 = vmatprep.mubr.bf16.mxu0 %v4071_v19  ;;  %3954 = vmatprep.mubr.bf16.mxu1 %v4072_v29  ;;  %6617 = vst [vmem:[#allocation29_spill] sm:$0xff] %v5007_v33  ;;  %v4082_v19 = vld [vmem:[%s6587_s5 + $0x1c8] sm:$0xff]   ;;  %v4083_v29 = vld [vmem:[%s6587_s5 + $0xc0] sm:$0xff]  }
 0x24f   : > { %3887 = vmatmul.mubr.bf16.gmra.mrb[44].mxu0 %v4073_v56  ;;  %3955 = vmatmul.mubr.bf16.gmra.mrb[52].mxu1 %v4074_v6  ;;  %v4084_v56 = vld [vmem:[%s6587_s5 + $0x1d0] sm:$0xff]   ;;  %v5021_v6 = vpop.permute.xlu1 %1474 }
 0x250   : > { %3890 = vmatprep.mubr.bf16.mxu0 %v4075_v12  ;;  %3958 = vmatprep.mubr.bf16.mxu1 %v4076_v55  ;;  %6618 = vst [vmem:[#allocation30_spill] sm:$0xff] %v5021_v6  ;;  %v5023_v12 = vpop.permute.xlu0 %1479  ;;  %v4085_v55 = vld [vmem:[%s6587_s5 + $0xc8] sm:$0xff]  }
 0x251   : > { %6619 = vst [vmem:[#allocation31_spill] sm:$0xff] %v5023_v12  ;;  %v4093_v6 = vld [vmem:[%s6587_s5 + $0xe8] sm:$0xff]  }
 0x257   : > { %3891 = vmatmul.mubr.bf16.gmra.mrb[48].mxu0 %v4077_v5  ;;  %3959 = vmatmul.mubr.bf16.gmra.mrb[56].mxu1 %v4078_v63  ;;  %v4086_v5 = vld [vmem:[%s6587_s5 + $0x1d8] sm:$0xff]   ;;  %v4087_v63 = vld [vmem:[%s6587_s5 + $0xd0] sm:$0xff]  }
 0x258   : > { %3894 = vmatprep.mubr.bf16.mxu0 %v4079_v46  ;;  %3962 = vmatprep.mubr.bf16.mxu1 %v4080_v14  ;;  %v4088_v46 = vld [vmem:[%s6587_s5 + $0x1e0] sm:$0xff]   ;;  %v5037_v14 = vpop.permute.xlu1 %1484 }
 0x259   : > { %6620 = vst [vmem:[#allocation32_spill] sm:$0xff] %v5037_v14  ;;  %v4094_v14 = vld [vmem:[%s6587_s5 + $0x1f8] sm:$0xff]  }
 0x25f   : > { %3895 = vmatmul.mubr.bf16.gmra.mrb[52].mxu0 %v4081_v39  ;;  %3963 = vmatmul.mubr.bf16.gmra.mrb[60].mxu1 %v4082_v19  ;;  %v5039_v39 = vpop.permute.xlu0 %1489  ;;  %v4089_v19 = vld [vmem:[%s6587_s5 + $0xd8] sm:$0xff]  }
 0x260   : > { %3898 = vmatprep.mubr.bf16.mxu0 %v4083_v29  ;;  %3966 = vmatprep.mubr.bf16.mxu1 %v4084_v56  ;;  %6621 = vst [vmem:[#allocation33_spill] sm:$0xff] %v5039_v39  ;;  %v4090_v29 = vld [vmem:[%s6587_s5 + $0x1e8] sm:$0xff]   ;;  %v4091_v56 = vld [vmem:[%s6587_s5 + $0xe0] sm:$0xff]   ;;  %v4092_v39 = vld [vmem:[%s6587_s5 + $0x1f0] sm:$0xff]  }
 0x267   : > { %3899 = vmatmul.mubr.bf16.gmra.mrb[56].mxu0 %v4085_v55  ;;  %3967 = vmatmul.mubr.bf16.gmra.mrb[64].mxu1 %v4086_v5  ;;  %v5053_v55 = vpop.permute.xlu1 %1494  ;;  %v5055_v5 = vpop.permute.xlu0 %1499 }
 0x268   : > { %3902 = vmatprep.mubr.bf16.mxu0 %v4087_v63  ;;  %3970 = vmatprep.mubr.bf16.mxu1 %v4088_v46  ;;  %6622 = vst [vmem:[#allocation34_spill] sm:$0xff] %v5053_v55  ;;  %6623 = vst [vmem:[#allocation35_spill] sm:$0xff] %v5055_v5  ;;  %v4095_v55 = vld [vmem:[%s6587_s5 + $0xf0] sm:$0xff]  }
 0x26b   : > { %v5057_v63 = vpop.permute.xlu1 %1504  ;;  %v5059_v46 = vpop.permute.xlu0 %1509 }
 0x26c   : > { %6624 = vst [vmem:[#allocation36_spill] sm:$0xff] %v5057_v63  ;;  %6625 = vst [vmem:[#allocation37_spill] sm:$0xff] %v5059_v46 }
 0x26f   : > { %3903 = vmatmul.mubr.bf16.gmra.mrb[60].mxu0 %v4089_v19  ;;  %3971 = vmatmul.mubr.bf16.gmra.mrb[68].mxu1 %v4090_v29  ;;  %v5072_v19 = vpop.permute.xlu0 %1519  ;;  %v4096_v29 = vld [vmem:[%s6587_s5 + $0xf8] sm:$0xff]  }
 0x270   : > { %3906 = vmatprep.mubr.bf16.mxu0 %v4091_v56  ;;  %3974 = vmatprep.mubr.bf16.mxu1 %v4092_v39  ;;  %v5070_v39 = vpop.permute.xlu1 %1514  ;;  %6627 = vst [vmem:[#allocation39_spill] sm:$0xff] %v5072_v19  ;;  %v4097_v56 = vld [vmem:[%s6587_s5 + $0x100] sm:$0xff]  }
 0x271   : > { %6626 = vst [vmem:[#allocation38_spill] sm:$0xff] %v5070_v39 }
 0x273   : > { %v5082_v63 = vpop.permute.xlu0 %1529 }
 0x274   : > { %v5080_v46 = vpop.permute.xlu1 %1524  ;;  %6629 = vst [vmem:[#allocation41_spill] sm:$0xff] %v5082_v63 }
 0x275   : > { %6628 = vst [vmem:[#allocation40_spill] sm:$0xff] %v5080_v46 }
 0x277   : > { %3907 = vmatmul.mubr.bf16.gmra.mrb[64].mxu0 %v4093_v6  ;;  %3975 = vmatmul.mubr.bf16.gmra.mrb[72].mxu1 %v4094_v14  ;;  %v4098_v6 = vld [vmem:[%s6587_s5 + $0x108] sm:$0xff]  }
 0x278   : > { %3910 = vmatprep.mubr.bf16.mxu0 %v4095_v55  ;;  %v5087_v14 = vpop.permute.xlu1 %1534  ;;  %v5089_v55 = vpop.permute.xlu0 %1539 }
 0x279   : > { %6630 = vst [vmem:[#allocation42_spill] sm:$0xff] %v5087_v14  ;;  %6631 = vst [vmem:[#allocation43_spill] sm:$0xff] %v5089_v55 }
 0x27c   : > { %v5091_v39 = vpop.permute.xlu1 %1544  ;;  %v1550_v19 = vpop.permute.xlu0 %1549 }
 0x27d   : > { %6632 = vst [vmem:[#allocation44_spill] sm:$0xff] %v5091_v39 }
 0x27f   : > { %3911 = vmatmul.mubr.bf16.gmra.mrb[68].mxu0 %v4096_v29 }
 0x280   : > { %3914 = vmatprep.mubr.bf16.mxu0 %v4097_v56  ;;  %v5093_v5 = vpop.permute.xlu1 %1554  ;;  %v1560_v33 = vpop.permute.xlu0 %1559 }
 0x284   : > { %v5095_v46 = vpop.permute.xlu1 %1564  ;;  %v5097_v63 = vpop.permute.xlu0 %1569 }
 0x287   : > { %3915 = vmatmul.mubr.bf16.gmra.mrb[72].mxu0 %v4098_v6 }
 0x288   : > { %v5099_v29 = vpop.permute.xlu1 %1574  ;;  %v5101_v56 = vpop.permute.xlu0 %1579 }
 0x28c   : > { %v5103_v12 = vpop.permute.xlu1 %1584  ;;  %v5105_v14 = vpop.permute.xlu0 %1589 }
 0x290   : > { %v5107_v55 = vpop.permute.xlu1 %1594  ;;  %v5109_v6 = vpop.permute.xlu0 %1599 }
 0x294   : > { %v5111_v39 = vpop.permute.xlu1 %1604  ;;  %v5113_v17 = vpop.permute.xlu0 %1609 }
 0x298   : > { %v5115_v4 = vpop.permute.xlu1 %1614  ;;  %v5117_v58 = vpop.permute.xlu0 %1619 }
 0x29c   : > { %v5119_v44 = vpop.permute.xlu1 %1624  ;;  %v5121_v37 = vpop.permute.xlu0 %1629 }
 0x2a0   : > { %v5123_v57 = vpop.permute.xlu1 %1634  ;;  %v5125_v0 = vpop.permute.xlu0 %1639 }
 0x2a4   : > { %v5127_v50 = vpop.permute.xlu1 %1644  ;;  %v5129_v60 = vpop.permute.xlu0 %1649 }
 0x2a8   : > { %v5131_v18 = vpop.permute.xlu1 %1654  ;;  %v5133_v40 = vpop.permute.xlu0 %1659 }
 0x2ac   : > { %v5135_v2 = vpop.permute.xlu1 %1664  ;;  %v5137_v10 = vpop.permute.xlu0 %1669 }
 0x2ad   : > { %6633 = vst [vmem:[#allocation45_spill] sm:$0xff] %v5137_v10 }
 0x2b0   : > { %v5139_v8 = vpop.permute.xlu1 %1674  ;;  %v5141_v54 = vpop.permute.xlu0 %1679 }
 0x2b1   : > { %6634 = vst [vmem:[#allocation46_spill] sm:$0xff] %v5139_v8 }
 0x2da   : > { %v3852_v49 = vpop.f32.mrb[8].mxu0  ;;  %v3920_v38 = vpop.f32.mrb[16].mxu1 }
 0x2db   : > { %v2274_v24 = vadd.f32 %v3852_v49, %v4605_v25  ;;  %v2546_v21 = vadd.f32 %v3920_v38, %v1560_v33  ;;  %v2265_v48 = vpop.f32.mrb[9].mxu0  ;;  %v2537_v9 = vpop.f32.mrb[17].mxu1 }
 0x2dc   : > { %v3853_v59 = vpop.f32.mrb[10].mxu0  ;;  %v5144_v30 = vpop.f32.mrb[18].mxu1  ;;  %v2266_v27 = vadd.f32 %v2265_v48, %v4589_v16  ;;  %v2538_v51 = vadd.f32 %v2537_v9, %v1550_v19 }
 0x2dd   : > { %v2268_v10 = vpop.f32.mrb[11].mxu0  ;;  %v5147_v61 = vpop.f32.mrb[19].mxu1  ;;  %v2987_v8 = vsel %vm2776_vm11, %v2546_v21, -inf  ;;  %v2783_v53 = vsel %vm2776_vm11, %v2274_v24, -inf  ;;  %v5162_v9 = vadd.f32 %v3853_v59, %v4600_v22  ;;  %v4124_v59 = vmov -inf  }
 0x2de   : > { %2988 = vmax.xlane.f32.xlu1 %v2987_v8  ;;  %2784 = vmax.xlane.f32.xlu0 %v2783_v53  ;;  %v5157_v25 = vpop.permute.xlu1 %1684  ;;  %v5159_v16 = vpop.permute.xlu0 %1689  ;;  %v5165_v21 = vadd.f32 %v2268_v10, %v4587_v15  ;;  %v2981_v53 = vsel %vm2776_vm11, %v2538_v51, -inf  ;;  %v2777_v38 = vsel %vm2776_vm11, %v2266_v27, -inf  ;;  %375 = vst.msk [vmem:[%s5155_s12 + $0x230] sm:$0xff] %vm304_vm12, %v4124_v59  ;;  %305 = vst.msk [vmem:[%s5155_s12] sm:$0xff] %vm304_vm12, %v4124_v59 }
 0x2df   : > { %6635 = vst [vmem:[#allocation47_spill] sm:$0xff] %v5157_v25  ;;  %6636 = vst [vmem:[#allocation48_spill] sm:$0xff] %v5159_v16  ;;  %v2549_v10 = vadd.f32 %v5144_v30, %v5095_v46  ;;  %v2541_v30 = vadd.f32 %v5147_v61, %v5093_v5 }
 0x2e0   : > { %306 = vst.msk [vmem:[%s5155_s12 + $0x8] sm:$0xff] %vm304_vm12, %v4124_v59  ;;  %307 = vst.msk [vmem:[%s5155_s12 + $0x10] sm:$0xff] %vm304_vm12, %v4124_v59  ;;  %v2780_v19 = vsel %vm2776_vm11, %v5165_v21, -inf }
 0x2e1   : > { %308 = vst.msk [vmem:[%s5155_s12 + $0x18] sm:$0xff] %vm304_vm12, %v4124_v59  ;;  %309 = vst.msk [vmem:[%s5155_s12 + $0x20] sm:$0xff] %vm304_vm12, %v4124_v59 }
 0x2e2   : > { %v5169_v48 = vpop.f32.mrb[20].mxu1  ;;  %2982 = vmax.xlane.f32.xlu1 %v2981_v53  ;;  %v5171_v24 = vpop.f32.mrb[12].mxu0  ;;  %2778 = vmax.xlane.f32.xlu0 %v2777_v38  ;;  %310 = vst.msk [vmem:[%s5155_s12 + $0x28] sm:$0xff] %vm304_vm12, %v4124_v59  ;;  %311 = vst.msk [vmem:[%s5155_s12 + $0x30] sm:$0xff] %vm304_vm12, %v4124_v59  ;;  %v2786_v53 = vsel %vm2776_vm11, %v5162_v9, -inf }
 0x2e3   : > { %v5173_v22 = vpop.f32.mrb[13].mxu0  ;;  %v5175_v15 = vpop.f32.mrb[21].mxu1  ;;  %312 = vst.msk [vmem:[%s5155_s12 + $0x38] sm:$0xff] %vm304_vm12, %v4124_v59  ;;  %313 = vst.msk [vmem:[%s5155_s12 + $0x40] sm:$0xff] %vm304_vm12, %v4124_v59  ;;  %v2290_v49 = vadd.f32 %v5171_v24, %v4638_v13  ;;  %v2562_v13 = vadd.f32 %v5169_v48, %v5101_v56  ;;  %v2990_v24 = vsel %vm2776_vm11, %v2549_v10, -inf  ;;  %v2984_v10 = vsel %vm2776_vm11, %v2541_v30, -inf }
 0x2e4   : > { %v5177_v51 = vpop.f32.mrb[14].mxu0  ;;  %v5179_v27 = vpop.f32.mrb[22].mxu1  ;;  %314 = vst.msk [vmem:[%s5155_s12 + $0x48] sm:$0xff] %vm304_vm12, %v4124_v59  ;;  %315 = vst.msk [vmem:[%s5155_s12 + $0x50] sm:$0xff] %vm304_vm12, %v4124_v59 }
 0x2e5   : > { %316 = vst.msk [vmem:[%s5155_s12 + $0x58] sm:$0xff] %vm304_vm12, %v4124_v59  ;;  %317 = vst.msk [vmem:[%s5155_s12 + $0x60] sm:$0xff] %vm304_vm12, %v4124_v59  ;;  %v2284_v8 = vpop.f32.mrb[15].mxu0  ;;  %v2556_v33 = vpop.f32.mrb[23].mxu1  ;;  %v2795_v46 = vsel %vm2776_vm11, %v2290_v49, -inf  ;;  %v2293_v61 = vadd.f32 %v5177_v51, %v4632_v7  ;;  %v2999_v48 = vsel %vm2776_vm11, %v2562_v13, -inf  ;;  %v2565_v7 = vadd.f32 %v5179_v27, %v5103_v12 }
 0x2e6   : > { %318 = vst.msk [vmem:[%s5155_s12 + $0x68] sm:$0xff] %vm304_vm12, %v4124_v59  ;;  %319 = vst.msk [vmem:[%s5155_s12 + $0x70] sm:$0xff] %vm304_vm12, %v4124_v59  ;;  %2781 = vmax.xlane.f32.xlu1 %v2780_v19  ;;  %2787 = vmax.xlane.f32.xlu0 %v2786_v53  ;;  %v5573_v38 = vpop.permute.xlu1 %1694  ;;  %v5575_v16 = vpop.permute.xlu0 %1699 }
 0x2e7   : > { %320 = vst.msk [vmem:[%s5155_s12 + $0x78] sm:$0xff] %vm304_vm12, %v4124_v59  ;;  %321 = vst.msk [vmem:[%s5155_s12 + $0x80] sm:$0xff] %vm304_vm12, %v4124_v59  ;;  %v2798_v51 = vsel %vm2776_vm11, %v2293_v61, -inf  ;;  %v3002_v61 = vsel %vm2776_vm11, %v2565_v7, -inf }
 0x2e8   : > { %322 = vst.msk [vmem:[%s5155_s12 + $0x88] sm:$0xff] %vm304_vm12, %v4124_v59  ;;  %323 = vst.msk [vmem:[%s5155_s12 + $0x90] sm:$0xff] %vm304_vm12, %v4124_v59 }
 0x2e9   : > { %324 = vst.msk [vmem:[%s5155_s12 + $0x98] sm:$0xff] %vm304_vm12, %v4124_v59  ;;  %325 = vst.msk [vmem:[%s5155_s12 + $0xa0] sm:$0xff] %vm304_vm12, %v4124_v59 }
 0x2ea   : > { %326 = vst.msk [vmem:[%s5155_s12 + $0xa8] sm:$0xff] %vm304_vm12, %v4124_v59  ;;  %327 = vst.msk [vmem:[%s5155_s12 + $0xb0] sm:$0xff] %vm304_vm12, %v4124_v59  ;;  %v3860_v21 = vpop.f32.mrb[16].mxu0  ;;  %2796 = vmax.xlane.f32.xlu1 %v2795_v46  ;;  %2991 = vmax.xlane.f32.xlu0 %v2990_v24  ;;  %v5593_v49 = vpop.permute.xlu1 %1704 }
 0x2eb   : > { %328 = vst.msk [vmem:[%s5155_s12 + $0xb8] sm:$0xff] %vm304_vm12, %v4124_v59  ;;  %329 = vst.msk [vmem:[%s5155_s12 + $0xc0] sm:$0xff] %vm304_vm12, %v4124_v59  ;;  %v2297_v9 = vpop.f32.mrb[17].mxu0  ;;  %v5595_v46 = vpop.permute.xlu0 %1709  ;;  %v2306_v12 = vadd.f32 %v3860_v21, %v4668_v20 }
 0x2ec   : > { %330 = vst.msk [vmem:[%s5155_s12 + $0xc8] sm:$0xff] %vm304_vm12, %v4124_v59  ;;  %331 = vst.msk [vmem:[%s5155_s12 + $0xd0] sm:$0xff] %vm304_vm12, %v4124_v59  ;;  %v3861_v53 = vpop.f32.mrb[18].mxu0 }
 0x2ed   : > { %332 = vst.msk [vmem:[%s5155_s12 + $0xd8] sm:$0xff] %vm304_vm12, %v4124_v59  ;;  %333 = vst.msk [vmem:[%s5155_s12 + $0xe0] sm:$0xff] %vm304_vm12, %v4124_v59  ;;  %v5587_v5 = vpop.f32.mrb[19].mxu0  ;;  %v2807_v20 = vsel %vm2776_vm11, %v2306_v12, -inf }
 0x2ee   : > { %334 = vst.msk [vmem:[%s5155_s12 + $0xe8] sm:$0xff] %vm304_vm12, %v4124_v59  ;;  %335 = vst.msk [vmem:[%s5155_s12 + $0xf0] sm:$0xff] %vm304_vm12, %v4124_v59  ;;  %3000 = vmax.xlane.f32.xlu1 %v2999_v48  ;;  %2985 = vmax.xlane.f32.xlu0 %v2984_v10 }
 0x2ef   : > { %336 = vst.msk [vmem:[%s5155_s12 + $0xf8] sm:$0xff] %vm304_vm12, %v4124_v59  ;;  %337 = vst.msk [vmem:[%s5155_s12 + $0x100] sm:$0xff] %vm304_vm12, %v4124_v59 }
 0x2f0   : > { %338 = vst.msk [vmem:[%s5155_s12 + $0x108] sm:$0xff] %vm304_vm12, %v4124_v59  ;;  %339 = vst.msk [vmem:[%s5155_s12 + $0x110] sm:$0xff] %vm304_vm12, %v4124_v59 }
 0x2f1   : > { %340 = vst.msk [vmem:[%s5155_s12 + $0x118] sm:$0xff] %vm304_vm12, %v4124_v59  ;;  %341 = vst.msk [vmem:[%s5155_s12 + $0x120] sm:$0xff] %vm304_vm12, %v4124_v59 }
 0x2f2   : > { %342 = vst.msk [vmem:[%s5155_s12 + $0x128] sm:$0xff] %vm304_vm12, %v4124_v59  ;;  %343 = vst.msk [vmem:[%s5155_s12 + $0x130] sm:$0xff] %vm304_vm12, %v4124_v59  ;;  %v3864_v24 = vpop.f32.mrb[20].mxu0  ;;  %2799 = vmax.xlane.f32.xlu0 %v2798_v51  ;;  %v5621_v51 = vpop.permute.xlu0 %1719 }
 0x2f3   : > { %344 = vst.msk [vmem:[%s5155_s12 + $0x138] sm:$0xff] %vm304_vm12, %v4124_v59  ;;  %345 = vst.msk [vmem:[%s5155_s12 + $0x140] sm:$0xff] %vm304_vm12, %v4124_v59  ;;  %v5603_v30 = vpop.f32.mrb[21].mxu0 }
 0x2f4   : > { %346 = vst.msk [vmem:[%s5155_s12 + $0x148] sm:$0xff] %vm304_vm12, %v4124_v59  ;;  %347 = vst.msk [vmem:[%s5155_s12 + $0x150] sm:$0xff] %vm304_vm12, %v4124_v59  ;;  %v5607_v10 = vpop.f32.mrb[22].mxu0 }
 0x2f5   : > { %348 = vst.msk [vmem:[%s5155_s12 + $0x158] sm:$0xff] %vm304_vm12, %v4124_v59  ;;  %349 = vst.msk [vmem:[%s5155_s12 + $0x160] sm:$0xff] %vm304_vm12, %v4124_v59 }
 0x2f6   : > { %350 = vst.msk [vmem:[%s5155_s12 + $0x168] sm:$0xff] %vm304_vm12, %v4124_v59  ;;  %351 = vst.msk [vmem:[%s5155_s12 + $0x170] sm:$0xff] %vm304_vm12, %v4124_v59  ;;  %3003 = vmax.xlane.f32.xlu0 %v3002_v61 }
 0x2f7   : > { %352 = vst.msk [vmem:[%s5155_s12 + $0x178] sm:$0xff] %vm304_vm12, %v4124_v59  ;;  %353 = vst.msk [vmem:[%s5155_s12 + $0x180] sm:$0xff] %vm304_vm12, %v4124_v59 }
 0x2f8   : > { %354 = vst.msk [vmem:[%s5155_s12 + $0x188] sm:$0xff] %vm304_vm12, %v4124_v59  ;;  %355 = vst.msk [vmem:[%s5155_s12 + $0x190] sm:$0xff] %vm304_vm12, %v4124_v59 }
 0x2f9   : > { %356 = vst.msk [vmem:[%s5155_s12 + $0x198] sm:$0xff] %vm304_vm12, %v4124_v59  ;;  %357 = vst.msk [vmem:[%s5155_s12 + $0x1a0] sm:$0xff] %vm304_vm12, %v4124_v59 }
 0x2fa   : > { %358 = vst.msk [vmem:[%s5155_s12 + $0x1a8] sm:$0xff] %vm304_vm12, %v4124_v59  ;;  %359 = vst.msk [vmem:[%s5155_s12 + $0x1b0] sm:$0xff] %vm304_vm12, %v4124_v59 }
 0x2fb   : > { %360 = vst.msk [vmem:[%s5155_s12 + $0x1b8] sm:$0xff] %vm304_vm12, %v4124_v59  ;;  %361 = vst.msk [vmem:[%s5155_s12 + $0x1c0] sm:$0xff] %vm304_vm12, %v4124_v59 }
 0x2fc   : > { %362 = vst.msk [vmem:[%s5155_s12 + $0x1c8] sm:$0xff] %vm304_vm12, %v4124_v59  ;;  %363 = vst.msk [vmem:[%s5155_s12 + $0x1d0] sm:$0xff] %vm304_vm12, %v4124_v59 }
 0x2fd   : > { %364 = vst.msk [vmem:[%s5155_s12 + $0x1d8] sm:$0xff] %vm304_vm12, %v4124_v59  ;;  %365 = vst.msk [vmem:[%s5155_s12 + $0x1e0] sm:$0xff] %vm304_vm12, %v4124_v59 }
 0x2fe   : > { %366 = vst.msk [vmem:[%s5155_s12 + $0x1e8] sm:$0xff] %vm304_vm12, %v4124_v59  ;;  %367 = vst.msk [vmem:[%s5155_s12 + $0x1f0] sm:$0xff] %vm304_vm12, %v4124_v59 }
 0x2ff   : > { %368 = vst.msk [vmem:[%s5155_s12 + $0x1f8] sm:$0xff] %vm304_vm12, %v4124_v59  ;;  %369 = vst.msk [vmem:[%s5155_s12 + $0x200] sm:$0xff] %vm304_vm12, %v4124_v59 }
 0x300   : > { %370 = vst.msk [vmem:[%s5155_s12 + $0x208] sm:$0xff] %vm304_vm12, %v4124_v59  ;;  %371 = vst.msk [vmem:[%s5155_s12 + $0x210] sm:$0xff] %vm304_vm12, %v4124_v59 }
 0x301   : > { %372 = vst.msk [vmem:[%s5155_s12 + $0x218] sm:$0xff] %vm304_vm12, %v4124_v59  ;;  %373 = vst.msk [vmem:[%s5155_s12 + $0x220] sm:$0xff] %vm304_vm12, %v4124_v59 }
 0x302   : > { %374 = vst.msk [vmem:[%s5155_s12 + $0x228] sm:$0xff] %vm304_vm12, %v4124_v59  ;;  %376 = vst.msk [vmem:[%s5155_s12 + $0x238] sm:$0xff] %vm304_vm12, %v4124_v59 }
 0x303   : > { %377 = vst.msk [vmem:[%s5155_s12 + $0x240] sm:$0xff] %vm304_vm12, %v4124_v59  ;;  %378 = vst.msk [vmem:[%s5155_s12 + $0x248] sm:$0xff] %vm304_vm12, %v4124_v59 }
 0x304   : > { %379 = vst.msk [vmem:[%s5155_s12 + $0x250] sm:$0xff] %vm304_vm12, %v4124_v59  ;;  %380 = vst.msk [vmem:[%s5155_s12 + $0x258] sm:$0xff] %vm304_vm12, %v4124_v59 }
 0x305   : > { %381 = vst.msk [vmem:[%s5155_s12 + $0x260] sm:$0xff] %vm304_vm12, %v4124_v59  ;;  %382 = vst.msk [vmem:[%s5155_s12 + $0x268] sm:$0xff] %vm304_vm12, %v4124_v59 }
 0x306   : > { %383 = vst.msk [vmem:[%s5155_s12 + $0x270] sm:$0xff] %vm304_vm12, %v4124_v59  ;;  %384 = vst.msk [vmem:[%s5155_s12 + $0x278] sm:$0xff] %vm304_vm12, %v4124_v59 }
 0x307   : > { %385 = vst.msk [vmem:[%s5155_s12 + $0x280] sm:$0xff] %vm304_vm12, %v4124_v59  ;;  %386 = vst.msk [vmem:[%s5155_s12 + $0x288] sm:$0xff] %vm304_vm12, %v4124_v59 }
 0x308   : > { %387 = vst.msk [vmem:[%s5155_s12 + $0x290] sm:$0xff] %vm304_vm12, %v4124_v59  ;;  %388 = vst.msk [vmem:[%s5155_s12 + $0x298] sm:$0xff] %vm304_vm12, %v4124_v59 }
 0x309   : > { %389 = vst.msk [vmem:[%s5155_s12 + $0x2a0] sm:$0xff] %vm304_vm12, %v4124_v59  ;;  %390 = vst.msk [vmem:[%s5155_s12 + $0x2a8] sm:$0xff] %vm304_vm12, %v4124_v59 }
 0x30a   : > { %391 = vst.msk [vmem:[%s5155_s12 + $0x2b0] sm:$0xff] %vm304_vm12, %v4124_v59  ;;  %392 = vst.msk [vmem:[%s5155_s12 + $0x2b8] sm:$0xff] %vm304_vm12, %v4124_v59 }
 0x30b   : > { %393 = vst.msk [vmem:[%s5155_s12 + $0x2c0] sm:$0xff] %vm304_vm12, %v4124_v59  ;;  %394 = vst.msk [vmem:[%s5155_s12 + $0x2c8] sm:$0xff] %vm304_vm12, %v4124_v59 }
 0x30c   : > { %395 = vst.msk [vmem:[%s5155_s12 + $0x2d0] sm:$0xff] %vm304_vm12, %v4124_v59  ;;  %396 = vst.msk [vmem:[%s5155_s12 + $0x2d8] sm:$0xff] %vm304_vm12, %v4124_v59 }
 0x30d   : > { %397 = vst.msk [vmem:[%s5155_s12 + $0x2e0] sm:$0xff] %vm304_vm12, %v4124_v59  ;;  %398 = vst.msk [vmem:[%s5155_s12 + $0x2e8] sm:$0xff] %vm304_vm12, %v4124_v59 }
 0x30e   : > { %399 = vst.msk [vmem:[%s5155_s12 + $0x2f0] sm:$0xff] %vm304_vm12, %v4124_v59  ;;  %400 = vst.msk [vmem:[%s5155_s12 + $0x2f8] sm:$0xff] %vm304_vm12, %v4124_v59 }
 0x30f   : > { %401 = vst.msk [vmem:[%s5155_s12 + $0x300] sm:$0xff] %vm304_vm12, %v4124_v59  ;;  %402 = vst.msk [vmem:[%s5155_s12 + $0x308] sm:$0xff] %vm304_vm12, %v4124_v59 }
 0x310   : > { %403 = vst.msk [vmem:[%s5155_s12 + $0x310] sm:$0xff] %vm304_vm12, %v4124_v59  ;;  %404 = vst.msk [vmem:[%s5155_s12 + $0x318] sm:$0xff] %vm304_vm12, %v4124_v59 }
 0x311   : > { %405 = vst.msk [vmem:[%s5155_s12 + $0x320] sm:$0xff] %vm304_vm12, %v4124_v59  ;;  %406 = vst.msk [vmem:[%s5155_s12 + $0x328] sm:$0xff] %vm304_vm12, %v4124_v59 }
 0x312   : > { %407 = vst.msk [vmem:[%s5155_s12 + $0x330] sm:$0xff] %vm304_vm12, %v4124_v59  ;;  %408 = vst.msk [vmem:[%s5155_s12 + $0x338] sm:$0xff] %vm304_vm12, %v4124_v59 }
 0x313   : > { %409 = vst.msk [vmem:[%s5155_s12 + $0x340] sm:$0xff] %vm304_vm12, %v4124_v59  ;;  %410 = vst.msk [vmem:[%s5155_s12 + $0x348] sm:$0xff] %vm304_vm12, %v4124_v59 }
 0x314   : > { %411 = vst.msk [vmem:[%s5155_s12 + $0x350] sm:$0xff] %vm304_vm12, %v4124_v59  ;;  %412 = vst.msk [vmem:[%s5155_s12 + $0x358] sm:$0xff] %vm304_vm12, %v4124_v59 }
 0x315   : > { %413 = vst.msk [vmem:[%s5155_s12 + $0x360] sm:$0xff] %vm304_vm12, %v4124_v59  ;;  %414 = vst.msk [vmem:[%s5155_s12 + $0x368] sm:$0xff] %vm304_vm12, %v4124_v59 }
 0x316   : > { %415 = vst.msk [vmem:[%s5155_s12 + $0x370] sm:$0xff] %vm304_vm12, %v4124_v59  ;;  %416 = vst.msk [vmem:[%s5155_s12 + $0x378] sm:$0xff] %vm304_vm12, %v4124_v59 }
 0x317   : > { %417 = vst.msk [vmem:[%s5155_s12 + $0x380] sm:$0xff] %vm304_vm12, %v4124_v59  ;;  %418 = vst.msk [vmem:[%s5155_s12 + $0x388] sm:$0xff] %vm304_vm12, %v4124_v59 }
 0x318   : > { %419 = vst.msk [vmem:[%s5155_s12 + $0x390] sm:$0xff] %vm304_vm12, %v4124_v59  ;;  %420 = vst.msk [vmem:[%s5155_s12 + $0x398] sm:$0xff] %vm304_vm12, %v4124_v59 }
 0x319   : > { %421 = vst.msk [vmem:[%s5155_s12 + $0x3a0] sm:$0xff] %vm304_vm12, %v4124_v59  ;;  %422 = vst.msk [vmem:[%s5155_s12 + $0x3a8] sm:$0xff] %vm304_vm12, %v4124_v59 }
 0x31a   : > { %423 = vst.msk [vmem:[%s5155_s12 + $0x3b0] sm:$0xff] %vm304_vm12, %v4124_v59  ;;  %424 = vst.msk [vmem:[%s5155_s12 + $0x3b8] sm:$0xff] %vm304_vm12, %v4124_v59 }
 0x31b   : > { %425 = vst.msk [vmem:[%s5155_s12 + $0x3c0] sm:$0xff] %vm304_vm12, %v4124_v59  ;;  %426 = vst.msk [vmem:[%s5155_s12 + $0x3c8] sm:$0xff] %vm304_vm12, %v4124_v59 }
 0x31c   : > { %427 = vst.msk [vmem:[%s5155_s12 + $0x3d0] sm:$0xff] %vm304_vm12, %v4124_v59  ;;  %428 = vst.msk [vmem:[%s5155_s12 + $0x3d8] sm:$0xff] %vm304_vm12, %v4124_v59 }
 0x31d   : > { %429 = vst.msk [vmem:[%s5155_s12 + $0x3e0] sm:$0xff] %vm304_vm12, %v4124_v59  ;;  %430 = vst.msk [vmem:[%s5155_s12 + $0x3e8] sm:$0xff] %vm304_vm12, %v4124_v59 }
 0x31e   : > { %431 = vst.msk [vmem:[%s5155_s12 + $0x3f0] sm:$0xff] %vm304_vm12, %v4124_v59  ;;  %432 = vst.msk [vmem:[%s5155_s12 + $0x3f8] sm:$0xff] %vm304_vm12, %v4124_v59  ;;  %v3928_v59 = vpop.f32.mrb[24].mxu1 }
 0x31f   : > { %6637 = vst [vmem:[#allocation49_spill] sm:$0xff] %v5573_v38  ;;  %6638 = vst [vmem:[#allocation50_spill] sm:$0xff] %v5575_v16  ;;  %v2569_v19 = vpop.f32.mrb[25].mxu1  ;;  %v2282_v16 = vadd.f32 %v5173_v22, %v4619_v47  ;;  %v2554_v47 = vadd.f32 %v5175_v15, %v5097_v63  ;;  %v2285_v63 = vadd.f32 %v2284_v8, %v4617_v45  ;;  %v5613_v15 = vpop.f32.mrb[23].mxu0 }
 0x320   : > { %v3929_v38 = vpop.f32.mrb[26].mxu1  ;;  %6639 = vst [vmem:[#allocation51_spill] sm:$0xff] %v5593_v49  ;;  %6640 = vst [vmem:[#allocation52_spill] sm:$0xff] %v5595_v46  ;;  %v2557_v49 = vadd.f32 %v2556_v33, %v5099_v29  ;;  %v2578_v45 = vadd.f32 %v3928_v59, %v5109_v6  ;;  %v5627_v21 = vpop.f32.mrb[24].mxu0  ;;  %v2298_v29 = vadd.f32 %v2297_v9, %v4649_v35 }
 0x321   : > { %v5589_v56 = vpop.f32.mrb[27].mxu1  ;;  %v2789_v22 = vsel %vm2776_vm11, %v2282_v16, -inf  ;;  %v2993_v27 = vsel %vm2776_vm11, %v2554_v47, -inf  ;;  %6642 = vst [vmem:[#allocation54_spill] sm:$0xff] %v5621_v51  ;;  %v2792_v8 = vsel %vm2776_vm11, %v2285_v63, -inf  ;;  %v5631_v47 = vpop.f32.mrb[25].mxu0  ;;  %v2309_v6 = vadd.f32 %v3861_v53, %v4660_v42 }
 0x322   : > { %v3932_v13 = vpop.f32.mrb[28].mxu1  ;;  %2790 = vmax.xlane.f32.xlu1 %v2789_v22  ;;  %v5619_v22 = vpop.permute.xlu1 %1714  ;;  %2793 = vmax.xlane.f32.xlu0 %v2792_v8  ;;  %v3011_v63 = vsel %vm2776_vm11, %v2578_v45, -inf  ;;  %v2996_v12 = vsel %vm2776_vm11, %v2557_v49, -inf  ;;  %v2581_v35 = vadd.f32 %v3929_v38, %v5111_v39  ;;  %v2801_v42 = vsel %vm2776_vm11, %v2298_v29, -inf }
 0x323   : > { %v5605_v48 = vpop.f32.mrb[29].mxu1  ;;  %6641 = vst [vmem:[#allocation53_spill] sm:$0xff] %v5619_v22  ;;  %v5649_v8 = vpop.permute.xlu0 %1729  ;;  %v2570_v22 = vadd.f32 %v2569_v19, %v5105_v14  ;;  %v2810_v9 = vsel %vm2776_vm11, %v2309_v6, -inf  ;;  %v2301_v39 = vadd.f32 %v5587_v5, %v4647_v32  ;;  %v2322_v14 = vadd.f32 %v3864_v24, %v4706_v1 }
 0x324   : > { %v5609_v46 = vpop.f32.mrb[30].mxu1  ;;  %6643 = vst [vmem:[#allocation55_spill] sm:$0xff] %v5649_v8  ;;  %v3014_v6 = vsel %vm2776_vm11, %v2581_v35, -inf  ;;  %v2573_v8 = vadd.f32 %v5589_v56, %v5107_v55  ;;  %v2594_v32 = vadd.f32 %v3932_v13, %v5117_v58  ;;  %v2314_v58 = vadd.f32 %v5603_v30, %v4683_v52 }
 0x325   : > { %v5615_v16 = vpop.f32.mrb[31].mxu1  ;;  %v3005_v29 = vsel %vm2776_vm11, %v2570_v22, -inf  ;;  %v2819_v1 = vsel %vm2776_vm11, %v2322_v14, -inf  ;;  %v2804_v5 = vsel %vm2776_vm11, %v2301_v39, -inf  ;;  %v2325_v55 = vadd.f32 %v5607_v10, %v4700_v62 }
 0x326   : > { %2994 = vmax.xlane.f32.xlu1 %v2993_v27  ;;  %v5629_v25 = vpop.f32.mrb[32].mxu1  ;;  %v5635_v27 = vpop.f32.mrb[26].mxu0  ;;  %2997 = vmax.xlane.f32.xlu0 %v2996_v12  ;;  %v3023_v39 = vsel %vm2776_vm11, %v2594_v32, -inf  ;;  %v3008_v14 = vsel %vm2776_vm11, %v2573_v8, -inf  ;;  %v2586_v52 = vadd.f32 %v5605_v48, %v5113_v17  ;;  %v2597_v62 = vadd.f32 %v5609_v46, %v5119_v44 }
 0x327   : > { %v5633_v7 = vpop.f32.mrb[33].mxu1  ;;  %v5641_v33 = vpop.f32.mrb[27].mxu0  ;;  %v2813_v30 = vsel %vm2776_vm11, %v2314_v58, -inf  ;;  %v2822_v10 = vsel %vm2776_vm11, %v2325_v55, -inf  ;;  %v2317_v44 = vadd.f32 %v5613_v15, %v4681_v26  ;;  %v2338_v46 = vadd.f32 %v5627_v21, %v4744_v23 }
 0x328   : > { %v5637_v61 = vpop.f32.mrb[34].mxu1  ;;  %v5655_v53 = vpop.f32.mrb[28].mxu0  ;;  %v3017_v55 = vsel %vm2776_vm11, %v2586_v52, -inf  ;;  %v2589_v26 = vadd.f32 %v5615_v16, %v5115_v4  ;;  %v2610_v23 = vadd.f32 %v5629_v25, %v5125_v0  ;;  %v2330_v0 = vadd.f32 %v5631_v47, %v4723_v36 }
 0x329   : > { %v5643_v59 = vpop.f32.mrb[35].mxu1  ;;  %v5659_v49 = vpop.f32.mrb[29].mxu0  ;;  %v2831_v15 = vsel %vm2776_vm11, %v2338_v46, -inf  ;;  %v2816_v21 = vsel %vm2776_vm11, %v2317_v44, -inf  ;;  %v2341_v25 = vadd.f32 %v5635_v27, %v4736_v34  ;;  %v2602_v36 = vadd.f32 %v5633_v7, %v5121_v37 }
 0x32a   : > { %2808 = vmax.xlane.f32.xlu1 %v2807_v20  ;;  %v5647_v20 = vpop.permute.xlu1 %1724  ;;  %v5657_v51 = vpop.f32.mrb[36].mxu1  ;;  %2811 = vmax.xlane.f32.xlu0 %v2810_v9  ;;  %v3035_v46 = vsel %vm2776_vm11, %v2610_v23, -inf  ;;  %v2613_v34 = vadd.f32 %v5637_v61, %v5127_v50  ;;  %v2825_v47 = vsel %vm2776_vm11, %v2330_v0, -inf  ;;  %v2333_v50 = vadd.f32 %v5641_v33, %v4721_v11 }
 0x32b   : > { %v5661_v45 = vpop.f32.mrb[37].mxu1  ;;  %v5678_v9 = vpop.permute.xlu0 %1739  ;;  %v2834_v27 = vsel %vm2776_vm11, %v2341_v25, -inf  ;;  %v2354_v7 = vadd.f32 %v5655_v53, %v4771_v43  ;;  %v3029_v25 = vsel %vm2776_vm11, %v2602_v36, -inf  ;;  %v2605_v11 = vadd.f32 %v5643_v59, %v5123_v57 }
 0x32c   : > { %v5665_v12 = vpop.f32.mrb[38].mxu1  ;;  %6645 = vst [vmem:[#allocation57_spill] sm:$0xff] %v5678_v9  ;;  %v2626_v43 = vadd.f32 %v5657_v51, %v5133_v40  ;;  %v2828_v53 = vsel %vm2776_vm11, %v2333_v50, -inf  ;;  %v2346_v40 = vadd.f32 %v5659_v49, %v4755_v31 }
 0x32d   : > { %v5672_v19 = vpop.f32.mrb[39].mxu1  ;;  %v2843_v33 = vsel %vm2776_vm11, %v2354_v7, -inf  ;;  %v2629_v31 = vadd.f32 %v5665_v12, %v5135_v2 }
 0x32e   : > { %3012 = vmax.xlane.f32.xlu1 %v3011_v63  ;;  %v5663_v63 = vpop.f32.mrb[30].mxu0  ;;  %3015 = vmax.xlane.f32.xlu0 %v3014_v6  ;;  %v5687_v22 = vpop.f32.mrb[40].mxu1  ;;  %v3047_v7 = vsel %vm2776_vm11, %v2626_v43, -inf }
 0x32f   : > { %v5670_v38 = vpop.f32.mrb[31].mxu0  ;;  %v2357_v51 = vadd.f32 %v5663_v63, %v4766_v41  ;;  %v2837_v41 = vsel %vm2776_vm11, %v2346_v40, -inf }
 0x330   : > { %v5685_v24 = vpop.f32.mrb[32].mxu0 }
 0x331   : > { %v5689_v35 = vpop.f32.mrb[33].mxu0  ;;  %v2846_v49 = vsel %vm2776_vm11, %v2357_v51, -inf  ;;  %v2370_v12 = vadd.f32 %v5685_v24, %v4797_v3 }
 0x332   : > { %2802 = vmax.xlane.f32.xlu1 %v2801_v42  ;;  %v5676_v42 = vpop.permute.xlu1 %1734  ;;  %2805 = vmax.xlane.f32.xlu0 %v2804_v5  ;;  %v5693_v6 = vpop.f32.mrb[34].mxu0 }
 0x333   : > { %6644 = vst [vmem:[#allocation56_spill] sm:$0xff] %v5676_v42  ;;  %v5701_v56 = vpop.f32.mrb[35].mxu0  ;;  %v5709_v5 = vpop.permute.xlu0 %1749  ;;  %v2855_v3 = vsel %vm2776_vm11, %v2370_v12, -inf }
 0x334   : > { %6647 = vst [vmem:[#allocation59_spill] sm:$0xff] %v5709_v5  ;;  %v5717_v9 = vpop.f32.mrb[36].mxu0 }
 0x335   : > { %v5721_v8 = vpop.f32.mrb[37].mxu0 }
 0x336   : > { %3006 = vmax.xlane.f32.xlu1 %v3005_v29  ;;  %v5691_v29 = vpop.f32.mrb[41].mxu1  ;;  %3009 = vmax.xlane.f32.xlu0 %v3008_v14  ;;  %v5725_v14 = vpop.f32.mrb[38].mxu0 }
 0x337   : > { %v5695_v42 = vpop.f32.mrb[42].mxu1  ;;  %v5733_v48 = vpop.f32.mrb[39].mxu0 }
 0x338   : > { %v5703_v13 = vpop.f32.mrb[43].mxu1  ;;  %v5741_v5 = vpop.permute.xlu0 %1759 }
 0x339   : > { %v5719_v32 = vpop.f32.mrb[44].mxu1  ;;  %6649 = vst [vmem:[#allocation61_spill] sm:$0xff] %v5741_v5 }
 0x33a   : > { %2820 = vmax.xlane.f32.xlu1 %v2819_v1  ;;  %v5707_v1 = vpop.permute.xlu1 %1744  ;;  %2823 = vmax.xlane.f32.xlu0 %v2822_v10 }
 0x33b   : > { %6646 = vst [vmem:[#allocation58_spill] sm:$0xff] %v5707_v1  ;;  %v5749_v1 = vpop.f32.mrb[40].mxu0 }
 0x33e   : > { %3024 = vmax.xlane.f32.xlu1 %v3023_v39  ;;  %v5723_v39 = vpop.f32.mrb[45].mxu1  ;;  %v5739_v10 = vpop.permute.xlu1 %1754 }
 0x33f   : > { %v5727_v17 = vpop.f32.mrb[46].mxu1  ;;  %6648 = vst [vmem:[#allocation60_spill] sm:$0xff] %v5739_v10  ;;  %v5773_v10 = vpop.permute.xlu0 %1769 }
 0x340   : > { %v5735_v58 = vpop.f32.mrb[47].mxu1  ;;  %6651 = vst [vmem:[#allocation63_spill] sm:$0xff] %v5773_v10 }
 0x341   : > { %v5751_v52 = vpop.f32.mrb[48].mxu1 }
 0x342   : > { %2814 = vmax.xlane.f32.xlu1 %v2813_v30  ;;  %v3026_v30 = vsel %vm2776_vm11, %v2597_v62, -inf  ;;  %v5753_v62 = vpop.f32.mrb[41].mxu0 }
 0x343   : > { %3027 = vmax.xlane.f32.xlu0 %v3026_v30  ;;  %v5757_v30 = vpop.f32.mrb[42].mxu0  ;;  %v5805_v10 = vpop.permute.xlu0 %1779 }
 0x344   : > { %v5765_v16 = vpop.f32.mrb[43].mxu0  ;;  %6653 = vst [vmem:[#allocation65_spill] sm:$0xff] %v5805_v10  ;;  %v2618_v10 = vadd.f32 %v5661_v45, %v5129_v60  ;;  %v2349_v60 = vadd.f32 %v5670_v38, %v4753_v28  ;;  %v2621_v28 = vadd.f32 %v5672_v19, %v5131_v18  ;;  %v2642_v38 = vadd.f32 %v5687_v22, %v5141_v54  ;;  %v6658_v54 = vld [vmem:[#allocation3_spill] sm:$0xff]  ;;  %v6659_v22 = vld [vmem:[#allocation4_spill] sm:$0xff] }
 0x345   : > { %v5781_v5 = vpop.f32.mrb[44].mxu0  ;;  %v2362_v19 = vadd.f32 %v5689_v35, %v6658_v54 }
 0x346   : > { %3018 = vmax.xlane.f32.xlu1 %v3017_v55  ;;  %v5755_v55 = vpop.f32.mrb[49].mxu1  ;;  %v2840_v24 = vsel %vm2776_vm11, %v2349_v60, -inf  ;;  %v2373_v60 = vadd.f32 %v5693_v6, %v6659_v22 }
 0x347   : > { %2817 = vmax.xlane.f32.xlu0 %v2816_v21  ;;  %v5759_v4 = vpop.f32.mrb[50].mxu1  ;;  %v5771_v21 = vpop.permute.xlu1 %1764  ;;  %v2849_v35 = vsel %vm2776_vm11, %v2362_v19, -inf }
 0x348   : > { %v5767_v44 = vpop.f32.mrb[51].mxu1  ;;  %6650 = vst [vmem:[#allocation62_spill] sm:$0xff] %v5771_v21  ;;  %v2858_v6 = vsel %vm2776_vm11, %v2373_v60, -inf }
 0x349   : > { %v5783_v23 = vpop.f32.mrb[52].mxu1 }
 0x34a   : > { %2832 = vmax.xlane.f32.xlu1 %v2831_v15  ;;  %v3020_v15 = vsel %vm2776_vm11, %v2589_v26, -inf  ;;  %v5785_v26 = vpop.f32.mrb[45].mxu0 }
 0x34b   : > { %3021 = vmax.xlane.f32.xlu0 %v3020_v15  ;;  %v5789_v15 = vpop.f32.mrb[46].mxu0 }
 0x34c   : > { %v5797_v61 = vpop.f32.mrb[47].mxu0 }
 0x34d   : > { %v5813_v21 = vpop.f32.mrb[48].mxu0 }
 0x34e   : > { %3036 = vmax.xlane.f32.xlu1 %v3035_v46  ;;  %v5787_v46 = vpop.f32.mrb[53].mxu1 }
 0x34f   : > { %2835 = vmax.xlane.f32.xlu0 %v2834_v27  ;;  %v5791_v37 = vpop.f32.mrb[54].mxu1  ;;  %v5803_v27 = vpop.permute.xlu1 %1774 }
 0x350   : > { %v5799_v0 = vpop.f32.mrb[55].mxu1  ;;  %6652 = vst [vmem:[#allocation64_spill] sm:$0xff] %v5803_v27  ;;  %v5835_v27 = vpop.permute.xlu0 %1789 }
 0x351   : > { %v5815_v36 = vpop.f32.mrb[56].mxu1  ;;  %6654 = vst [vmem:[#allocation66_spill] sm:$0xff] %v5835_v27 }
 0x352   : > { %2826 = vmax.xlane.f32.xlu1 %v2825_v47  ;;  %v3038_v47 = vsel %vm2776_vm11, %v2613_v34, -inf  ;;  %v5817_v34 = vpop.f32.mrb[49].mxu0 }
 0x353   : > { %3039 = vmax.xlane.f32.xlu0 %v3038_v47  ;;  %v5821_v47 = vpop.f32.mrb[50].mxu0 }
 0x354   : > { %v5829_v59 = vpop.f32.mrb[51].mxu0  ;;  %v1800_v27 = vpop.permute.xlu0 %1799 }
 0x355   : > { %v5843_v63 = vpop.f32.mrb[52].mxu0 }
 0x356   : > { %3030 = vmax.xlane.f32.xlu1 %v3029_v25  ;;  %v5819_v25 = vpop.f32.mrb[57].mxu1 }
 0x357   : > { %2829 = vmax.xlane.f32.xlu0 %v2828_v53  ;;  %v5823_v57 = vpop.f32.mrb[58].mxu1  ;;  %v1785_v53 = vpop.permute.xlu1 %1784 }
 0x358   : > { %v5831_v50 = vpop.f32.mrb[59].mxu1 }
 0x359   : > { %v5845_v43 = vpop.f32.mrb[60].mxu1 }
 0x35a   : > { %2844 = vmax.xlane.f32.xlu1 %v2843_v33  ;;  %v3032_v33 = vsel %vm2776_vm11, %v2605_v11, -inf  ;;  %v5847_v11 = vpop.f32.mrb[53].mxu0 }
 0x35b   : > { %3033 = vmax.xlane.f32.xlu0 %v3032_v33  ;;  %v5853_v45 = vpop.f32.mrb[54].mxu0 }
 0x35c   : > { %v5859_v51 = vpop.f32.mrb[55].mxu0 }
 0x35e   : > { %3048 = vmax.xlane.f32.xlu1 %v3047_v7  ;;  %v5849_v7 = vpop.f32.mrb[61].mxu1 }
 0x35f   : > { %2847 = vmax.xlane.f32.xlu0 %v2846_v49  ;;  %v3965_v2 = vpop.f32.mrb[62].mxu1  ;;  %v3050_v49 = vsel %vm2776_vm11, %v2629_v31, -inf }
 0x360   : > { %v5857_v40 = vadd.f32 %v3965_v2, %v1785_v53  ;;  %v5861_v33 = vpop.f32.mrb[63].mxu1  ;;  %v5871_v53 = vpop.f32.mrb[56].mxu0 }
 0x361   : > { %v3968_v2 = vpop.f32.mrb[64].mxu1  ;;  %v5875_v31 = vpop.f32.mrb[57].mxu0 }
 0x362   : > { %2838 = vmax.xlane.f32.xlu1 %v2837_v41  ;;  %v3041_v41 = vsel %vm2776_vm11, %v2618_v10, -inf  ;;  %v5873_v10 = vadd.f32 %v3968_v2, %v1800_v27  ;;  %v3059_v27 = vsel %vm2776_vm11, %v2642_v38, -inf  ;;  %v6660_v2 = vld [vmem:[#allocation45_spill] sm:$0xff] }
 0x363   : > { %3051 = vmax.xlane.f32.xlu0 %v3050_v49  ;;  %v5879_v49 = vpop.f32.mrb[58].mxu0 }
 0x364   : > { %6655 = vst [vmem:[#allocation67_spill] sm:$0xff] %v5873_v10  ;;  %v5887_v12 = vpop.f32.mrb[59].mxu0 }
 0x365   : > { %v5899_v54 = vpop.f32.mrb[60].mxu0 }
 0x366   : > { %3042 = vmax.xlane.f32.xlu1 %v3041_v41  ;;  %v5877_v41 = vpop.f32.mrb[65].mxu1  ;;  %v5903_v38 = vpop.f32.mrb[61].mxu0 }
 0x367   : > { %2841 = vmax.xlane.f32.xlu0 %v2840_v24  ;;  %6656 = vst [vmem:[#allocation68_spill] sm:$0xff] %v5877_v41  ;;  %v5881_v18 = vpop.f32.mrb[66].mxu1  ;;  %v3044_v24 = vsel %vm2776_vm11, %v2621_v28, -inf  ;;  %v2634_v41 = vadd.f32 %v5691_v29, %v6660_v2  ;;  %6662 = vst [vmem:[#allocation3_spill] sm:$0xff] %v5903_v38  ;;  %v6670_v38 = vld [vmem:[#allocation50_spill] sm:$0xff] }
 0x368   : > { %6657 = vst [vmem:[#allocation69_spill] sm:$0xff] %v5881_v18  ;;  %v6661_v18 = vld [vmem:[#allocation47_spill] sm:$0xff] }
 0x369   : > { %v2645_v10 = vadd.f32 %v5695_v42, %v6661_v18  ;;  %v6667_v18 = vld [vmem:[#allocation7_spill] sm:$0xff] }
 0x36a   : > { %2856 = vmax.xlane.f32.xlu1 %v2855_v3  ;;  %v5889_v3 = vpop.f32.mrb[67].mxu1  ;;  %v2386_v19 = vadd.f32 %v5717_v9, %v6667_v18 }
 0x36b   : > { %3045 = vmax.xlane.f32.xlu0 %v3044_v24  ;;  %v5901_v22 = vpop.f32.mrb[68].mxu1  ;;  %v6666_v24 = vld [vmem:[#allocation2_spill] sm:$0xff] }
 0x36c   : > { %v5905_v28 = vpop.f32.mrb[69].mxu1  ;;  %v2365_v42 = vadd.f32 %v5701_v56, %v6666_v24  ;;  %v2658_v56 = vadd.f32 %v5719_v32, %v6670_v38  ;;  %v2867_v9 = vsel %vm2776_vm11, %v2386_v19, -inf  ;;  %v6676_v38 = vld [vmem:[#allocation8_spill] sm:$0xff] }
 0x36d   : > { %6663 = vst [vmem:[#allocation4_spill] sm:$0xff] %v5905_v28  ;;  %v5909_v29 = vpop.f32.mrb[70].mxu1  ;;  %v5921_v28 = vpop.permute.xlu1 %1794 }
 0x36e   : > { %3060 = vmax.xlane.f32.xlu1 %v3059_v27  ;;  %v5907_v27 = vpop.f32.mrb[62].mxu0  ;;  %6665 = vst [vmem:[#allocation47_spill] sm:$0xff] %v5909_v29  ;;  %v5917_v2 = vpop.f32.mrb[71].mxu1  ;;  %v2852_v24 = vsel %vm2776_vm11, %v2365_v42, -inf  ;;  %v2389_v42 = vadd.f32 %v5725_v14, %v6676_v38 }
 0x36f   : > { %2859 = vmax.xlane.f32.xlu0 %v2858_v6  ;;  %6664 = vst [vmem:[#allocation45_spill] sm:$0xff] %v5907_v27  ;;  %v5915_v60 = vpop.f32.mrb[63].mxu0  ;;  %6668 = vst [vmem:[#allocation2_spill] sm:$0xff] %v5917_v2  ;;  %v3062_v6 = vsel %vm2776_vm11, %v2645_v10, -inf  ;;  %v6669_v27 = vld [vmem:[#allocation46_spill] sm:$0xff]  ;;  %v5931_v2 = vpop.f32.mrb[72].mxu1 }
 0x370   : > { %v2637_v29 = vadd.f32 %v5703_v13, %v6669_v27  ;;  %v5929_v18 = vpop.f32.mrb[64].mxu0  ;;  %6671 = vst [vmem:[#allocation7_spill] sm:$0xff] %v5931_v2  ;;  %v6675_v27 = vld [vmem:[#allocation6_spill] sm:$0xff] }
 0x371   : > { %v5933_v10 = vpop.f32.mrb[65].mxu0  ;;  %v2378_v32 = vadd.f32 %v5721_v8, %v6675_v27  ;;  %v5951_v2 = vpop.permute.xlu1 %1804  ;;  %v2870_v27 = vsel %vm2776_vm11, %v2389_v42, -inf }
 0x372   : > { %2850 = vmax.xlane.f32.xlu1 %v2849_v35  ;;  %v3053_v35 = vsel %vm2776_vm11, %v2634_v41, -inf  ;;  %v5935_v41 = vpop.f32.mrb[73].mxu1 }
 0x373   : > { %3063 = vmax.xlane.f32.xlu0 %v3062_v6  ;;  %6672 = vst [vmem:[#allocation46_spill] sm:$0xff] %v5935_v41  ;;  %v5939_v13 = vpop.f32.mrb[74].mxu1  ;;  %v6679_v41 = vld [vmem:[#allocation51_spill] sm:$0xff]  ;;  %v2861_v14 = vsel %vm2776_vm11, %v2378_v32, -inf }
 0x374   : > { %6674 = vst [vmem:[#allocation70_spill] sm:$0xff] %v5939_v13  ;;  %v5947_v6 = vpop.f32.mrb[75].mxu1  ;;  %v2661_v8 = vadd.f32 %v5727_v17, %v6679_v41  ;;  %v6684_v17 = vld [vmem:[#allocation11_spill] sm:$0xff] }
 0x375   : > { %6677 = vst [vmem:[#allocation6_spill] sm:$0xff] %v5947_v6  ;;  %v2402_v41 = vadd.f32 %v5749_v1, %v6684_v17 }
 0x376   : > { %3054 = vmax.xlane.f32.xlu1 %v3053_v35  ;;  %v5937_v35 = vpop.f32.mrb[66].mxu0 }
 0x377   : > { %2853 = vmax.xlane.f32.xlu0 %v2852_v24  ;;  %6673 = vst [vmem:[#allocation50_spill] sm:$0xff] %v5937_v35  ;;  %v5945_v19 = vpop.f32.mrb[67].mxu0  ;;  %v3056_v24 = vsel %vm2776_vm11, %v2637_v29, -inf  ;;  %v6678_v35 = vld [vmem:[#allocation48_spill] sm:$0xff]  ;;  %v5963_v29 = vpop.permute.xlu1 %1814 }
 0x378   : > { %v2650_v13 = vadd.f32 %v5723_v39, %v6678_v35  ;;  %v5959_v38 = vpop.f32.mrb[68].mxu0  ;;  %v6683_v39 = vld [vmem:[#allocation5_spill] sm:$0xff] }
 0x379   : > { %6680 = vst [vmem:[#allocation8_spill] sm:$0xff] %v5959_v38  ;;  %v2381_v35 = vadd.f32 %v5733_v48, %v6683_v39  ;;  %v2879_v38 = vsel %vm2776_vm11, %v2402_v41, -inf }
 0x37a   : > { %2868 = vmax.xlane.f32.xlu1 %v2867_v9  ;;  %v3071_v9 = vsel %vm2776_vm11, %v2658_v56, -inf  ;;  %v5961_v56 = vpop.f32.mrb[69].mxu0  ;;  %v3065_v42 = vsel %vm2776_vm11, %v2650_v13, -inf }
 0x37b   : > { %3057 = vmax.xlane.f32.xlu0 %v3056_v24  ;;  %6681 = vst [vmem:[#allocation48_spill] sm:$0xff] %v5961_v56  ;;  %v5967_v24 = vpop.permute.xlu0 %1809  ;;  %v2864_v48 = vsel %vm2776_vm11, %v2381_v35, -inf  ;;  %v5983_v39 = vpop.permute.xlu1 %1824 }
 0x37e   : > { %3072 = vmax.xlane.f32.xlu1 %v3071_v9  ;;  %v5965_v9 = vpop.f32.mrb[70].mxu0 }
 0x37f   : > { %2871 = vmax.xlane.f32.xlu0 %v2870_v27  ;;  %6682 = vst [vmem:[#allocation51_spill] sm:$0xff] %v5965_v9  ;;  %v5973_v32 = vpop.f32.mrb[71].mxu0  ;;  %v6685_v27 = vld [vmem:[#allocation49_spill] sm:$0xff]  ;;  %v6686_v9 = vld [vmem:[#allocation54_spill] sm:$0xff]  ;;  %v5987_v13 = vpop.permute.xlu0 %1819 }
 0x380   : > { %v2653_v56 = vadd.f32 %v5735_v58, %v6685_v27  ;;  %v2674_v6 = vadd.f32 %v5751_v52, %v6686_v9  ;;  %v5985_v1 = vpop.f32.mrb[72].mxu0  ;;  %v6688_v58 = vld [vmem:[#allocation9_spill] sm:$0xff]  ;;  %v6689_v52 = vld [vmem:[#allocation12_spill] sm:$0xff] }
 0x381   : > { %v2405_v9 = vadd.f32 %v5757_v30, %v6689_v52  ;;  %v6692_v52 = vld [vmem:[#allocation15_spill] sm:$0xff] }
 0x382   : > { %2862 = vmax.xlane.f32.xlu1 %v2861_v14  ;;  %v3074_v14 = vsel %vm2776_vm11, %v2661_v8, -inf  ;;  %v5989_v8 = vpop.f32.mrb[73].mxu0  ;;  %v3083_v35 = vsel %vm2776_vm11, %v2674_v6, -inf  ;;  %v6691_v6 = vld [vmem:[#allocation10_spill] sm:$0xff] }
 0x383   : > { %3075 = vmax.xlane.f32.xlu0 %v3074_v14  ;;  %v5991_v17 = vpop.f32.mrb[74].mxu0  ;;  %v3068_v14 = vsel %vm2776_vm11, %v2653_v56, -inf  ;;  %v6003_v27 = vpop.permute.xlu0 %1829  ;;  %v2397_v56 = vadd.f32 %v5765_v16, %v6691_v6 }
 0x384   : > { %6687 = vst [vmem:[#allocation5_spill] sm:$0xff] %v5991_v17  ;;  %v5997_v41 = vpop.f32.mrb[75].mxu0 }
 0x386   : > { %3066 = vmax.xlane.f32.xlu1 %v3065_v42  ;;  %v2394_v42 = vadd.f32 %v5753_v62, %v6688_v58  ;;  %v2677_v62 = vadd.f32 %v5759_v4, %v5647_v20  ;;  %v2882_v58 = vsel %vm2776_vm11, %v2405_v9, -inf }
 0x387   : > { %2865 = vmax.xlane.f32.xlu0 %v2864_v48  ;;  %v6690_v48 = vld [vmem:[#allocation52_spill] sm:$0xff]  ;;  %v6019_v4 = vpop.permute.xlu0 %1839 }
 0x388   : > { %v2666_v17 = vadd.f32 %v5755_v55, %v6690_v48  ;;  %v2873_v30 = vsel %vm2776_vm11, %v2394_v42, -inf  ;;  %v3086_v55 = vsel %vm2776_vm11, %v2677_v62, -inf  ;;  %v6693_v42 = vld [vmem:[#allocation53_spill] sm:$0xff]  ;;  %v3231_v62 = vld [vmem:[%s5155_s12 + $0x230] sm:$0xff] }
 0x389   : > { %v2669_v9 = vadd.f32 %v5767_v44, %v6693_v42  ;;  %v6694_v48 = vld [vmem:[#allocation57_spill] sm:$0xff]  ;;  %v6696_v42 = vld [vmem:[#allocation16_spill] sm:$0xff] }
 0x38a   : > { %2880 = vmax.xlane.f32.xlu1 %v2879_v38  ;;  %v6001_v38 = vpop.permute.xlu1 %1834  ;;  %v2690_v16 = vadd.f32 %v5783_v23, %v6694_v48  ;;  %v6695_v44 = vld [vmem:[#allocation13_spill] sm:$0xff]  ;;  %v2421_v23 = vadd.f32 %v5789_v15, %v6696_v42  ;;  %v3229_v48 = vld [vmem:[%s5155_s12 + $0x220] sm:$0xff] }
 0x38b   : > { %3069 = vmax.xlane.f32.xlu0 %v3068_v14  ;;  %v3077_v14 = vsel %vm2776_vm11, %v2666_v17, -inf  ;;  %v2876_v17 = vsel %vm2776_vm11, %v2397_v56, -inf  ;;  %v2785_v6 = vpop.xlane.xlu0 %2784  ;;  %v3080_v56 = vsel %vm2776_vm11, %v2669_v9, -inf }
 0x38e   : > { %3084 = vmax.xlane.f32.xlu1 %v3083_v35  ;;  %v2418_v35 = vadd.f32 %v5781_v5, %v6692_v52  ;;  %v6017_v20 = vpop.permute.xlu1 %1844 }
 0x38f   : > { %2883 = vmax.xlane.f32.xlu0 %v2882_v58 }
 0x390   : > { %v2891_v5 = vsel %vm2776_vm11, %v2418_v35, -inf  ;;  %v3095_v35 = vsel %vm2776_vm11, %v2690_v16, -inf }
 0x392   : > { %2874 = vmax.xlane.f32.xlu1 %v2873_v30  ;;  %v3163_v30 = vld [vmem:[%s5155_s12 + $0x10] sm:$0xff]  ;;  %v2989_v58 = vpop.xlane.xlu1 %2988 }
 0x393   : > { %3087 = vmax.xlane.f32.xlu0 %v3086_v55  ;;  %v3359_v52 = vmax.f32 %v3231_v62, %v2989_v58  ;;  %v2410_v55 = vadd.f32 %v5785_v26, %v6695_v44  ;;  %v6698_v58 = vld [vmem:[#allocation58_spill] sm:$0xff]  ;;  %v2894_v44 = vsel %vm2776_vm11, %v2421_v23, -inf }
 0x394   : > { %v2693_v9 = vadd.f32 %v5791_v37, %v6698_v58  ;;  %v6701_v58 = vld [vmem:[#allocation56_spill] sm:$0xff] }
 0x395   : > { %3488 = vst.msk [vmem:[%s5155_s12 + $0x230] sm:$0xff] %vm304_vm12, %v3359_v52  ;;  %v3162_v52 = vld [vmem:[%s5155_s12 + $0x8] sm:$0xff] }
 0x396   : > { %3078 = vmax.xlane.f32.xlu1 %v3077_v14  ;;  %v3291_v14 = vmax.f32 %v3163_v30, %v2785_v6  ;;  %v2983_v26 = vpop.xlane.xlu1 %2982  ;;  %v6697_v30 = vld [vmem:[#allocation55_spill] sm:$0xff]  ;;  %v2885_v6 = vsel %vm2776_vm11, %v2410_v55, -inf }
 0x397   : > { %2877 = vmax.xlane.f32.xlu0 %v2876_v17  ;;  %v2779_v17 = vpop.xlane.xlu0 %2778  ;;  %v3357_v62 = vmax.f32 %v3229_v48, %v2983_v26  ;;  %v2682_v16 = vadd.f32 %v5787_v46, %v6697_v30  ;;  %v6700_v48 = vld [vmem:[#allocation19_spill] sm:$0xff]  ;;  %v3098_v26 = vsel %vm2776_vm11, %v2693_v9, -inf }
 0x398   : > { %3420 = vst.msk [vmem:[%s5155_s12 + $0x10] sm:$0xff] %vm304_vm12, %v3291_v14  ;;  %v3164_v14 = vld [vmem:[%s5155_s12 + $0x18] sm:$0xff]  ;;  %v2434_v23 = vadd.f32 %v5813_v21, %v6700_v48  ;;  %v6704_v48 = vld [vmem:[#allocation20_spill] sm:$0xff] }
 0x399   : > { %3486 = vst.msk [vmem:[%s5155_s12 + $0x220] sm:$0xff] %vm304_vm12, %v3357_v62  ;;  %v3232_v62 = vld [vmem:[%s5155_s12 + $0x238] sm:$0xff] }
 0x39a   : > { %2892 = vmax.xlane.f32.xlu1 %v2891_v5  ;;  %v3161_v5 = vld [vmem:[%s5155_s12] sm:$0xff]  ;;  %v2782_v46 = vpop.xlane.xlu1 %2781 }
 0x39b   : > { %3081 = vmax.xlane.f32.xlu0 %v3080_v56  ;;  %v3289_v15 = vmax.f32 %v3161_v5, %v2779_v17  ;;  %v2788_v42 = vpop.xlane.xlu0 %2787  ;;  %v6699_v56 = vld [vmem:[#allocation14_spill] sm:$0xff]  ;;  %v3089_v5 = vsel %vm2776_vm11, %v2682_v16, -inf  ;;  %v3167_v17 = vld [vmem:[%s5155_s12 + $0x30] sm:$0xff]  ;;  %v2685_v16 = vadd.f32 %v5799_v0, %v6701_v58 }
 0x39c   : > { %v3292_v37 = vmax.f32 %v3164_v14, %v2788_v42  ;;  %v2413_v55 = vadd.f32 %v5797_v61, %v6699_v56  ;;  %v3235_v14 = vld [vmem:[%s5155_s12 + $0x250] sm:$0xff] }
 0x39d   : > { %3418 = vst.msk [vmem:[%s5155_s12] sm:$0xff] %vm304_vm12, %v3289_v15 }
 0x39e   : > { %3096 = vmax.xlane.f32.xlu1 %v3095_v35  ;;  %v3290_v35 = vmax.f32 %v3162_v52, %v2782_v46  ;;  %3421 = vst.msk [vmem:[%s5155_s12 + $0x18] sm:$0xff] %vm304_vm12, %v3292_v37  ;;  %v2797_v61 = vpop.xlane.xlu1 %2796  ;;  %v2888_v52 = vsel %vm2776_vm11, %v2413_v55, -inf  ;;  %v3230_v46 = vld [vmem:[%s5155_s12 + $0x228] sm:$0xff]  ;;  %v6703_v37 = vld [vmem:[#allocation17_spill] sm:$0xff]  ;;  %v2437_v55 = vadd.f32 %v5821_v47, %v6704_v48 }
 0x39f   : > { %2895 = vmax.xlane.f32.xlu0 %v2894_v44  ;;  %v2992_v15 = vpop.xlane.xlu0 %2991  ;;  %v3295_v30 = vmax.f32 %v3167_v17, %v2797_v61  ;;  %v2903_v44 = vsel %vm2776_vm11, %v2434_v23, -inf  ;;  %v2426_v56 = vadd.f32 %v5817_v34, %v6703_v37  ;;  %v3168_v17 = vld [vmem:[%s5155_s12 + $0x38] sm:$0xff]  ;;  %v3166_v48 = vld [vmem:[%s5155_s12 + $0x28] sm:$0xff] }
 0x3a0   : > { %3419 = vst.msk [vmem:[%s5155_s12 + $0x8] sm:$0xff] %vm304_vm12, %v3290_v35  ;;  %v3360_v21 = vmax.f32 %v3232_v62, %v2992_v15  ;;  %v6705_v15 = vld [vmem:[#allocation59_spill] sm:$0xff] }
 0x3a1   : > { %3424 = vst.msk [vmem:[%s5155_s12 + $0x30] sm:$0xff] %vm304_vm12, %v3295_v30  ;;  %v2698_v30 = vadd.f32 %v5819_v25, %v6705_v15  ;;  %v3234_v15 = vld [vmem:[%s5155_s12 + $0x248] sm:$0xff] }
 0x3a2   : > { %2886 = vmax.xlane.f32.xlu1 %v2885_v6  ;;  %v6702_v6 = vld [vmem:[#allocation61_spill] sm:$0xff]  ;;  %3489 = vst.msk [vmem:[%s5155_s12 + $0x238] sm:$0xff] %vm304_vm12, %v3360_v21  ;;  %v3001_v0 = vpop.xlane.xlu1 %3000  ;;  %v6706_v21 = vld [vmem:[#allocation62_spill] sm:$0xff] }
 0x3a3   : > { %3099 = vmax.xlane.f32.xlu0 %v3098_v26  ;;  %v2706_v9 = vadd.f32 %v5815_v36, %v6702_v6  ;;  %v2986_v42 = vpop.xlane.xlu0 %2985  ;;  %v3363_v35 = vmax.f32 %v3235_v14, %v3001_v0  ;;  %v3165_v26 = vld [vmem:[%s5155_s12 + $0x20] sm:$0xff]  ;;  %v2709_v58 = vadd.f32 %v5823_v57, %v6706_v21  ;;  %v2906_v6 = vsel %vm2776_vm11, %v2437_v55, -inf }
 0x3a4   : > { %v3358_v36 = vmax.f32 %v3230_v46, %v2986_v42  ;;  %v6707_v46 = vld [vmem:[#allocation18_spill] sm:$0xff]  ;;  %v6708_v42 = vld [vmem:[#allocation23_spill] sm:$0xff] }
 0x3a5   : > { %v3107_v23 = vsel %vm2776_vm11, %v2706_v9, -inf  ;;  %3492 = vst.msk [vmem:[%s5155_s12 + $0x250] sm:$0xff] %vm304_vm12, %v3363_v35  ;;  %v3233_v9 = vld [vmem:[%s5155_s12 + $0x240] sm:$0xff]  ;;  %v2429_v0 = vadd.f32 %v5829_v59, %v6707_v46  ;;  %v2450_v35 = vadd.f32 %v5843_v63, %v6708_v42  ;;  %v3110_v37 = vsel %vm2776_vm11, %v2709_v58, -inf  ;;  %v6711_v58 = vld [vmem:[#allocation21_spill] sm:$0xff] }
 0x3a6   : > { %3090 = vmax.xlane.f32.xlu1 %v3089_v5  ;;  %v3092_v5 = vsel %vm2776_vm11, %v2685_v16, -inf  ;;  %3487 = vst.msk [vmem:[%s5155_s12 + $0x228] sm:$0xff] %vm304_vm12, %v3358_v36  ;;  %v2897_v16 = vsel %vm2776_vm11, %v2426_v56, -inf  ;;  %v3101_v36 = vsel %vm2776_vm11, %v2698_v30, -inf  ;;  %v3171_v56 = vld [vmem:[%s5155_s12 + $0x50] sm:$0xff] }
 0x3a7   : > { %2889 = vmax.xlane.f32.xlu0 %v2888_v52  ;;  %v2800_v62 = vpop.xlane.xlu0 %2799 }
 0x3a8   : > { %v3296_v47 = vmax.f32 %v3168_v17, %v2800_v62  ;;  %v6710_v17 = vld [vmem:[#allocation65_spill] sm:$0xff]  ;;  %v2915_v62 = vsel %vm2776_vm11, %v2450_v35, -inf }
 0x3aa   : > { %2904 = vmax.xlane.f32.xlu1 %v2903_v44  ;;  %v3236_v44 = vld [vmem:[%s5155_s12 + $0x258] sm:$0xff]  ;;  %3425 = vst.msk [vmem:[%s5155_s12 + $0x38] sm:$0xff] %vm304_vm12, %v3296_v47  ;;  %v3239_v47 = vld [vmem:[%s5155_s12 + $0x270] sm:$0xff] }
 0x3ab   : > { %3093 = vmax.xlane.f32.xlu0 %v3092_v5  ;;  %v3004_v52 = vpop.xlane.xlu0 %3003  ;;  %v6709_v5 = vld [vmem:[#allocation60_spill] sm:$0xff] }
 0x3ac   : > { %v3364_v57 = vmax.f32 %v3236_v44, %v3004_v52  ;;  %v3169_v52 = vld [vmem:[%s5155_s12 + $0x40] sm:$0xff] }
 0x3ae   : > { %3108 = vmax.xlane.f32.xlu1 %v3107_v23  ;;  %3493 = vst.msk [vmem:[%s5155_s12 + $0x258] sm:$0xff] %vm304_vm12, %v3364_v57 }
 0x3af   : > { %v2791_v34 = vpop.xlane.xlu1 %2790  ;;  %2907 = vmax.xlane.f32.xlu0 %v2906_v6  ;;  %v2794_v55 = vpop.xlane.xlu0 %2793  ;;  %v6712_v6 = vld [vmem:[#allocation24_spill] sm:$0xff] }
 0x3b0   : > { %v3293_v61 = vmax.f32 %v3165_v26, %v2791_v34  ;;  %v3294_v63 = vmax.f32 %v3166_v48, %v2794_v55  ;;  %v2701_v26 = vadd.f32 %v5831_v50, %v6709_v5  ;;  %v2722_v34 = vadd.f32 %v5845_v43, %v6710_v17  ;;  %v6715_v5 = vld [vmem:[#allocation27_spill] sm:$0xff] }
 0x3b2   : > { %3422 = vst.msk [vmem:[%s5155_s12 + $0x20] sm:$0xff] %vm304_vm12, %v3293_v61  ;;  %2898 = vmax.xlane.f32.xlu1 %v2897_v16  ;;  %v2900_v61 = vsel %vm2776_vm11, %v2429_v0, -inf  ;;  %3423 = vst.msk [vmem:[%s5155_s12 + $0x28] sm:$0xff] %vm304_vm12, %v3294_v63  ;;  %v2442_v16 = vadd.f32 %v5847_v11, %v6711_v58  ;;  %v3119_v44 = vsel %vm2776_vm11, %v2722_v34, -inf  ;;  %v6713_v0 = vld [vmem:[#allocation63_spill] sm:$0xff]  ;;  %v3122_v34 = vsel %vm2776_vm11, %v5857_v40, -inf }
 0x3b3   : > { %v2995_v25 = vpop.xlane.xlu1 %2994  ;;  %3111 = vmax.xlane.f32.xlu0 %v3110_v37  ;;  %v2998_v30 = vpop.xlane.xlu0 %2997  ;;  %v2714_v42 = vadd.f32 %v5849_v7, %v6713_v0  ;;  %v3237_v37 = vld [vmem:[%s5155_s12 + $0x260] sm:$0xff]  ;;  %v3238_v58 = vld [vmem:[%s5155_s12 + $0x268] sm:$0xff]  ;;  %v3176_v0 = vld [vmem:[%s5155_s12 + $0x78] sm:$0xff] }
 0x3b4   : > { %v3361_v14 = vmax.f32 %v3233_v9, %v2995_v25  ;;  %v3362_v43 = vmax.f32 %v3234_v15, %v2998_v30  ;;  %v2453_v9 = vadd.f32 %v5853_v45, %v6712_v6  ;;  %v3104_v25 = vsel %vm2776_vm11, %v2701_v26, -inf }
 0x3b5   : > { %v2909_v35 = vsel %vm2776_vm11, %v2442_v16, -inf  ;;  %v2466_v26 = vadd.f32 %v5871_v53, %v6715_v5  ;;  %v3113_v17 = vsel %vm2776_vm11, %v2714_v42, -inf }
 0x3b6   : > { %3490 = vst.msk [vmem:[%s5155_s12 + $0x240] sm:$0xff] %vm304_vm12, %v3361_v14  ;;  %3102 = vmax.xlane.f32.xlu1 %v3101_v36  ;;  %v3172_v14 = vld [vmem:[%s5155_s12 + $0x58] sm:$0xff]  ;;  %3491 = vst.msk [vmem:[%s5155_s12 + $0x248] sm:$0xff] %vm304_vm12, %v3362_v43  ;;  %v2918_v36 = vsel %vm2776_vm11, %v2453_v9, -inf  ;;  %v3243_v43 = vld [vmem:[%s5155_s12 + $0x290] sm:$0xff] }
 0x3b7   : > { %v2809_v59 = vpop.xlane.xlu1 %2808  ;;  %2901 = vmax.xlane.f32.xlu0 %v2900_v61  ;;  %v2812_v57 = vpop.xlane.xlu0 %2811  ;;  %v3170_v61 = vld [vmem:[%s5155_s12 + $0x48] sm:$0xff] }
 0x3b8   : > { %v3299_v23 = vmax.f32 %v3171_v56, %v2809_v59  ;;  %v3300_v45 = vmax.f32 %v3172_v14, %v2812_v57  ;;  %v3240_v56 = vld [vmem:[%s5155_s12 + $0x278] sm:$0xff] }
 0x3ba   : > { %3428 = vst.msk [vmem:[%s5155_s12 + $0x50] sm:$0xff] %vm304_vm12, %v3299_v23  ;;  %2916 = vmax.xlane.f32.xlu1 %v2915_v62  ;;  %3429 = vst.msk [vmem:[%s5155_s12 + $0x58] sm:$0xff] %vm304_vm12, %v3300_v45  ;;  %v6714_v23 = vld [vmem:[#allocation22_spill] sm:$0xff]  ;;  %v3175_v62 = vld [vmem:[%s5155_s12 + $0x70] sm:$0xff] }
 0x3bb   : > { %v3013_v50 = vpop.xlane.xlu1 %3012  ;;  %3105 = vmax.xlane.f32.xlu0 %v3104_v25  ;;  %v3016_v59 = vpop.xlane.xlu0 %3015  ;;  %v2445_v63 = vadd.f32 %v5859_v51, %v6714_v23  ;;  %v3173_v45 = vld [vmem:[%s5155_s12 + $0x60] sm:$0xff] }
 0x3bc   : > { %v3367_v21 = vmax.f32 %v3239_v47, %v3013_v50  ;;  %v3368_v7 = vmax.f32 %v3240_v56, %v3016_v59  ;;  %v6716_v50 = vld [vmem:[#allocation64_spill] sm:$0xff]  ;;  %v3241_v23 = vld [vmem:[%s5155_s12 + $0x280] sm:$0xff] }
 0x3bd   : > { %v2717_v30 = vadd.f32 %v5861_v33, %v6716_v50  ;;  %v2912_v40 = vsel %vm2776_vm11, %v2445_v63, -inf  ;;  %v3244_v63 = vld [vmem:[%s5155_s12 + $0x298] sm:$0xff]  ;;  %v3174_v50 = vld [vmem:[%s5155_s12 + $0x68] sm:$0xff] }
 0x3be   : > { %3496 = vst.msk [vmem:[%s5155_s12 + $0x270] sm:$0xff] %vm304_vm12, %v3367_v21  ;;  %3120 = vmax.xlane.f32.xlu1 %v3119_v44  ;;  %3497 = vst.msk [vmem:[%s5155_s12 + $0x278] sm:$0xff] %vm304_vm12, %v3368_v7  ;;  %v2927_v21 = vsel %vm2776_vm11, %v2466_v26, -inf  ;;  %v6717_v44 = vld [vmem:[#allocation25_spill] sm:$0xff] }
 0x3bf   : > { %v2803_v11 = vpop.xlane.xlu1 %2802  ;;  %2919 = vmax.xlane.f32.xlu0 %v2918_v36  ;;  %v2806_v47 = vpop.xlane.xlu0 %2805  ;;  %v2458_v25 = vadd.f32 %v5875_v31, %v6717_v44  ;;  %v6720_v36 = vld [vmem:[#allocation66_spill] sm:$0xff]  ;;  %v6726_v44 = vld [vmem:[#allocation3_spill] sm:$0xff] }
 0x3c0   : > { %v3297_v46 = vmax.f32 %v3169_v52, %v2803_v11  ;;  %v3298_v15 = vmax.f32 %v3170_v61, %v2806_v47  ;;  %v6718_v52 = vld [vmem:[#allocation28_spill] sm:$0xff]  ;;  %v6719_v11 = vld [vmem:[#allocation67_spill] sm:$0xff] }
 0x3c1   : > { %v2469_v14 = vadd.f32 %v5879_v49, %v6718_v52  ;;  %v3131_v57 = vsel %vm2776_vm11, %v6719_v11, -inf  ;;  %v6724_v61 = vld [vmem:[#allocation31_spill] sm:$0xff]  ;;  %v6727_v52 = vld [vmem:[#allocation32_spill] sm:$0xff] }
 0x3c2   : > { %3426 = vst.msk [vmem:[%s5155_s12 + $0x40] sm:$0xff] %vm304_vm12, %v3297_v46  ;;  %2910 = vmax.xlane.f32.xlu1 %v2909_v35  ;;  %3427 = vst.msk [vmem:[%s5155_s12 + $0x48] sm:$0xff] %vm304_vm12, %v3298_v15  ;;  %v3116_v46 = vsel %vm2776_vm11, %v2717_v30, -inf  ;;  %v3179_v15 = vld [vmem:[%s5155_s12 + $0x90] sm:$0xff] }
 0x3c3   : > { %v3007_v48 = vpop.xlane.xlu1 %3006  ;;  %3123 = vmax.xlane.f32.xlu0 %v3122_v34  ;;  %v3010_v6 = vpop.xlane.xlu0 %3009  ;;  %v2930_v7 = vsel %vm2776_vm11, %v2469_v14, -inf  ;;  %v6723_v34 = vld [vmem:[#allocation26_spill] sm:$0xff]  ;;  %v6728_v14 = vld [vmem:[#allocation45_spill] sm:$0xff] }
 0x3c4   : > { %v3365_v55 = vmax.f32 %v3237_v37, %v3007_v48  ;;  %v3366_v33 = vmax.f32 %v3238_v58, %v3010_v6  ;;  %v6721_v37 = vld [vmem:[#allocation68_spill] sm:$0xff]  ;;  %v6722_v48 = vld [vmem:[#allocation69_spill] sm:$0xff]  ;;  %v2485_v11 = vadd.f32 %v6728_v14, %v6727_v52 }
 0x3c5   : > { %v2730_v56 = vadd.f32 %v6721_v37, %v6720_v36  ;;  %v2741_v59 = vadd.f32 %v6722_v48, %v5951_v2  ;;  %v3247_v6 = vld [vmem:[%s5155_s12 + $0x2b0] sm:$0xff]  ;;  %v3184_v52 = vld [vmem:[%s5155_s12 + $0xb8] sm:$0xff] }
 0x3c6   : > { %3494 = vst.msk [vmem:[%s5155_s12 + $0x260] sm:$0xff] %vm304_vm12, %v3365_v55  ;;  %3114 = vmax.xlane.f32.xlu1 %v3113_v17  ;;  %3495 = vst.msk [vmem:[%s5155_s12 + $0x268] sm:$0xff] %vm304_vm12, %v3366_v33  ;;  %v2921_v55 = vsel %vm2776_vm11, %v2458_v25, -inf  ;;  %v6729_v36 = vld [vmem:[#allocation4_spill] sm:$0xff] }
 0x3c7   : > { %v2821_v51 = vpop.xlane.xlu1 %2820  ;;  %2913 = vmax.xlane.f32.xlu0 %v2912_v40  ;;  %v2824_v42 = vpop.xlane.xlu0 %2823  ;;  %v3125_v47 = vsel %vm2776_vm11, %v2730_v56, -inf  ;;  %v2733_v40 = vadd.f32 %v5889_v3, %v5921_v28  ;;  %v2746_v37 = vadd.f32 %v6729_v36, %v5967_v24  ;;  %v6730_v56 = vld [vmem:[#allocation47_spill] sm:$0xff]  ;;  %v3249_v36 = vld [vmem:[%s5155_s12 + $0x2c0] sm:$0xff] }
 0x3c8   : > { %v3303_v53 = vmax.f32 %v3175_v62, %v2821_v51  ;;  %v3304_v35 = vmax.f32 %v3176_v0, %v2824_v42  ;;  %v2461_v62 = vadd.f32 %v5887_v12, %v6723_v34  ;;  %v2482_v51 = vadd.f32 %v5899_v54, %v6724_v61  ;;  %v3180_v0 = vld [vmem:[%s5155_s12 + $0x98] sm:$0xff] }
 0x3c9   : > { %v2757_v48 = vadd.f32 %v6730_v56, %v5983_v39 }
 0x3ca   : > { %3432 = vst.msk [vmem:[%s5155_s12 + $0x70] sm:$0xff] %vm304_vm12, %v3303_v53  ;;  %2928 = vmax.xlane.f32.xlu1 %v2927_v21  ;;  %3433 = vst.msk [vmem:[%s5155_s12 + $0x78] sm:$0xff] %vm304_vm12, %v3304_v35  ;;  %v3134_v53 = vsel %vm2776_vm11, %v2741_v59, -inf  ;;  %v2939_v58 = vsel %vm2776_vm11, %v2482_v51, -inf  ;;  %v3183_v51 = vld [vmem:[%s5155_s12 + $0xb0] sm:$0xff] }
 0x3cb   : > { %v3025_v16 = vpop.xlane.xlu1 %3024  ;;  %3117 = vmax.xlane.f32.xlu0 %v3116_v46  ;;  %v3128_v46 = vsel %vm2776_vm11, %v2733_v40, -inf  ;;  %v3146_v61 = vsel %vm2776_vm11, %v2757_v48, -inf }
 0x3cc   : > { %v3371_v9 = vmax.f32 %v3243_v43, %v3025_v16  ;;  %v2754_v43 = vadd.f32 %v5901_v22, %v5987_v13  ;;  %v2924_v16 = vsel %vm2776_vm11, %v2461_v62, -inf  ;;  %v6725_v13 = vld [vmem:[#allocation29_spill] sm:$0xff]  ;;  %v3137_v62 = vsel %vm2776_vm11, %v2746_v37, -inf }
 0x3cd   : > { %v2474_v25 = vadd.f32 %v6726_v44, %v6725_v13  ;;  %v3252_v37 = vld [vmem:[%s5155_s12 + $0x2d8] sm:$0xff] }
 0x3ce   : > { %3500 = vst.msk [vmem:[%s5155_s12 + $0x290] sm:$0xff] %vm304_vm12, %v3371_v9  ;;  %3132 = vmax.xlane.f32.xlu1 %v3131_v57  ;;  %v3242_v9 = vld [vmem:[%s5155_s12 + $0x288] sm:$0xff]  ;;  %v3143_v57 = vsel %vm2776_vm11, %v2754_v43, -inf  ;;  %v3251_v43 = vld [vmem:[%s5155_s12 + $0x2d0] sm:$0xff] }
 0x3cf   : > { %v2815_v31 = vpop.xlane.xlu1 %2814  ;;  %2931 = vmax.xlane.f32.xlu0 %v2930_v7  ;;  %v2933_v59 = vsel %vm2776_vm11, %v2474_v25, -inf  ;;  %v3245_v7 = vld [vmem:[%s5155_s12 + $0x2a0] sm:$0xff] }
 0x3d0   : > { %v3301_v49 = vmax.f32 %v3173_v45, %v2815_v31  ;;  %v3028_v26 = vpop.xlane.xlu0 %3027  ;;  %v3177_v45 = vld [vmem:[%s5155_s12 + $0x80] sm:$0xff] }
 0x3d1   : > { %v3372_v2 = vmax.f32 %v3244_v63, %v3028_v26  ;;  %v6731_v26 = vld [vmem:[#allocation30_spill] sm:$0xff] }
 0x3d2   : > { %3430 = vst.msk [vmem:[%s5155_s12 + $0x60] sm:$0xff] %vm304_vm12, %v3301_v49  ;;  %2922 = vmax.xlane.f32.xlu1 %v2921_v55  ;;  %v2942_v55 = vsel %vm2776_vm11, %v2485_v11, -inf  ;;  %v3181_v25 = vld [vmem:[%s5155_s12 + $0xa0] sm:$0xff] }
 0x3d3   : > { %v3019_v5 = vpop.xlane.xlu1 %3018  ;;  %3501 = vst.msk [vmem:[%s5155_s12 + $0x298] sm:$0xff] %vm304_vm12, %v3372_v2  ;;  %3135 = vmax.xlane.f32.xlu0 %v3134_v53  ;;  %v6732_v2 = vld [vmem:[#allocation35_spill] sm:$0xff] }
 0x3d4   : > { %v3369_v17 = vmax.f32 %v3241_v23, %v3019_v5  ;;  %v2818_v30 = vpop.xlane.xlu0 %2817  ;;  %v3248_v23 = vld [vmem:[%s5155_s12 + $0x2b8] sm:$0xff]  ;;  %v2498_v34 = vadd.f32 %v5929_v18, %v6732_v2 }
 0x3d5   : > { %v3302_v54 = vmax.f32 %v3174_v50, %v2818_v30  ;;  %v6733_v50 = vld [vmem:[#allocation2_spill] sm:$0xff]  ;;  %v6734_v30 = vld [vmem:[#allocation33_spill] sm:$0xff] }
 0x3d6   : > { %3498 = vst.msk [vmem:[%s5155_s12 + $0x280] sm:$0xff] %vm304_vm12, %v3369_v17  ;;  %3126 = vmax.xlane.f32.xlu1 %v3125_v47  ;;  %v2477_v17 = vadd.f32 %v5915_v60, %v6731_v26  ;;  %v3178_v47 = vld [vmem:[%s5155_s12 + $0x88] sm:$0xff]  ;;  %v3187_v26 = vld [vmem:[%s5155_s12 + $0xd0] sm:$0xff] }
 0x3d7   : > { %v2833_v12 = vpop.xlane.xlu1 %2832  ;;  %3431 = vst.msk [vmem:[%s5155_s12 + $0x68] sm:$0xff] %vm304_vm12, %v3302_v54  ;;  %2925 = vmax.xlane.f32.xlu0 %v2924_v16  ;;  %v2951_v54 = vsel %vm2776_vm11, %v2498_v34, -inf }
 0x3d8   : > { %v3307_v21 = vmax.f32 %v3179_v15, %v2833_v12  ;;  %v3022_v28 = vpop.xlane.xlu0 %3021  ;;  %v2749_v12 = vadd.f32 %v6733_v50, %v5963_v29  ;;  %v2936_v40 = vsel %vm2776_vm11, %v2477_v17, -inf  ;;  %v3182_v17 = vld [vmem:[%s5155_s12 + $0xa8] sm:$0xff]  ;;  %v3255_v50 = vld [vmem:[%s5155_s12 + $0x2f0] sm:$0xff] }
 0x3d9   : > { %v3370_v22 = vmax.f32 %v3242_v9, %v3022_v28  ;;  %v6735_v9 = vld [vmem:[#allocation46_spill] sm:$0xff]  ;;  %v6736_v28 = vld [vmem:[#allocation36_spill] sm:$0xff] }
 0x3da   : > { %3436 = vst.msk [vmem:[%s5155_s12 + $0x90] sm:$0xff] %vm304_vm12, %v3307_v21  ;;  %2940 = vmax.xlane.f32.xlu1 %v2939_v58  ;;  %v2490_v21 = vadd.f32 %v5933_v10, %v6734_v30  ;;  %v3246_v58 = vld [vmem:[%s5155_s12 + $0x2a8] sm:$0xff]  ;;  %v3140_v44 = vsel %vm2776_vm11, %v2749_v12, -inf }
 0x3db   : > { %v3037_v3 = vpop.xlane.xlu1 %3036  ;;  %3499 = vst.msk [vmem:[%s5155_s12 + $0x288] sm:$0xff] %vm304_vm12, %v3370_v22  ;;  %3129 = vmax.xlane.f32.xlu0 %v3128_v46  ;;  %v6738_v46 = vld [vmem:[#allocation34_spill] sm:$0xff]  ;;  %v3250_v12 = vld [vmem:[%s5155_s12 + $0x2c8] sm:$0xff] }
 0x3dc   : > { %v3375_v33 = vmax.f32 %v3247_v6, %v3037_v3  ;;  %v2836_v42 = vpop.xlane.xlu0 %2835  ;;  %v2762_v3 = vadd.f32 %v6735_v9, %v6003_v27  ;;  %v2945_v13 = vsel %vm2776_vm11, %v2490_v21, -inf  ;;  %v3188_v9 = vld [vmem:[%s5155_s12 + $0xd8] sm:$0xff] }
 0x3dd   : > { %v3308_v35 = vmax.f32 %v3180_v0, %v2836_v42  ;;  %v6739_v0 = vld [vmem:[#allocation39_spill] sm:$0xff] }
 0x3de   : > { %3504 = vst.msk [vmem:[%s5155_s12 + $0x2b0] sm:$0xff] %vm304_vm12, %v3375_v33  ;;  %3144 = vmax.xlane.f32.xlu1 %v3143_v57  ;;  %v6737_v33 = vld [vmem:[#allocation50_spill] sm:$0xff] }
 0x3df   : > { %v2827_v31 = vpop.xlane.xlu1 %2826  ;;  %3437 = vst.msk [vmem:[%s5155_s12 + $0x98] sm:$0xff] %vm304_vm12, %v3308_v35  ;;  %2943 = vmax.xlane.f32.xlu0 %v2942_v55  ;;  %v2501_v22 = vadd.f32 %v6737_v33, %v6736_v28  ;;  %v6741_v55 = vld [vmem:[#allocation6_spill] sm:$0xff]  ;;  %v6749_v33 = vld [vmem:[#allocation7_spill] sm:$0xff] }
 0x3e0   : > { %v3305_v49 = vmax.f32 %v3177_v45, %v2827_v31  ;;  %v3040_v63 = vpop.xlane.xlu0 %3039  ;;  %v2493_v45 = vadd.f32 %v5945_v19, %v6738_v46  ;;  %v6740_v31 = vld [vmem:[#allocation8_spill] sm:$0xff] }
 0x3e1   : > { %v3376_v39 = vmax.f32 %v3248_v23, %v3040_v63  ;;  %v2514_v42 = vadd.f32 %v6740_v31, %v6739_v0  ;;  %v2954_v35 = vsel %vm2776_vm11, %v2501_v22, -inf  ;;  %v6742_v23 = vld [vmem:[#allocation37_spill] sm:$0xff]  ;;  %v2770_v22 = vadd.f32 %v6749_v33, %v6019_v4  ;;  %v6752_v0 = vld [vmem:[#allocation42_spill] sm:$0xff] }
 0x3e2   : > { %3434 = vst.msk [vmem:[%s5155_s12 + $0x80] sm:$0xff] %vm304_vm12, %v3305_v49  ;;  %2934 = vmax.xlane.f32.xlu1 %v2933_v59  ;;  %v3149_v49 = vsel %vm2776_vm11, %v2762_v3, -inf  ;;  %v2525_v31 = vadd.f32 %v5997_v41, %v6752_v0  ;;  %v3264_v33 = vld [vmem:[%s5155_s12 + $0x338] sm:$0xff] }
 0x3e3   : > { %v3031_v24 = vpop.xlane.xlu1 %3030  ;;  %3505 = vst.msk [vmem:[%s5155_s12 + $0x2b8] sm:$0xff] %vm304_vm12, %v3376_v39  ;;  %3147 = vmax.xlane.f32.xlu0 %v3146_v61  ;;  %v2948_v39 = vsel %vm2776_vm11, %v2493_v45, -inf  ;;  %v6744_v61 = vld [vmem:[#allocation40_spill] sm:$0xff] }
 0x3e4   : > { %v3373_v5 = vmax.f32 %v3245_v7, %v3031_v24  ;;  %v2830_v53 = vpop.xlane.xlu0 %2829  ;;  %v2765_v7 = vadd.f32 %v6741_v55, %v6001_v38  ;;  %v6743_v24 = vld [vmem:[#allocation48_spill] sm:$0xff]  ;;  %v2972_v55 = vsel %vm2776_vm11, %v2525_v31, -inf }
 0x3e5   : > { %v3306_v18 = vmax.f32 %v3178_v47, %v2830_v53  ;;  %v2506_v63 = vadd.f32 %v6743_v24, %v6742_v23  ;;  %v3254_v23 = vld [vmem:[%s5155_s12 + $0x2e8] sm:$0xff] }
 0x3e6   : > { %3502 = vst.msk [vmem:[%s5155_s12 + $0x2a0] sm:$0xff] %vm304_vm12, %v3373_v5  ;;  %3138 = vmax.xlane.f32.xlu1 %v3137_v62  ;;  %v2963_v5 = vsel %vm2776_vm11, %v2514_v42, -inf  ;;  %v3155_v42 = vsel %vm2776_vm11, %v2770_v22, -inf }
 0x3e7   : > { %v2845_v60 = vpop.xlane.xlu1 %2844  ;;  %3435 = vst.msk [vmem:[%s5155_s12 + $0x88] sm:$0xff] %vm304_vm12, %v3306_v18  ;;  %2937 = vmax.xlane.f32.xlu0 %v2936_v40  ;;  %v3152_v18 = vsel %vm2776_vm11, %v2765_v7, -inf  ;;  %v6747_v40 = vld [vmem:[#allocation38_spill] sm:$0xff]  ;;  %v3259_v7 = vld [vmem:[%s5155_s12 + $0x310] sm:$0xff] }
 0x3e8   : > { %v3311_v15 = vmax.f32 %v3183_v51, %v2845_v60  ;;  %v3034_v16 = vpop.xlane.xlu0 %3033  ;;  %v6745_v51 = vld [vmem:[#allocation51_spill] sm:$0xff] }
 0x3e9   : > { %v3374_v10 = vmax.f32 %v3246_v58, %v3034_v16  ;;  %v2517_v47 = vadd.f32 %v6745_v51, %v6744_v61  ;;  %v6746_v60 = vld [vmem:[#allocation43_spill] sm:$0xff]  ;;  %v6748_v58 = vld [vmem:[#allocation41_spill] sm:$0xff]  ;;  %v3257_v61 = vld [vmem:[%s5155_s12 + $0x300] sm:$0xff] }
 0x3ea   : > { %3440 = vst.msk [vmem:[%s5155_s12 + $0xb0] sm:$0xff] %vm304_vm12, %v3311_v15  ;;  %2952 = vmax.xlane.f32.xlu1 %v2951_v54  ;;  %v2530_v53 = vadd.f32 %v5985_v1, %v6746_v60  ;;  %v2957_v15 = vsel %vm2776_vm11, %v2506_v63, -inf  ;;  %v3260_v51 = vld [vmem:[%s5155_s12 + $0x318] sm:$0xff] }
 0x3eb   : > { %v3049_v29 = vpop.xlane.xlu1 %3048  ;;  %3503 = vst.msk [vmem:[%s5155_s12 + $0x2a8] sm:$0xff] %vm304_vm12, %v3374_v10  ;;  %3141 = vmax.xlane.f32.xlu0 %v3140_v44  ;;  %v3185_v10 = vld [vmem:[%s5155_s12 + $0xc0] sm:$0xff]  ;;  %v6751_v44 = vld [vmem:[#allocation5_spill] sm:$0xff] }
 0x3ec   : > { %v3379_v6 = vmax.f32 %v3251_v43, %v3049_v29  ;;  %v2848_v14 = vpop.xlane.xlu0 %2847  ;;  %v2509_v43 = vadd.f32 %v5973_v32, %v6747_v40  ;;  %v2522_v29 = vadd.f32 %v5989_v8, %v6748_v58  ;;  %v2975_v16 = vsel %vm2776_vm11, %v2530_v53, -inf  ;;  %v3258_v40 = vld [vmem:[%s5155_s12 + $0x308] sm:$0xff] }
 0x3ed   : > { %v3312_v57 = vmax.f32 %v3184_v52, %v2848_v14  ;;  %v3253_v14 = vld [vmem:[%s5155_s12 + $0x2e0] sm:$0xff] }
 0x3ee   : > { %3508 = vst.msk [vmem:[%s5155_s12 + $0x2d0] sm:$0xff] %vm304_vm12, %v3379_v6  ;;  %2946 = vmax.xlane.f32.xlu1 %v2945_v13  ;;  %v2966_v6 = vsel %vm2776_vm11, %v2517_v47, -inf  ;;  %v6750_v13 = vld [vmem:[#allocation44_spill] sm:$0xff]  ;;  %v2969_v52 = vsel %vm2776_vm11, %v2522_v29, -inf }
 0x3ef   : > { %v2839_v27 = vpop.xlane.xlu1 %2838  ;;  %3441 = vst.msk [vmem:[%s5155_s12 + $0xb8] sm:$0xff] %vm304_vm12, %v3312_v57  ;;  %2955 = vmax.xlane.f32.xlu0 %v2954_v35  ;;  %v3191_v35 = vld [vmem:[%s5155_s12 + $0xf0] sm:$0xff] }
 0x3f0   : > { %v3309_v11 = vmax.f32 %v3181_v25, %v2839_v27  ;;  %v3052_v56 = vpop.xlane.xlu0 %3051  ;;  %v2533_v25 = vadd.f32 %v6751_v44, %v6750_v13  ;;  %v2960_v27 = vsel %vm2776_vm11, %v2509_v43, -inf }
 0x3f1   : > { %v3380_v59 = vmax.f32 %v3252_v37, %v3052_v56 }
 0x3f2   : > { %3438 = vst.msk [vmem:[%s5155_s12 + $0xa0] sm:$0xff] %vm304_vm12, %v3309_v11  ;;  %3150 = vmax.xlane.f32.xlu1 %v3149_v49  ;;  %v3256_v11 = vld [vmem:[%s5155_s12 + $0x2f8] sm:$0xff]  ;;  %v2978_v49 = vsel %vm2776_vm11, %v2533_v25, -inf }
 0x3f3   : > { %v3043_v19 = vpop.xlane.xlu1 %3042  ;;  %3509 = vst.msk [vmem:[%s5155_s12 + $0x2d8] sm:$0xff] %vm304_vm12, %v3380_v59  ;;  %2949 = vmax.xlane.f32.xlu0 %v2948_v39 }
 0x3f4   : > { %v3377_v48 = vmax.f32 %v3249_v36, %v3043_v19  ;;  %v2842_v2 = vpop.xlane.xlu0 %2841  ;;  %v3186_v36 = vld [vmem:[%s5155_s12 + $0xc8] sm:$0xff] }
 0x3f5   : > { %v3310_v62 = vmax.f32 %v3182_v17, %v2842_v2  ;;  %v3192_v17 = vld [vmem:[%s5155_s12 + $0xf8] sm:$0xff] }
 0x3f6   : > { %3506 = vst.msk [vmem:[%s5155_s12 + $0x2c0] sm:$0xff] %vm304_vm12, %v3377_v48  ;;  %2964 = vmax.xlane.f32.xlu1 %v2963_v5  ;;  %v6753_v48 = vld [vmem:[#allocation70_spill] sm:$0xff] }
 0x3f7   : > { %v2857_v38 = vpop.xlane.xlu1 %2856  ;;  %3439 = vst.msk [vmem:[%s5155_s12 + $0xa8] sm:$0xff] %vm304_vm12, %v3310_v62  ;;  %3153 = vmax.xlane.f32.xlu0 %v3152_v18  ;;  %v2773_v59 = vadd.f32 %v6753_v48, %v6017_v20  ;;  %v3189_v20 = vld [vmem:[%s5155_s12 + $0xe0] sm:$0xff]  ;;  %v3195_v18 = vld [vmem:[%s5155_s12 + $0x110] sm:$0xff] }
 0x3f8   : > { %v3315_v34 = vmax.f32 %v3187_v26, %v2857_v38  ;;  %v3046_v21 = vpop.xlane.xlu0 %3045  ;;  %v3265_v48 = vld [vmem:[%s5155_s12 + $0x340] sm:$0xff] }
 0x3f9   : > { %v3378_v1 = vmax.f32 %v3250_v12, %v3046_v21  ;;  %v3158_v26 = vsel %vm2776_vm11, %v2773_v59, -inf  ;;  %v3268_v59 = vld [vmem:[%s5155_s12 + $0x358] sm:$0xff] }
 0x3fa   : > { %3444 = vst.msk [vmem:[%s5155_s12 + $0xd0] sm:$0xff] %vm304_vm12, %v3315_v34  ;;  %2958 = vmax.xlane.f32.xlu1 %v2957_v15 }
 0x3fb   : > { %v3061_v30 = vpop.xlane.xlu1 %3060  ;;  %3507 = vst.msk [vmem:[%s5155_s12 + $0x2c8] sm:$0xff] %vm304_vm12, %v3378_v1  ;;  %2967 = vmax.xlane.f32.xlu0 %v2966_v6  ;;  %v3263_v1 = vld [vmem:[%s5155_s12 + $0x330] sm:$0xff]  ;;  %v3193_v6 = vld [vmem:[%s5155_s12 + $0x100] sm:$0xff] }
 0x3fc   : > { %v3383_v54 = vmax.f32 %v3255_v50, %v3061_v30  ;;  %v2860_v3 = vpop.xlane.xlu0 %2859  ;;  %v3190_v50 = vld [vmem:[%s5155_s12 + $0xe8] sm:$0xff] }
 0x3fd   : > { %v3316_v8 = vmax.f32 %v3188_v9, %v2860_v3 }
 0x3fe   : > { %3512 = vst.msk [vmem:[%s5155_s12 + $0x2f0] sm:$0xff] %vm304_vm12, %v3383_v54  ;;  %2976 = vmax.xlane.f32.xlu1 %v2975_v16 }
 0x3ff   : > { %v2851_v32 = vpop.xlane.xlu1 %2850  ;;  %3445 = vst.msk [vmem:[%s5155_s12 + $0xd8] sm:$0xff] %vm304_vm12, %v3316_v8  ;;  %2961 = vmax.xlane.f32.xlu0 %v2960_v27  ;;  %v3261_v8 = vld [vmem:[%s5155_s12 + $0x320] sm:$0xff]  ;;  %v3194_v27 = vld [vmem:[%s5155_s12 + $0x108] sm:$0xff] }
 0x400   : > { %v3313_v28 = vmax.f32 %v3185_v10, %v2851_v32  ;;  %v3064_v57 = vpop.xlane.xlu0 %3063  ;;  %v3196_v10 = vld [vmem:[%s5155_s12 + $0x118] sm:$0xff] }
 0x401   : > { %v3384_v45 = vmax.f32 %v3256_v11, %v3064_v57 }
 0x402   : > { %3442 = vst.msk [vmem:[%s5155_s12 + $0xc0] sm:$0xff] %vm304_vm12, %v3313_v28  ;;  %2970 = vmax.xlane.f32.xlu1 %v2969_v52  ;;  %v3199_v52 = vld [vmem:[%s5155_s12 + $0x130] sm:$0xff] }
 0x403   : > { %v3055_v4 = vpop.xlane.xlu1 %3054  ;;  %3513 = vst.msk [vmem:[%s5155_s12 + $0x2f8] sm:$0xff] %vm304_vm12, %v3384_v45  ;;  %2979 = vmax.xlane.f32.xlu0 %v2978_v49  ;;  %v3262_v45 = vld [vmem:[%s5155_s12 + $0x328] sm:$0xff] }
 0x404   : > { %v3381_v46 = vmax.f32 %v3253_v14, %v3055_v4  ;;  %v2854_v19 = vpop.xlane.xlu0 %2853 }
 0x405   : > { %v3314_v56 = vmax.f32 %v3186_v36, %v2854_v19  ;;  %v3200_v36 = vld [vmem:[%s5155_s12 + $0x138] sm:$0xff] }
 0x406   : > { %3510 = vst.msk [vmem:[%s5155_s12 + $0x2e0] sm:$0xff] %vm304_vm12, %v3381_v46  ;;  %3156 = vmax.xlane.f32.xlu1 %v3155_v42  ;;  %v3267_v46 = vld [vmem:[%s5155_s12 + $0x350] sm:$0xff] }
 0x407   : > { %v2869_v37 = vpop.xlane.xlu1 %2868  ;;  %3443 = vst.msk [vmem:[%s5155_s12 + $0xc8] sm:$0xff] %vm304_vm12, %v3314_v56  ;;  %2973 = vmax.xlane.f32.xlu0 %v2972_v55 }
 0x408   : > { %v3319_v41 = vmax.f32 %v3191_v35, %v2869_v37  ;;  %v3058_v63 = vpop.xlane.xlu0 %3057  ;;  %v3197_v35 = vld [vmem:[%s5155_s12 + $0x120] sm:$0xff] }
 0x409   : > { %v3382_v39 = vmax.f32 %v3254_v23, %v3058_v63  ;;  %v3203_v63 = vld [vmem:[%s5155_s12 + $0x150] sm:$0xff] }
 0x40a   : > { %3448 = vst.msk [vmem:[%s5155_s12 + $0xf0] sm:$0xff] %vm304_vm12, %v3319_v41 }
 0x40b   : > { %v3073_v24 = vpop.xlane.xlu1 %3072  ;;  %3511 = vst.msk [vmem:[%s5155_s12 + $0x2e8] sm:$0xff] %vm304_vm12, %v3382_v39  ;;  %3159 = vmax.xlane.f32.xlu0 %v3158_v26 }
 0x40c   : > { %v3387_v5 = vmax.f32 %v3259_v7, %v3073_v24  ;;  %v2872_v2 = vpop.xlane.xlu0 %2871 }
 0x40d   : > { %v3320_v62 = vmax.f32 %v3192_v17, %v2872_v2  ;;  %v3266_v2 = vld [vmem:[%s5155_s12 + $0x348] sm:$0xff] }
 0x40e   : > { %3516 = vst.msk [vmem:[%s5155_s12 + $0x310] sm:$0xff] %vm304_vm12, %v3387_v5  ;;  %v3198_v5 = vld [vmem:[%s5155_s12 + $0x128] sm:$0xff] }
 0x40f   : > { %v2863_v38 = vpop.xlane.xlu1 %2862  ;;  %3449 = vst.msk [vmem:[%s5155_s12 + $0xf8] sm:$0xff] %vm304_vm12, %v3320_v62 }
 0x410   : > { %v3317_v34 = vmax.f32 %v3189_v20, %v2863_v38  ;;  %v3076_v60 = vpop.xlane.xlu0 %3075  ;;  %v3271_v38 = vld [vmem:[%s5155_s12 + $0x370] sm:$0xff] }
 0x411   : > { %v3388_v15 = vmax.f32 %v3260_v51, %v3076_v60  ;;  %v3204_v60 = vld [vmem:[%s5155_s12 + $0x158] sm:$0xff] }
 0x412   : > { %3446 = vst.msk [vmem:[%s5155_s12 + $0xe0] sm:$0xff] %vm304_vm12, %v3317_v34 }
 0x413   : > { %v3067_v47 = vpop.xlane.xlu1 %3066  ;;  %3517 = vst.msk [vmem:[%s5155_s12 + $0x318] sm:$0xff] %vm304_vm12, %v3388_v15 }
 0x414   : > { %v3385_v53 = vmax.f32 %v3257_v61, %v3067_v47  ;;  %v2866_v30 = vpop.xlane.xlu0 %2865  ;;  %v3201_v47 = vld [vmem:[%s5155_s12 + $0x140] sm:$0xff] }
 0x415   : > { %v3318_v54 = vmax.f32 %v3190_v50, %v2866_v30  ;;  %v3272_v30 = vld [vmem:[%s5155_s12 + $0x378] sm:$0xff] }
 0x416   : > { %3514 = vst.msk [vmem:[%s5155_s12 + $0x300] sm:$0xff] %vm304_vm12, %v3385_v53 }
 0x417   : > { %v2881_v12 = vpop.xlane.xlu1 %2880  ;;  %3447 = vst.msk [vmem:[%s5155_s12 + $0xe8] sm:$0xff] %vm304_vm12, %v3318_v54 }
 0x418   : > { %v3323_v21 = vmax.f32 %v3195_v18, %v2881_v12  ;;  %v3070_v58 = vpop.xlane.xlu0 %3069  ;;  %v3269_v12 = vld [vmem:[%s5155_s12 + $0x360] sm:$0xff] }
 0x419   : > { %v3386_v16 = vmax.f32 %v3258_v40, %v3070_v58  ;;  %v3202_v58 = vld [vmem:[%s5155_s12 + $0x148] sm:$0xff] }
 0x41a   : > { %3452 = vst.msk [vmem:[%s5155_s12 + $0x110] sm:$0xff] %vm304_vm12, %v3323_v21 }
 0x41b   : > { %v3085_v43 = vpop.xlane.xlu1 %3084  ;;  %3515 = vst.msk [vmem:[%s5155_s12 + $0x308] sm:$0xff] %vm304_vm12, %v3386_v16 }
 0x41c   : > { %v3391_v29 = vmax.f32 %v3263_v1, %v3085_v43  ;;  %v2884_v32 = vpop.xlane.xlu0 %2883  ;;  %v3207_v43 = vld [vmem:[%s5155_s12 + $0x170] sm:$0xff] }
 0x41d   : > { %v3324_v28 = vmax.f32 %v3196_v10, %v2884_v32  ;;  %v3270_v32 = vld [vmem:[%s5155_s12 + $0x368] sm:$0xff] }
 0x41e   : > { %3520 = vst.msk [vmem:[%s5155_s12 + $0x330] sm:$0xff] %vm304_vm12, %v3391_v29 }
 0x41f   : > { %v2875_v9 = vpop.xlane.xlu1 %2874  ;;  %3453 = vst.msk [vmem:[%s5155_s12 + $0x118] sm:$0xff] %vm304_vm12, %v3324_v28 }
 0x420   : > { %v3321_v3 = vmax.f32 %v3193_v6, %v2875_v9  ;;  %v3088_v13 = vpop.xlane.xlu0 %3087  ;;  %v3275_v9 = vld [vmem:[%s5155_s12 + $0x390] sm:$0xff] }
 0x421   : > { %v3392_v25 = vmax.f32 %v3264_v33, %v3088_v13  ;;  %v3208_v13 = vld [vmem:[%s5155_s12 + $0x178] sm:$0xff] }
 0x422   : > { %3450 = vst.msk [vmem:[%s5155_s12 + $0x100] sm:$0xff] %vm304_vm12, %v3321_v3 }
 0x423   : > { %v3079_v22 = vpop.xlane.xlu1 %3078  ;;  %3521 = vst.msk [vmem:[%s5155_s12 + $0x338] sm:$0xff] %vm304_vm12, %v3392_v25 }
 0x424   : > { %v3389_v44 = vmax.f32 %v3261_v8, %v3079_v22  ;;  %v2878_v11 = vpop.xlane.xlu0 %2877  ;;  %v3205_v22 = vld [vmem:[%s5155_s12 + $0x160] sm:$0xff] }
 0x425   : > { %v3322_v57 = vmax.f32 %v3194_v27, %v2878_v11  ;;  %v3276_v11 = vld [vmem:[%s5155_s12 + $0x398] sm:$0xff] }
 0x426   : > { %3518 = vst.msk [vmem:[%s5155_s12 + $0x320] sm:$0xff] %vm304_vm12, %v3389_v44 }
 0x427   : > { %v2893_v14 = vpop.xlane.xlu1 %2892  ;;  %3451 = vst.msk [vmem:[%s5155_s12 + $0x108] sm:$0xff] %vm304_vm12, %v3322_v57 }
 0x428   : > { %v3327_v4 = vmax.f32 %v3199_v52, %v2893_v14  ;;  %v3082_v31 = vpop.xlane.xlu0 %3081  ;;  %v3273_v14 = vld [vmem:[%s5155_s12 + $0x380] sm:$0xff] }
 0x429   : > { %v3390_v49 = vmax.f32 %v3262_v45, %v3082_v31  ;;  %v3206_v31 = vld [vmem:[%s5155_s12 + $0x168] sm:$0xff] }
 0x42a   : > { %3456 = vst.msk [vmem:[%s5155_s12 + $0x130] sm:$0xff] %vm304_vm12, %v3327_v4 }
 0x42b   : > { %v3097_v0 = vpop.xlane.xlu1 %3096  ;;  %3519 = vst.msk [vmem:[%s5155_s12 + $0x328] sm:$0xff] %vm304_vm12, %v3390_v49 }
 0x42c   : > { %v3395_v42 = vmax.f32 %v3267_v46, %v3097_v0  ;;  %v2896_v19 = vpop.xlane.xlu0 %2895  ;;  %v3211_v0 = vld [vmem:[%s5155_s12 + $0x190] sm:$0xff] }
 0x42d   : > { %v3328_v56 = vmax.f32 %v3200_v36, %v2896_v19  ;;  %v3274_v19 = vld [vmem:[%s5155_s12 + $0x388] sm:$0xff] }
 0x42e   : > { %3524 = vst.msk [vmem:[%s5155_s12 + $0x350] sm:$0xff] %vm304_vm12, %v3395_v42 }
 0x42f   : > { %v2887_v37 = vpop.xlane.xlu1 %2886  ;;  %3457 = vst.msk [vmem:[%s5155_s12 + $0x138] sm:$0xff] %vm304_vm12, %v3328_v56 }
 0x430   : > { %v3325_v41 = vmax.f32 %v3197_v35, %v2887_v37  ;;  %v3100_v7 = vpop.xlane.xlu0 %3099  ;;  %v3279_v37 = vld [vmem:[%s5155_s12 + $0x3b0] sm:$0xff] }
 0x431   : > { %v3396_v24 = vmax.f32 %v3268_v59, %v3100_v7  ;;  %v3212_v7 = vld [vmem:[%s5155_s12 + $0x198] sm:$0xff] }
 0x432   : > { %3454 = vst.msk [vmem:[%s5155_s12 + $0x120] sm:$0xff] %vm304_vm12, %v3325_v41 }
 0x433   : > { %v3091_v55 = vpop.xlane.xlu1 %3090  ;;  %3525 = vst.msk [vmem:[%s5155_s12 + $0x358] sm:$0xff] %vm304_vm12, %v3396_v24 }
 0x434   : > { %v3393_v23 = vmax.f32 %v3265_v48, %v3091_v55  ;;  %v2890_v26 = vpop.xlane.xlu0 %2889  ;;  %v3209_v55 = vld [vmem:[%s5155_s12 + $0x180] sm:$0xff] }
 0x435   : > { %v3326_v17 = vmax.f32 %v3198_v5, %v2890_v26  ;;  %v3280_v26 = vld [vmem:[%s5155_s12 + $0x3b8] sm:$0xff] }
 0x436   : > { %3522 = vst.msk [vmem:[%s5155_s12 + $0x340] sm:$0xff] %vm304_vm12, %v3393_v23 }
 0x437   : > { %v2905_v39 = vpop.xlane.xlu1 %2904  ;;  %3455 = vst.msk [vmem:[%s5155_s12 + $0x128] sm:$0xff] %vm304_vm12, %v3326_v17 }
 0x438   : > { %v3331_v20 = vmax.f32 %v3203_v63, %v2905_v39  ;;  %v3094_v62 = vpop.xlane.xlu0 %3093  ;;  %v3277_v39 = vld [vmem:[%s5155_s12 + $0x3a0] sm:$0xff] }
 0x439   : > { %v3394_v51 = vmax.f32 %v3266_v2, %v3094_v62  ;;  %v3210_v62 = vld [vmem:[%s5155_s12 + $0x188] sm:$0xff] }
 0x43a   : > { %3460 = vst.msk [vmem:[%s5155_s12 + $0x150] sm:$0xff] %vm304_vm12, %v3331_v20 }
 0x43b   : > { %v3109_v34 = vpop.xlane.xlu1 %3108  ;;  %3523 = vst.msk [vmem:[%s5155_s12 + $0x348] sm:$0xff] %vm304_vm12, %v3394_v51 }
 0x43c   : > { %v3399_v61 = vmax.f32 %v3271_v38, %v3109_v34  ;;  %v2908_v15 = vpop.xlane.xlu0 %2907  ;;  %v3215_v34 = vld [vmem:[%s5155_s12 + $0x1b0] sm:$0xff] }
 0x43d   : > { %v3332_v50 = vmax.f32 %v3204_v60, %v2908_v15  ;;  %v3278_v15 = vld [vmem:[%s5155_s12 + $0x3a8] sm:$0xff] }
 0x43e   : > { %3528 = vst.msk [vmem:[%s5155_s12 + $0x370] sm:$0xff] %vm304_vm12, %v3399_v61 }
 0x43f   : > { %v2899_v53 = vpop.xlane.xlu1 %2898  ;;  %3461 = vst.msk [vmem:[%s5155_s12 + $0x158] sm:$0xff] %vm304_vm12, %v3332_v50 }
 0x440   : > { %v3329_v18 = vmax.f32 %v3201_v47, %v2899_v53  ;;  %v3112_v54 = vpop.xlane.xlu0 %3111  ;;  %v3283_v53 = vld [vmem:[%s5155_s12 + $0x3d0] sm:$0xff] }
 0x441   : > { %v3400_v40 = vmax.f32 %v3272_v30, %v3112_v54  ;;  %v3216_v54 = vld [vmem:[%s5155_s12 + $0x1b8] sm:$0xff] }
 0x442   : > { %3458 = vst.msk [vmem:[%s5155_s12 + $0x140] sm:$0xff] %vm304_vm12, %v3329_v18 }
 0x443   : > { %v3103_v21 = vpop.xlane.xlu1 %3102  ;;  %3529 = vst.msk [vmem:[%s5155_s12 + $0x378] sm:$0xff] %vm304_vm12, %v3400_v40 }
 0x444   : > { %v3397_v1 = vmax.f32 %v3269_v12, %v3103_v21  ;;  %v2902_v16 = vpop.xlane.xlu0 %2901  ;;  %v3213_v21 = vld [vmem:[%s5155_s12 + $0x1a0] sm:$0xff] }
 0x445   : > { %v3330_v10 = vmax.f32 %v3202_v58, %v2902_v16  ;;  %v3284_v16 = vld [vmem:[%s5155_s12 + $0x3d8] sm:$0xff] }
 0x446   : > { %3526 = vst.msk [vmem:[%s5155_s12 + $0x360] sm:$0xff] %vm304_vm12, %v3397_v1 }
 0x447   : > { %v2917_v29 = vpop.xlane.xlu1 %2916  ;;  %3459 = vst.msk [vmem:[%s5155_s12 + $0x148] sm:$0xff] %vm304_vm12, %v3330_v10 }
 0x448   : > { %v3335_v6 = vmax.f32 %v3207_v43, %v2917_v29  ;;  %v3106_v28 = vpop.xlane.xlu0 %3105  ;;  %v3281_v29 = vld [vmem:[%s5155_s12 + $0x3c0] sm:$0xff] }
 0x449   : > { %v3398_v33 = vmax.f32 %v3270_v32, %v3106_v28  ;;  %v3214_v28 = vld [vmem:[%s5155_s12 + $0x1a8] sm:$0xff] }
 0x44a   : > { %3464 = vst.msk [vmem:[%s5155_s12 + $0x170] sm:$0xff] %vm304_vm12, %v3335_v6 }
 0x44b   : > { %v3121_v3 = vpop.xlane.xlu1 %3120  ;;  %3527 = vst.msk [vmem:[%s5155_s12 + $0x368] sm:$0xff] %vm304_vm12, %v3398_v33 }
 0x44c   : > { %v3403_v8 = vmax.f32 %v3275_v9, %v3121_v3  ;;  %v2920_v25 = vpop.xlane.xlu0 %2919  ;;  %v3219_v3 = vld [vmem:[%s5155_s12 + $0x1d0] sm:$0xff] }
 0x44d   : > { %v3336_v27 = vmax.f32 %v3208_v13, %v2920_v25  ;;  %v3282_v25 = vld [vmem:[%s5155_s12 + $0x3c8] sm:$0xff] }
 0x44e   : > { %3532 = vst.msk [vmem:[%s5155_s12 + $0x390] sm:$0xff] %vm304_vm12, %v3403_v8 }
 0x44f   : > { %v2911_v44 = vpop.xlane.xlu1 %2910  ;;  %3465 = vst.msk [vmem:[%s5155_s12 + $0x178] sm:$0xff] %vm304_vm12, %v3336_v27 }
 0x450   : > { %v3333_v52 = vmax.f32 %v3205_v22, %v2911_v44  ;;  %v3124_v57 = vpop.xlane.xlu0 %3123  ;;  %v3217_v44 = vld [vmem:[%s5155_s12 + $0x1c0] sm:$0xff] }
 0x451   : > { %v3404_v45 = vmax.f32 %v3276_v11, %v3124_v57  ;;  %v3220_v57 = vld [vmem:[%s5155_s12 + $0x1d8] sm:$0xff] }
 0x452   : > { %3462 = vst.msk [vmem:[%s5155_s12 + $0x160] sm:$0xff] %vm304_vm12, %v3333_v52 }
 0x453   : > { %v3115_v4 = vpop.xlane.xlu1 %3114  ;;  %3533 = vst.msk [vmem:[%s5155_s12 + $0x398] sm:$0xff] %vm304_vm12, %v3404_v45 }
 0x454   : > { %v3401_v46 = vmax.f32 %v3273_v14, %v3115_v4  ;;  %v2914_v49 = vpop.xlane.xlu0 %2913  ;;  %v3285_v4 = vld [vmem:[%s5155_s12 + $0x3e0] sm:$0xff] }
 0x455   : > { %v3334_v36 = vmax.f32 %v3206_v31, %v2914_v49  ;;  %v3218_v49 = vld [vmem:[%s5155_s12 + $0x1c8] sm:$0xff] }
 0x456   : > { %3530 = vst.msk [vmem:[%s5155_s12 + $0x380] sm:$0xff] %vm304_vm12, %v3401_v46 }
 0x457   : > { %v2929_v42 = vpop.xlane.xlu1 %2928  ;;  %3463 = vst.msk [vmem:[%s5155_s12 + $0x168] sm:$0xff] %vm304_vm12, %v3334_v36 }
 0x458   : > { %v3339_v35 = vmax.f32 %v3211_v0, %v2929_v42  ;;  %v3118_v56 = vpop.xlane.xlu0 %3117  ;;  %v3223_v42 = vld [vmem:[%s5155_s12 + $0x1f0] sm:$0xff] }
 0x459   : > { %v3402_v59 = vmax.f32 %v3274_v19, %v3118_v56  ;;  %v3286_v56 = vld [vmem:[%s5155_s12 + $0x3e8] sm:$0xff] }
 0x45a   : > { %3468 = vst.msk [vmem:[%s5155_s12 + $0x190] sm:$0xff] %vm304_vm12, %v3339_v35 }
 0x45b   : > { %v3133_v41 = vpop.xlane.xlu1 %3132  ;;  %3531 = vst.msk [vmem:[%s5155_s12 + $0x388] sm:$0xff] %vm304_vm12, %v3402_v59 }
 0x45c   : > { %v3407_v48 = vmax.f32 %v3279_v37, %v3133_v41  ;;  %v2932_v24 = vpop.xlane.xlu0 %2931  ;;  %v3221_v41 = vld [vmem:[%s5155_s12 + $0x1e0] sm:$0xff] }
 0x45d   : > { %v3340_v5 = vmax.f32 %v3212_v7, %v2932_v24  ;;  %v3224_v24 = vld [vmem:[%s5155_s12 + $0x1f8] sm:$0xff] }
 0x45e   : > { %3536 = vst.msk [vmem:[%s5155_s12 + $0x3b0] sm:$0xff] %vm304_vm12, %v3407_v48 }
 0x45f   : > { %v2923_v23 = vpop.xlane.xlu1 %2922  ;;  %3469 = vst.msk [vmem:[%s5155_s12 + $0x198] sm:$0xff] %vm304_vm12, %v3340_v5 }
 0x460   : > { %v3337_v63 = vmax.f32 %v3209_v55, %v2923_v23  ;;  %v3136_v17 = vpop.xlane.xlu0 %3135  ;;  %v3227_v23 = vld [vmem:[%s5155_s12 + $0x210] sm:$0xff] }
 0x461   : > { %v3408_v2 = vmax.f32 %v3280_v26, %v3136_v17  ;;  %v3222_v17 = vld [vmem:[%s5155_s12 + $0x1e8] sm:$0xff] }
 0x462   : > { %3466 = vst.msk [vmem:[%s5155_s12 + $0x180] sm:$0xff] %vm304_vm12, %v3337_v63 }
 0x463   : > { %v3127_v20 = vpop.xlane.xlu1 %3126  ;;  %3537 = vst.msk [vmem:[%s5155_s12 + $0x3b8] sm:$0xff] %vm304_vm12, %v3408_v2 }
 0x464   : > { %v3405_v38 = vmax.f32 %v3277_v39, %v3127_v20  ;;  %v2926_v51 = vpop.xlane.xlu0 %2925  ;;  %v3225_v20 = vld [vmem:[%s5155_s12 + $0x200] sm:$0xff] }
 0x465   : > { %v3338_v60 = vmax.f32 %v3210_v62, %v2926_v51  ;;  %v3228_v51 = vld [vmem:[%s5155_s12 + $0x218] sm:$0xff] }
 0x466   : > { %3534 = vst.msk [vmem:[%s5155_s12 + $0x3a0] sm:$0xff] %vm304_vm12, %v3405_v38 }
 0x467   : > { %v2941_v61 = vpop.xlane.xlu1 %2940  ;;  %3467 = vst.msk [vmem:[%s5155_s12 + $0x188] sm:$0xff] %vm304_vm12, %v3338_v60 }
 0x468   : > { %v3343_v47 = vmax.f32 %v3215_v34, %v2941_v61  ;;  %v3130_v50 = vpop.xlane.xlu0 %3129  ;;  %v3287_v61 = vld [vmem:[%s5155_s12 + $0x3f0] sm:$0xff] }
 0x469   : > { %v3406_v30 = vmax.f32 %v3278_v15, %v3130_v50 }
 0x46a   : > { %3472 = vst.msk [vmem:[%s5155_s12 + $0x1b0] sm:$0xff] %vm304_vm12, %v3343_v47 }
 0x46b   : > { %v3145_v18 = vpop.xlane.xlu1 %3144  ;;  %3535 = vst.msk [vmem:[%s5155_s12 + $0x3a8] sm:$0xff] %vm304_vm12, %v3406_v30  ;;  %v3288_v30 = vld [vmem:[%s5155_s12 + $0x3f8] sm:$0xff] }
 0x46c   : > { %v3411_v12 = vmax.f32 %v3283_v53, %v3145_v18  ;;  %v2944_v40 = vpop.xlane.xlu0 %2943  ;;  %v3226_v18 = vld [vmem:[%s5155_s12 + $0x208] sm:$0xff] }
 0x46d   : > { %v3344_v58 = vmax.f32 %v3216_v54, %v2944_v40 }
 0x46e   : > { %3540 = vst.msk [vmem:[%s5155_s12 + $0x3d0] sm:$0xff] %vm304_vm12, %v3411_v12 }
 0x46f   : > { %v2935_v1 = vpop.xlane.xlu1 %2934  ;;  %3473 = vst.msk [vmem:[%s5155_s12 + $0x1b8] sm:$0xff] %vm304_vm12, %v3344_v58 }
 0x470   : > { %v3341_v43 = vmax.f32 %v3213_v21, %v2935_v1  ;;  %v3148_v10 = vpop.xlane.xlu0 %3147 }
 0x471   : > { %v3412_v32 = vmax.f32 %v3284_v16, %v3148_v10 }
 0x472   : > { %3470 = vst.msk [vmem:[%s5155_s12 + $0x1a0] sm:$0xff] %vm304_vm12, %v3341_v43 }
 0x473   : > { %v3139_v6 = vpop.xlane.xlu1 %3138  ;;  %3541 = vst.msk [vmem:[%s5155_s12 + $0x3d8] sm:$0xff] %vm304_vm12, %v3412_v32 }
 0x474   : > { %v3409_v9 = vmax.f32 %v3281_v29, %v3139_v6  ;;  %v2938_v33 = vpop.xlane.xlu0 %2937 }
 0x475   : > { %v3342_v13 = vmax.f32 %v3214_v28, %v2938_v33 }
 0x476   : > { %3538 = vst.msk [vmem:[%s5155_s12 + $0x3c0] sm:$0xff] %vm304_vm12, %v3409_v9 }
 0x477   : > { %v2953_v8 = vpop.xlane.xlu1 %2952  ;;  %3471 = vst.msk [vmem:[%s5155_s12 + $0x1a8] sm:$0xff] %vm304_vm12, %v3342_v13 }
 0x478   : > { %v3347_v22 = vmax.f32 %v3219_v3, %v2953_v8  ;;  %v3142_v27 = vpop.xlane.xlu0 %3141 }
 0x479   : > { %v3410_v11 = vmax.f32 %v3282_v25, %v3142_v27 }
 0x47a   : > { %3476 = vst.msk [vmem:[%s5155_s12 + $0x1d0] sm:$0xff] %vm304_vm12, %v3347_v22 }
 0x47b   : > { %v2947_v52 = vpop.xlane.xlu1 %2946  ;;  %3539 = vst.msk [vmem:[%s5155_s12 + $0x3c8] sm:$0xff] %vm304_vm12, %v3410_v11 }
 0x47c   : > { %v3345_v14 = vmax.f32 %v3217_v44, %v2947_v52  ;;  %v2956_v45 = vpop.xlane.xlu0 %2955 }
 0x47d   : > { %v3348_v31 = vmax.f32 %v3220_v57, %v2956_v45 }
 0x47e   : > { %3474 = vst.msk [vmem:[%s5155_s12 + $0x1c0] sm:$0xff] %vm304_vm12, %v3345_v14 }
 0x47f   : > { %v3151_v46 = vpop.xlane.xlu1 %3150  ;;  %3477 = vst.msk [vmem:[%s5155_s12 + $0x1d8] sm:$0xff] %vm304_vm12, %v3348_v31 }
 0x480   : > { %v3413_v0 = vmax.f32 %v3285_v4, %v3151_v46  ;;  %v2950_v36 = vpop.xlane.xlu0 %2949 }
 0x481   : > { %v3346_v19 = vmax.f32 %v3218_v49, %v2950_v36 }
 0x482   : > { %3542 = vst.msk [vmem:[%s5155_s12 + $0x3e0] sm:$0xff] %vm304_vm12, %v3413_v0 }
 0x483   : > { %v2965_v35 = vpop.xlane.xlu1 %2964  ;;  %3475 = vst.msk [vmem:[%s5155_s12 + $0x1c8] sm:$0xff] %vm304_vm12, %v3346_v19 }
 0x484   : > { %v3351_v37 = vmax.f32 %v3223_v42, %v2965_v35  ;;  %v3154_v59 = vpop.xlane.xlu0 %3153 }
 0x485   : > { %v3414_v7 = vmax.f32 %v3286_v56, %v3154_v59 }
 0x486   : > { %3480 = vst.msk [vmem:[%s5155_s12 + $0x1f0] sm:$0xff] %vm304_vm12, %v3351_v37 }
 0x487   : > { %v2959_v48 = vpop.xlane.xlu1 %2958  ;;  %3543 = vst.msk [vmem:[%s5155_s12 + $0x3e8] sm:$0xff] %vm304_vm12, %v3414_v7 }
 0x488   : > { %v3349_v55 = vmax.f32 %v3221_v41, %v2959_v48  ;;  %v2968_v5 = vpop.xlane.xlu0 %2967 }
 0x489   : > { %v3352_v26 = vmax.f32 %v3224_v24, %v2968_v5 }
 0x48a   : > { %3478 = vst.msk [vmem:[%s5155_s12 + $0x1e0] sm:$0xff] %vm304_vm12, %v3349_v55 }
 0x48b   : > { %v2977_v63 = vpop.xlane.xlu1 %2976  ;;  %3481 = vst.msk [vmem:[%s5155_s12 + $0x1f8] sm:$0xff] %vm304_vm12, %v3352_v26 }
 0x48c   : > { %v3355_v39 = vmax.f32 %v3227_v23, %v2977_v63  ;;  %v2962_v2 = vpop.xlane.xlu0 %2961 }
 0x48d   : > { %v3350_v62 = vmax.f32 %v3222_v17, %v2962_v2 }
 0x48e   : > { %3484 = vst.msk [vmem:[%s5155_s12 + $0x210] sm:$0xff] %vm304_vm12, %v3355_v39 }
 0x48f   : > { %v2971_v38 = vpop.xlane.xlu1 %2970  ;;  %3479 = vst.msk [vmem:[%s5155_s12 + $0x1e8] sm:$0xff] %vm304_vm12, %v3350_v62 }
 0x490   : > { %v3353_v34 = vmax.f32 %v3225_v20, %v2971_v38  ;;  %v2980_v60 = vpop.xlane.xlu0 %2979 }
 0x491   : > { %v3356_v15 = vmax.f32 %v3228_v51, %v2980_v60 }
 0x492   : > { %3482 = vst.msk [vmem:[%s5155_s12 + $0x200] sm:$0xff] %vm304_vm12, %v3353_v34 }
 0x493   : > { %v3157_v47 = vpop.xlane.xlu1 %3156  ;;  %3485 = vst.msk [vmem:[%s5155_s12 + $0x218] sm:$0xff] %vm304_vm12, %v3356_v15 }
 0x494   : > { %v3415_v53 = vmax.f32 %v3287_v61, %v3157_v47  ;;  %v2974_v50 = vpop.xlane.xlu0 %2973 }
 0x495   : > { %v3354_v12 = vmax.f32 %v3226_v18, %v2974_v50 }
 0x496   : > { %3544 = vst.msk [vmem:[%s5155_s12 + $0x3f0] sm:$0xff] %vm304_vm12, %v3415_v53 }
 0x497   : > { %3483 = vst.msk [vmem:[%s5155_s12 + $0x208] sm:$0xff] %vm304_vm12, %v3354_v12 }
 0x498   : > { %v3160_v21 = vpop.xlane.xlu0 %3159 }
 0x499   : > { %v3416_v54 = vmax.f32 %v3288_v30, %v3160_v21 }
 0x49b   : > { %3545 = vst.msk [vmem:[%s5155_s12 + $0x3f8] sm:$0xff] %vm304_vm12, %v3416_v54 }
 0x49c PF: > { %s17_s26 = sadd.s32 1, %s4121_s26   ;;  %s6754_s24 = smov %s4117_s25 }
 0x49d   : > { %p14_p5 = scmp.ge.s32.totalorder %s17_s26, 4   ;;  %s6755_s25 = smov %s6757_s27 }
 0x49f   :  { %16 = sbr.rel (!%p14_p5) target bundleno = 2 (0x2), region = 82 }

</bundles_post_ra>
